<compile_context>
chip_gen: v7x
topology: tpu7x:2x2x1
jax: 0.10.0
libtpu: 0.0.40
codegen_flags: <defaults>
</compile_context>

<pallas_src>
import functools

import jax
import jax.numpy as jnp
from jax import lax
from jax.experimental import pallas as pl
from jax.experimental.pallas import tpu as pltpu

NEG_SLOPE = 0.2   # LeakyReLU slope used by GATConv and HetGCNLayer
NEG_INF = -1e30


# -----------------------------------------------------------------------------
# Fused kernel: (metapath x head) GAT propagation + semantic attention
# -----------------------------------------------------------------------------
def _hmsg_fused_kernel(hs_ref, hsh_ref, hd_ref, alT_ref, arT_ref, adjT_ref,
                       w1_ref, b1_ref, w2t_ref, out_ref,
                       *, num_metapaths, num_heads, head_dim, has_er):
    M, H, D = num_metapaths, num_heads, head_dim
    f32, bf16 = jnp.float32, jnp.bfloat16

    hd = hd_ref[...]                                       # [Nd, H*D] bf16
    nd = hd.shape[0]

    # ---- per-metapath GAT / HetGCN-attention propagation (static unroll) ----
    z_list = []
    for m in range(M):
        hs = hs_ref[m]                                     # [Ns, H*D] bf16 (padded)
        alT = alT_ref[m]                                   # [H, H*D] bf16, block-diag rows

        # Packed attention dots: one MXU matmul covers all H heads.
        # elT[h, u] = <attn_l[h], hs[u, h*D:(h+1)*D]>
        elT = lax.dot_general(alT, hs, (((1,), (1,)), ((), ())),
                              preferred_element_type=f32)  # [H, Ns]
        if has_er[m]:
            arT = arT_ref[m]                               # [H, H*D] bf16
            # er[v, h] = <attn_r[h], hd[v, h*D:(h+1)*D]>
            er = lax.dot_general(hd, arT, (((1,), (1,)), ((), ())),
                                 preferred_element_type=f32)  # [Nd, H]

        # Edge mask hoisted out of the head loop (additive -inf bias; padded
        # source columns are masked too).
        adjm = adjT_ref[m].astype(f32)                     # [Nd, Ns] 0/1
        neg = jnp.where(adjm > 0, 0.0, NEG_INF)            # [Nd, Ns]

        head_outs = []
        for h in range(H):                                 # static unroll over heads
            if has_er[m]:
                s = elT[h:h + 1, :] + er[:, h:h + 1]       # [Nd, Ns]
            else:
                s = elT[h:h + 1, :]                        # [1, Ns] (HetGCN: el only)
            s = jnp.where(s >= 0, s, NEG_SLOPE * s)        # LeakyReLU
            masked = s + neg                               # broadcasts to [Nd, Ns]
            mrow = jnp.max(masked, axis=1, keepdims=True)  # [Nd, 1]
            # Masked entries are ~ -1e30 below the row max -> exp underflows to
            # exactly 0 (requires in-degree >= 1 per destination, as in IMDB).
            p = jnp.exp(masked - mrow)                     # [Nd, Ns]
            denom = jnp.sum(p, axis=1, keepdims=True)      # [Nd, 1]
            a = p * pl.reciprocal(jnp.maximum(denom, 1e-30), approx=True)
            head_outs.append(
                jnp.dot(a.astype(bf16), hsh_ref[m, h],     # [Nd,Ns]@[Ns,D] bf16 MXU
                        preferred_element_type=f32))       # [Nd, D]

        z = jnp.concatenate(head_outs, axis=1)             # [Nd, H*D] (== flatten(1))
        z = jnp.where(z > 0, z, jnp.exp(jnp.minimum(z, 0.0)) - 1.0)     # ELU
        z_list.append(z)

    # ---- semantic attention over the M metapath embeddings (fused) ----------
    w1 = w1_ref[...]                                       # [H*D, HID] bf16
    b1 = b1_ref[...]                                       # [1, HID] f32
    w2t = w2t_ref[...]                                     # [1, HID] f32

    z_all = jnp.concatenate(z_list, axis=0)                # [M*Nd, H*D] f32
    t = jnp.tanh(jnp.dot(z_all.astype(bf16), w1,
                         preferred_element_type=f32) + b1)  # [M*Nd, HID]
    wv = lax.dot_general(t, w2t, (((1,), (1,)), ((), ())),
                         preferred_element_type=f32)        # [M*Nd, 1]

    inv_nd = 1.0 / nd
    wms = [jnp.sum(wv[m * nd:(m + 1) * nd, :], axis=0, keepdims=True) * inv_nd
           for m in range(M)]                              # M x [1, 1]
    wmax = wms[0]
    for m in range(1, M):
        wmax = jnp.maximum(wmax, wms[m])
    es = [jnp.exp(w - wmax) for w in wms]
    den = es[0]
    for m in range(1, M):
        den = den + es[m]
    inv = 1.0 / den                                        # exact (scalar softmax)

    acc = (es[0] * inv) * z_list[0]                        # sum_m beta_m * z_m
    for m in range(1, M):
        acc = acc + (es[m] * inv) * z_list[m]
    out_ref[...] = acc                                     # [Nd, H*D] lane-dense store


# -----------------------------------------------------------------------------
# Wrapper
# -----------------------------------------------------------------------------
def _block_diag_rows(a, H, D):
    """[H, D] -> [H, H*D]; row h is nonzero only at columns h*D:(h+1)*D."""
    eye = jnp.eye(H, dtype=a.dtype)
    return jnp.einsum('hd,hg->hgd', a, eye).reshape(H, H * D)


def hmsg_layer_forward(h_dst, h_src_list, adj_list, attn_l_list, attn_r_list,
                       W1, b1, w2, *, num_heads, in_size):
    """Fused HMSGLayer forward for the 'movie' destination node type.

    h_dst          : [Nd, H*D]   destination (movie) features
    h_src_list[m]  : [Ns_m, H*D] source features for metapath m
    adj_list[m]    : [Ns_m, Nd]  0/1 adjacency, adj[u, v] = 1 iff edge u -> v
    attn_l_list[m] : [H, D]      per-metapath attn_l
    attn_r_list[m] : [H, D] or None (None => HetGCNLayer 'attention', el only)
    W1:[H*D,HID] b1:[HID] w2:[HID,1]  SemanticAttention parameters
    returns        : [Nd, H*D]
    """
    H, D = num_heads, in_size
    F = H * D
    M = len(h_src_list)
    Nd = int(h_dst.shape[0])
    HID = int(W1.shape[1])
    Ns_max = max(int(x.shape[0]) for x in h_src_list)
    f32, bf16 = jnp.float32, jnp.bfloat16

    has_er = tuple(ar is not None for ar in attn_r_list)

    # TODO(synk): cache these layout transforms per graph / per parameter set
    # instead of re-emitting the pad/stack/transpose HLOs on every call.
    hs_stack = jnp.stack(
        [jnp.pad(x.astype(f32), ((0, Ns_max - x.shape[0]), (0, 0)))
         for x in h_src_list]).astype(bf16)                       # [M, Ns_max, F]
    hs_heads = hs_stack.reshape(M, Ns_max, H, D).transpose(0, 2, 1, 3)  # [M,H,Ns,D]
    adjT_stack = jnp.stack(
        [jnp.pad(a.T, ((0, 0), (0, Ns_max - a.shape[0]))) for a in adj_list]
    ).astype(jnp.int8)                                            # [M, Nd, Ns_max]
    alT_stack = jnp.stack(
        [_block_diag_rows(a.astype(f32), H, D) for a in attn_l_list]
    ).astype(bf16)                                                # [M, H, F]
    arT_stack = jnp.stack(
        [_block_diag_rows((a if a is not None
                           else jnp.zeros((H, D), f32)).astype(f32), H, D)
         for a in attn_r_list]).astype(bf16)                      # [M, H, F]

    kernel = functools.partial(_hmsg_fused_kernel, num_metapaths=M,
                               num_heads=H, head_dim=D, has_er=has_er)

    # Advisory cost estimate so XLA schedules around this (tiny) custom call.
    flops = int(M * 2 * H * F * Ns_max
                + sum(has_er) * 2 * Nd * F * H
                + M * H * (2 * Nd * Ns_max * D + 10 * Nd * Ns_max)
                + 2 * M * Nd * F * HID + 2 * M * Nd * HID
                + 2 * M * Nd * F)
    transcendentals = int(M * H * Nd * Ns_max + M * Nd * HID + M * Nd * F + 8)
    bytes_accessed = int(2 * (hs_stack.size + hs_heads.size + h_dst.size
                              + alT_stack.size + arT_stack.size + W1.size)
                         + adjT_stack.size
                         + 4 * (b1.size + w2.size + Nd * F))

    return pl.pallas_call(
        kernel,
        out_shape=jax.ShapeDtypeStruct((Nd, F), f32),
        grid=(1,),
        in_specs=[
            pl.BlockSpec((M, Ns_max, F), lambda i: (0, 0, 0)),       # hs_stack
            pl.BlockSpec((M, H, Ns_max, D), lambda i: (0, 0, 0, 0)), # hs_heads
            pl.BlockSpec((Nd, F), lambda i: (0, 0)),                 # h_dst
            pl.BlockSpec((M, H, F), lambda i: (0, 0, 0)),            # attn_l packed
            pl.BlockSpec((M, H, F), lambda i: (0, 0, 0)),            # attn_r packed
            pl.BlockSpec((M, Nd, Ns_max), lambda i: (0, 0, 0)),      # adjT (int8)
            pl.BlockSpec((F, HID), lambda i: (0, 0)),                # W1
            pl.BlockSpec((1, HID), lambda i: (0, 0)),                # b1
            pl.BlockSpec((1, HID), lambda i: (0, 0)),                # w2^T
        ],
        out_specs=pl.BlockSpec((Nd, F), lambda i: (0, 0)),
        compiler_params=pltpu.CompilerParams(
            dimension_semantics=("arbitrary",)),
        cost_estimate=pl.CostEstimate(flops=flops,
                                      transcendentals=transcendentals,
                                      bytes_accessed=bytes_accessed),
    )(hs_stack, hs_heads, h_dst.astype(bf16), alT_stack, arT_stack, adjT_stack,
      W1.astype(bf16), b1.reshape(1, HID).astype(f32),
      w2.reshape(1, HID).astype(f32))


# -----------------------------------------------------------------------------
# Pure-JAX references (correctness check, f32 throughout)
# -----------------------------------------------------------------------------
def _gat_ref(h_src, h_dst, attn_l, attn_r, adj, H, D):
    Ns, Nd = h_src.shape[0], h_dst.shape[0]
    hs = h_src.reshape(Ns, H, D)
    hd = h_dst.reshape(Nd, H, D)
    el = (hs * attn_l[None]).sum(-1)                 # [Ns, H]
    er = (hd * attn_r[None]).sum(-1)                 # [Nd, H]
    e = el[:, None, :] + er[None, :, :]              # [Ns, Nd, H]
    e = jnp.where(e >= 0, e, NEG_SLOPE * e)
    mask = (adj > 0)[:, :, None]
    e = jnp.where(mask, e, NEG_INF)
    emax = jnp.max(e, axis=0, keepdims=True)
    p = jnp.where(mask, jnp.exp(e - emax), 0.0)
    denom = p.sum(0, keepdims=True)
    a = p / jnp.maximum(denom, 1e-30)
    out = jnp.einsum('uvh,uhd->vhd', a, hs)
    out = jnp.where(out > 0, out, jnp.exp(out) - 1.0)
    return out.reshape(Nd, H * D)


def _sem_ref(z_nmf, W1, b1, w2):
    w = jnp.tanh(z_nmf @ W1 + b1) @ w2               # [N, M, 1]
    w = w.mean(0)                                    # [M, 1]
    beta = jax.nn.softmax(w, axis=0)                 # [M, 1]
    return (beta[None] * z_nmf).sum(1)               # [N, F]


# -----------------------------------------------------------------------------
if __name__ == "__main__":
    D = 8            # in_size (per-head feature dim)
    H = 4            # layer_num_heads
    F = D * H        # node feature dim == in_size * num_heads
    HID = 128        # SemanticAttention hidden size (module default)
    Nm, Na, Ndir = 16, 12, 8

    keys = jax.random.split(jax.random.PRNGKey(0), 16)
    h_movie = jax.random.normal(keys[0], (Nm, F), jnp.float32)
    h_actor = jax.random.normal(keys[1], (Na, F), jnp.float32)
    h_director = jax.random.normal(keys[2], (Ndir, F), jnp.float32)

    # Bipartite adjacency (actor->movie, director->movie); ensure each movie
    # has at least one actor and one director (in-degree >= 1 everywhere).
    A_am = (jax.random.uniform(keys[3], (Na, Nm)) < 0.35).astype(jnp.float32)
    A_dm = (jax.random.uniform(keys[4], (Ndir, Nm)) < 0.35).astype(jnp.float32)
    mv = jnp.arange(Nm)
    A_am = A_am.at[mv % Na, mv].set(1.0)
    A_dm = A_dm.at[mv % Ndir, mv].set(1.0)
    # metapath-reachable homogeneous movie->movie graphs ('ma','am'), ('md','dm')
    A_mam = (jnp.dot(A_am.T, A_am) > 0).astype(jnp.float32)     # [Nm, Nm]
    A_mdm = (jnp.dot(A_dm.T, A_dm) > 0).astype(jnp.float32)     # [Nm, Nm]

    # deterministic parameter init (shapes as in the module __init__)
    std_a = 1.414 * (2.0 / (H * D + D)) ** 0.5
    attn_l = [jax.random.normal(keys[5 + i], (H, D), jnp.float32) * std_a
              for i in range(4)]
    attn_r = [jax.random.normal(keys[9 + i], (H, D), jnp.float32) * std_a
              for i in range(2)]
    zeros_attn = jnp.zeros((H, D), jnp.float32)
    W1 = jax.random.normal(keys[11], (F, HID), jnp.float32) * (1.0 / F ** 0.5)
    b1 = jax.random.normal(keys[12], (HID,), jnp.float32) * 0.1
    w2 = jax.random.normal(keys[13], (HID, 1), jnp.float32) * (1.0 / HID ** 0.5)

    # meta_paths = [('ma','am'), ('md','dm'), ('am',), ('dm',)]
    # first two -> GATConv on movie graphs, last two -> HetGCNLayer (attention,
    # el only => attn_r is None and the er path is statically skipped).
    out_movie = hmsg_layer_forward(
        h_movie,
        [h_movie, h_movie, h_actor, h_director],
        [A_mam, A_mdm, A_am, A_dm],
        [attn_l[0], attn_l[1], attn_l[2], attn_l[3]],
        [attn_r[0], attn_r[1], None, None],
        W1, b1, w2, num_heads=H, in_size=D)
    out_movie = jax.block_until_ready(out_movie)

    # ----- reference check -----
    r0 = _gat_ref(h_movie, h_movie, attn_l[0], attn_r[0], A_mam, H, D)
    r1 = _gat_ref(h_movie, h_movie, attn_l[1], attn_r[1], A_mdm, H, D)
    r2 = _gat_ref(h_actor, h_movie, attn_l[2], zeros_attn, A_am, H, D)
    r3 = _gat_ref(h_director, h_movie, attn_l[3], zeros_attn, A_dm, H, D)
    z_ref_nmf = jnp.stack([r0, r1, r2, r3], axis=1)              # [Nm, M, F]
    ref_out = _sem_ref(z_ref_nmf, W1, b1, w2)

    # tolerance accounts for bf16 MXU operands + approx reciprocal in the
    # edge softmax (reference is pure f32)
    err = float(jnp.max(jnp.abs(out_movie - ref_out)))
    assert jnp.allclose(out_movie, ref_out, atol=2e-2, rtol=2e-2), err
    print("KERNEL_OK")
</pallas_src>

<mosaic_0001>
module attributes {stable_mosaic.version = 11 : i64} {
  func.func @_hmsg_fused_kernel(%arg0: i32, %arg1: memref<4x16x32xbf16, #tpu.memory_space<vmem>>, %arg2: memref<4x4x16x8xbf16, #tpu.memory_space<vmem>>, %arg3: memref<16x32xbf16, #tpu.memory_space<vmem>>, %arg4: memref<4x4x32xbf16, #tpu.memory_space<vmem>>, %arg5: memref<4x4x32xbf16, #tpu.memory_space<vmem>>, %arg6: memref<4x16x16xi8, #tpu.memory_space<vmem>>, %arg7: memref<32x128xbf16, #tpu.memory_space<vmem>>, %arg8: memref<1x128xf32, #tpu.memory_space<vmem>>, %arg9: memref<1x128xf32, #tpu.memory_space<vmem>>, %arg10: memref<16x32xf32, #tpu.memory_space<vmem>>) attributes {dimension_semantics = [#tpu.dimension_semantics<arbitrary>], iteration_bounds = array<i64: 1>, scalar_prefetch = 0 : i64, scratch_operands = 0 : i64, tpu.core_type = #tpu.core_type<tc>, window_params = [{pipeline_mode = #tpu.pipeline_mode<synchronous>, transform_indices = @transform_0, window_bounds = array<i64: 4, 16, 32>}, {pipeline_mode = #tpu.pipeline_mode<synchronous>, transform_indices = @transform_1, window_bounds = array<i64: 4, 4, 16, 8>}, {pipeline_mode = #tpu.pipeline_mode<synchronous>, transform_indices = @transform_2, window_bounds = array<i64: 16, 32>}, {pipeline_mode = #tpu.pipeline_mode<synchronous>, transform_indices = @transform_3, window_bounds = array<i64: 4, 4, 32>}, {pipeline_mode = #tpu.pipeline_mode<synchronous>, transform_indices = @transform_4, window_bounds = array<i64: 4, 4, 32>}, {pipeline_mode = #tpu.pipeline_mode<synchronous>, transform_indices = @transform_5, window_bounds = array<i64: 4, 16, 16>}, {pipeline_mode = #tpu.pipeline_mode<synchronous>, transform_indices = @transform_6, window_bounds = array<i64: 32, 128>}, {pipeline_mode = #tpu.pipeline_mode<synchronous>, transform_indices = @transform_7, window_bounds = array<i64: 1, 128>}, {pipeline_mode = #tpu.pipeline_mode<synchronous>, transform_indices = @transform_8, window_bounds = array<i64: 1, 128>}, {pipeline_mode = #tpu.pipeline_mode<synchronous>, transform_indices = @transform_9, window_bounds = array<i64: 16, 32>}]} {
    %c0 = arith.constant 0 : index
    %c0_0 = arith.constant 0 : index
    %0 = vector.load %arg3[%c0, %c0_0] : memref<16x32xbf16, #tpu.memory_space<vmem>>, vector<16x32xbf16>
    %c0_1 = arith.constant 0 : index
    %c0_2 = arith.constant 0 : index
    %c0_3 = arith.constant 0 : index
    %1 = vector.load %arg1[%c0_1, %c0_2, %c0_3] : memref<4x16x32xbf16, #tpu.memory_space<vmem>>, vector<1x16x32xbf16>
    %2 = vector.shape_cast %1 : vector<1x16x32xbf16> to vector<16x32xbf16>
    %c0_4 = arith.constant 0 : index
    %c0_5 = arith.constant 0 : index
    %c0_6 = arith.constant 0 : index
    %3 = vector.load %arg4[%c0_4, %c0_5, %c0_6] : memref<4x4x32xbf16, #tpu.memory_space<vmem>>, vector<1x4x32xbf16>
    %4 = vector.shape_cast %3 : vector<1x4x32xbf16> to vector<4x32xbf16>
    %cst = arith.constant dense<0.000000e+00> : vector<4x16xf32>
    %5 = tpu.matmul %4, %2, %cst {dimension_numbers = #tpu.dot_dimension_numbers<[1], [1], [0], [0], [0, 0, 1, 0], [], []>} : vector<4x32xbf16>, vector<16x32xbf16>, vector<4x16xf32> -> vector<4x16xf32>
    %c0_7 = arith.constant 0 : index
    %c0_8 = arith.constant 0 : index
    %c0_9 = arith.constant 0 : index
    %6 = vector.load %arg5[%c0_7, %c0_8, %c0_9] : memref<4x4x32xbf16, #tpu.memory_space<vmem>>, vector<1x4x32xbf16>
    %7 = vector.shape_cast %6 : vector<1x4x32xbf16> to vector<4x32xbf16>
    %cst_10 = arith.constant dense<0.000000e+00> : vector<16x4xf32>
    %8 = tpu.matmul %0, %7, %cst_10 {dimension_numbers = #tpu.dot_dimension_numbers<[1], [1], [0], [0], [0, 0, 1, 0], [], []>} : vector<16x32xbf16>, vector<4x32xbf16>, vector<16x4xf32> -> vector<16x4xf32>
    %c0_11 = arith.constant 0 : index
    %c0_12 = arith.constant 0 : index
    %c0_13 = arith.constant 0 : index
    %9 = vector.load %arg6[%c0_11, %c0_12, %c0_13] : memref<4x16x16xi8, #tpu.memory_space<vmem>>, vector<1x16x16xi8>
    %10 = vector.shape_cast %9 : vector<1x16x16xi8> to vector<16x16xi8>
    %11 = arith.sitofp %10 : vector<16x16xi8> to vector<16x16xf32>
    %cst_14 = arith.constant 0.000000e+00 : f32
    %12 = vector.broadcast %cst_14 : f32 to vector<16x16xf32>
    %13 = arith.cmpf ogt, %11, %12 : vector<16x16xf32>
    %cst_15 = arith.constant 0.000000e+00 : f32
    %cst_16 = arith.constant -1.000000e+30 : f32
    %14 = vector.broadcast %cst_15 : f32 to vector<16x16xf32>
    %15 = vector.broadcast %cst_16 : f32 to vector<16x16xf32>
    %16 = arith.select %13, %14, %15 : vector<16x16xi1>, vector<16x16xf32>
    %17 = vector.extract_strided_slice %5 {offsets = [0, 0], sizes = [1, 16], strides = [1, 1]} : vector<4x16xf32> to vector<1x16xf32>
    %18 = vector.extract_strided_slice %8 {offsets = [0, 0], sizes = [16, 1], strides = [1, 1]} : vector<16x4xf32> to vector<16x1xf32>
    %19 = vector.broadcast %17 : vector<1x16xf32> to vector<16x16xf32>
    %20 = vector.broadcast %18 : vector<16x1xf32> to vector<16x16xf32>
    %21 = arith.addf %19, %20 : vector<16x16xf32>
    %cst_17 = arith.constant 0.000000e+00 : f32
    %22 = vector.broadcast %cst_17 : f32 to vector<16x16xf32>
    %23 = arith.cmpf oge, %21, %22 : vector<16x16xf32>
    %cst_18 = arith.constant 2.000000e-01 : f32
    %24 = vector.broadcast %cst_18 : f32 to vector<16x16xf32>
    %25 = arith.mulf %24, %21 : vector<16x16xf32>
    %26 = arith.select %23, %21, %25 : vector<16x16xi1>, vector<16x16xf32>
    %27 = arith.addf %26, %16 : vector<16x16xf32>
    %cst_19 = arith.constant dense<0xFF800000> : vector<16xf32>
    %28 = vector.multi_reduction <maximumf>, %27, %cst_19 [1] : vector<16x16xf32> to vector<16xf32>
    %29 = vector.shape_cast %28 : vector<16xf32> to vector<16x1xf32>
    %30 = vector.broadcast %29 : vector<16x1xf32> to vector<16x16xf32>
    %31 = arith.subf %27, %30 : vector<16x16xf32>
    %32 = math.exp %31 : vector<16x16xf32>
    %cst_20 = arith.constant dense<0.000000e+00> : vector<16xf32>
    %33 = vector.multi_reduction <add>, %32, %cst_20 [1] : vector<16x16xf32> to vector<16xf32>
    %34 = vector.shape_cast %33 : vector<16xf32> to vector<16x1xf32>
    %cst_21 = arith.constant 1.000000e-30 : f32
    %35 = vector.broadcast %cst_21 : f32 to vector<16x1xf32>
    %36 = arith.maximumf %34, %35 : vector<16x1xf32>
    %37 = tpu.reciprocal %36 {approx = true} : vector<16x1xf32> -> vector<16x1xf32>
    %38 = vector.broadcast %37 : vector<16x1xf32> to vector<16x16xf32>
    %39 = arith.mulf %32, %38 : vector<16x16xf32>
    %40 = arith.truncf %39 : vector<16x16xf32> to vector<16x16xbf16>
    %c0_22 = arith.constant 0 : index
    %c0_23 = arith.constant 0 : index
    %c0_24 = arith.constant 0 : index
    %c0_25 = arith.constant 0 : index
    %41 = vector.load %arg2[%c0_22, %c0_23, %c0_24, %c0_25] : memref<4x4x16x8xbf16, #tpu.memory_space<vmem>>, vector<1x1x16x8xbf16>
    %42 = vector.shape_cast %41 : vector<1x1x16x8xbf16> to vector<16x8xbf16>
    %cst_26 = arith.constant dense<0.000000e+00> : vector<16x8xf32>
    %43 = tpu.matmul %40, %42, %cst_26 {dimension_numbers = #tpu.dot_dimension_numbers<[1], [0], [0], [1], [0, 0, 1, 1], [], []>} : vector<16x16xbf16>, vector<16x8xbf16>, vector<16x8xf32> -> vector<16x8xf32>
    %44 = vector.extract_strided_slice %5 {offsets = [1, 0], sizes = [1, 16], strides = [1, 1]} : vector<4x16xf32> to vector<1x16xf32>
    %45 = vector.extract_strided_slice %8 {offsets = [0, 1], sizes = [16, 1], strides = [1, 1]} : vector<16x4xf32> to vector<16x1xf32>
    %46 = vector.broadcast %44 : vector<1x16xf32> to vector<16x16xf32>
    %47 = vector.broadcast %45 : vector<16x1xf32> to vector<16x16xf32>
    %48 = arith.addf %46, %47 : vector<16x16xf32>
    %cst_27 = arith.constant 0.000000e+00 : f32
    %49 = vector.broadcast %cst_27 : f32 to vector<16x16xf32>
    %50 = arith.cmpf oge, %48, %49 : vector<16x16xf32>
    %cst_28 = arith.constant 2.000000e-01 : f32
    %51 = vector.broadcast %cst_28 : f32 to vector<16x16xf32>
    %52 = arith.mulf %51, %48 : vector<16x16xf32>
    %53 = arith.select %50, %48, %52 : vector<16x16xi1>, vector<16x16xf32>
    %54 = arith.addf %53, %16 : vector<16x16xf32>
    %cst_29 = arith.constant dense<0xFF800000> : vector<16xf32>
    %55 = vector.multi_reduction <maximumf>, %54, %cst_29 [1] : vector<16x16xf32> to vector<16xf32>
    %56 = vector.shape_cast %55 : vector<16xf32> to vector<16x1xf32>
    %57 = vector.broadcast %56 : vector<16x1xf32> to vector<16x16xf32>
    %58 = arith.subf %54, %57 : vector<16x16xf32>
    %59 = math.exp %58 : vector<16x16xf32>
    %cst_30 = arith.constant dense<0.000000e+00> : vector<16xf32>
    %60 = vector.multi_reduction <add>, %59, %cst_30 [1] : vector<16x16xf32> to vector<16xf32>
    %61 = vector.shape_cast %60 : vector<16xf32> to vector<16x1xf32>
    %cst_31 = arith.constant 1.000000e-30 : f32
    %62 = vector.broadcast %cst_31 : f32 to vector<16x1xf32>
    %63 = arith.maximumf %61, %62 : vector<16x1xf32>
    %64 = tpu.reciprocal %63 {approx = true} : vector<16x1xf32> -> vector<16x1xf32>
    %65 = vector.broadcast %64 : vector<16x1xf32> to vector<16x16xf32>
    %66 = arith.mulf %59, %65 : vector<16x16xf32>
    %67 = arith.truncf %66 : vector<16x16xf32> to vector<16x16xbf16>
    %c0_32 = arith.constant 0 : index
    %c1 = arith.constant 1 : index
    %c0_33 = arith.constant 0 : index
    %c0_34 = arith.constant 0 : index
    %68 = vector.load %arg2[%c0_32, %c1, %c0_33, %c0_34] : memref<4x4x16x8xbf16, #tpu.memory_space<vmem>>, vector<1x1x16x8xbf16>
    %69 = vector.shape_cast %68 : vector<1x1x16x8xbf16> to vector<16x8xbf16>
    %cst_35 = arith.constant dense<0.000000e+00> : vector<16x8xf32>
    %70 = tpu.matmul %67, %69, %cst_35 {dimension_numbers = #tpu.dot_dimension_numbers<[1], [0], [0], [1], [0, 0, 1, 1], [], []>} : vector<16x16xbf16>, vector<16x8xbf16>, vector<16x8xf32> -> vector<16x8xf32>
    %71 = vector.extract_strided_slice %5 {offsets = [2, 0], sizes = [1, 16], strides = [1, 1]} : vector<4x16xf32> to vector<1x16xf32>
    %72 = vector.extract_strided_slice %8 {offsets = [0, 2], sizes = [16, 1], strides = [1, 1]} : vector<16x4xf32> to vector<16x1xf32>
    %73 = vector.broadcast %71 : vector<1x16xf32> to vector<16x16xf32>
    %74 = vector.broadcast %72 : vector<16x1xf32> to vector<16x16xf32>
    %75 = arith.addf %73, %74 : vector<16x16xf32>
    %cst_36 = arith.constant 0.000000e+00 : f32
    %76 = vector.broadcast %cst_36 : f32 to vector<16x16xf32>
    %77 = arith.cmpf oge, %75, %76 : vector<16x16xf32>
    %cst_37 = arith.constant 2.000000e-01 : f32
    %78 = vector.broadcast %cst_37 : f32 to vector<16x16xf32>
    %79 = arith.mulf %78, %75 : vector<16x16xf32>
    %80 = arith.select %77, %75, %79 : vector<16x16xi1>, vector<16x16xf32>
    %81 = arith.addf %80, %16 : vector<16x16xf32>
    %cst_38 = arith.constant dense<0xFF800000> : vector<16xf32>
    %82 = vector.multi_reduction <maximumf>, %81, %cst_38 [1] : vector<16x16xf32> to vector<16xf32>
    %83 = vector.shape_cast %82 : vector<16xf32> to vector<16x1xf32>
    %84 = vector.broadcast %83 : vector<16x1xf32> to vector<16x16xf32>
    %85 = arith.subf %81, %84 : vector<16x16xf32>
    %86 = math.exp %85 : vector<16x16xf32>
    %cst_39 = arith.constant dense<0.000000e+00> : vector<16xf32>
    %87 = vector.multi_reduction <add>, %86, %cst_39 [1] : vector<16x16xf32> to vector<16xf32>
    %88 = vector.shape_cast %87 : vector<16xf32> to vector<16x1xf32>
    %cst_40 = arith.constant 1.000000e-30 : f32
    %89 = vector.broadcast %cst_40 : f32 to vector<16x1xf32>
    %90 = arith.maximumf %88, %89 : vector<16x1xf32>
    %91 = tpu.reciprocal %90 {approx = true} : vector<16x1xf32> -> vector<16x1xf32>
    %92 = vector.broadcast %91 : vector<16x1xf32> to vector<16x16xf32>
    %93 = arith.mulf %86, %92 : vector<16x16xf32>
    %94 = arith.truncf %93 : vector<16x16xf32> to vector<16x16xbf16>
    %c0_41 = arith.constant 0 : index
    %c2 = arith.constant 2 : index
    %c0_42 = arith.constant 0 : index
    %c0_43 = arith.constant 0 : index
    %95 = vector.load %arg2[%c0_41, %c2, %c0_42, %c0_43] : memref<4x4x16x8xbf16, #tpu.memory_space<vmem>>, vector<1x1x16x8xbf16>
    %96 = vector.shape_cast %95 : vector<1x1x16x8xbf16> to vector<16x8xbf16>
    %cst_44 = arith.constant dense<0.000000e+00> : vector<16x8xf32>
    %97 = tpu.matmul %94, %96, %cst_44 {dimension_numbers = #tpu.dot_dimension_numbers<[1], [0], [0], [1], [0, 0, 1, 1], [], []>} : vector<16x16xbf16>, vector<16x8xbf16>, vector<16x8xf32> -> vector<16x8xf32>
    %98 = vector.extract_strided_slice %5 {offsets = [3, 0], sizes = [1, 16], strides = [1, 1]} : vector<4x16xf32> to vector<1x16xf32>
    %99 = vector.extract_strided_slice %8 {offsets = [0, 3], sizes = [16, 1], strides = [1, 1]} : vector<16x4xf32> to vector<16x1xf32>
    %100 = vector.broadcast %98 : vector<1x16xf32> to vector<16x16xf32>
    %101 = vector.broadcast %99 : vector<16x1xf32> to vector<16x16xf32>
    %102 = arith.addf %100, %101 : vector<16x16xf32>
    %cst_45 = arith.constant 0.000000e+00 : f32
    %103 = vector.broadcast %cst_45 : f32 to vector<16x16xf32>
    %104 = arith.cmpf oge, %102, %103 : vector<16x16xf32>
    %cst_46 = arith.constant 2.000000e-01 : f32
    %105 = vector.broadcast %cst_46 : f32 to vector<16x16xf32>
    %106 = arith.mulf %105, %102 : vector<16x16xf32>
    %107 = arith.select %104, %102, %106 : vector<16x16xi1>, vector<16x16xf32>
    %108 = arith.addf %107, %16 : vector<16x16xf32>
    %cst_47 = arith.constant dense<0xFF800000> : vector<16xf32>
    %109 = vector.multi_reduction <maximumf>, %108, %cst_47 [1] : vector<16x16xf32> to vector<16xf32>
    %110 = vector.shape_cast %109 : vector<16xf32> to vector<16x1xf32>
    %111 = vector.broadcast %110 : vector<16x1xf32> to vector<16x16xf32>
    %112 = arith.subf %108, %111 : vector<16x16xf32>
    %113 = math.exp %112 : vector<16x16xf32>
    %cst_48 = arith.constant dense<0.000000e+00> : vector<16xf32>
    %114 = vector.multi_reduction <add>, %113, %cst_48 [1] : vector<16x16xf32> to vector<16xf32>
    %115 = vector.shape_cast %114 : vector<16xf32> to vector<16x1xf32>
    %cst_49 = arith.constant 1.000000e-30 : f32
    %116 = vector.broadcast %cst_49 : f32 to vector<16x1xf32>
    %117 = arith.maximumf %115, %116 : vector<16x1xf32>
    %118 = tpu.reciprocal %117 {approx = true} : vector<16x1xf32> -> vector<16x1xf32>
    %119 = vector.broadcast %118 : vector<16x1xf32> to vector<16x16xf32>
    %120 = arith.mulf %113, %119 : vector<16x16xf32>
    %121 = arith.truncf %120 : vector<16x16xf32> to vector<16x16xbf16>
    %c0_50 = arith.constant 0 : index
    %c3 = arith.constant 3 : index
    %c0_51 = arith.constant 0 : index
    %c0_52 = arith.constant 0 : index
    %122 = vector.load %arg2[%c0_50, %c3, %c0_51, %c0_52] : memref<4x4x16x8xbf16, #tpu.memory_space<vmem>>, vector<1x1x16x8xbf16>
    %123 = vector.shape_cast %122 : vector<1x1x16x8xbf16> to vector<16x8xbf16>
    %cst_53 = arith.constant dense<0.000000e+00> : vector<16x8xf32>
    %124 = tpu.matmul %121, %123, %cst_53 {dimension_numbers = #tpu.dot_dimension_numbers<[1], [0], [0], [1], [0, 0, 1, 1], [], []>} : vector<16x16xbf16>, vector<16x8xbf16>, vector<16x8xf32> -> vector<16x8xf32>
    %125 = tpu.concatenate %43, %70, %97, %124 in 1 : vector<16x8xf32>, vector<16x8xf32>, vector<16x8xf32>, vector<16x8xf32> -> vector<16x32xf32>
    %cst_54 = arith.constant 0.000000e+00 : f32
    %126 = vector.broadcast %cst_54 : f32 to vector<16x32xf32>
    %127 = arith.cmpf ogt, %125, %126 : vector<16x32xf32>
    %cst_55 = arith.constant 0.000000e+00 : f32
    %128 = vector.broadcast %cst_55 : f32 to vector<16x32xf32>
    %129 = arith.minimumf %125, %128 : vector<16x32xf32>
    %130 = math.exp %129 : vector<16x32xf32>
    %cst_56 = arith.constant 1.000000e+00 : f32
    %131 = vector.broadcast %cst_56 : f32 to vector<16x32xf32>
    %132 = arith.subf %130, %131 : vector<16x32xf32>
    %133 = arith.select %127, %125, %132 : vector<16x32xi1>, vector<16x32xf32>
    %c1_57 = arith.constant 1 : index
    %c0_58 = arith.constant 0 : index
    %c0_59 = arith.constant 0 : index
    %134 = vector.load %arg1[%c1_57, %c0_58, %c0_59] : memref<4x16x32xbf16, #tpu.memory_space<vmem>>, vector<1x16x32xbf16>
    %135 = vector.shape_cast %134 : vector<1x16x32xbf16> to vector<16x32xbf16>
    %c1_60 = arith.constant 1 : index
    %c0_61 = arith.constant 0 : index
    %c0_62 = arith.constant 0 : index
    %136 = vector.load %arg4[%c1_60, %c0_61, %c0_62] : memref<4x4x32xbf16, #tpu.memory_space<vmem>>, vector<1x4x32xbf16>
    %137 = vector.shape_cast %136 : vector<1x4x32xbf16> to vector<4x32xbf16>
    %cst_63 = arith.constant dense<0.000000e+00> : vector<4x16xf32>
    %138 = tpu.matmul %137, %135, %cst_63 {dimension_numbers = #tpu.dot_dimension_numbers<[1], [1], [0], [0], [0, 0, 1, 0], [], []>} : vector<4x32xbf16>, vector<16x32xbf16>, vector<4x16xf32> -> vector<4x16xf32>
    %c1_64 = arith.constant 1 : index
    %c0_65 = arith.constant 0 : index
    %c0_66 = arith.constant 0 : index
    %139 = vector.load %arg5[%c1_64, %c0_65, %c0_66] : memref<4x4x32xbf16, #tpu.memory_space<vmem>>, vector<1x4x32xbf16>
    %140 = vector.shape_cast %139 : vector<1x4x32xbf16> to vector<4x32xbf16>
    %cst_67 = arith.constant dense<0.000000e+00> : vector<16x4xf32>
    %141 = tpu.matmul %0, %140, %cst_67 {dimension_numbers = #tpu.dot_dimension_numbers<[1], [1], [0], [0], [0, 0, 1, 0], [], []>} : vector<16x32xbf16>, vector<4x32xbf16>, vector<16x4xf32> -> vector<16x4xf32>
    %c1_68 = arith.constant 1 : index
    %c0_69 = arith.constant 0 : index
    %c0_70 = arith.constant 0 : index
    %142 = vector.load %arg6[%c1_68, %c0_69, %c0_70] : memref<4x16x16xi8, #tpu.memory_space<vmem>>, vector<1x16x16xi8>
    %143 = vector.shape_cast %142 : vector<1x16x16xi8> to vector<16x16xi8>
    %144 = arith.sitofp %143 : vector<16x16xi8> to vector<16x16xf32>
    %cst_71 = arith.constant 0.000000e+00 : f32
    %145 = vector.broadcast %cst_71 : f32 to vector<16x16xf32>
    %146 = arith.cmpf ogt, %144, %145 : vector<16x16xf32>
    %cst_72 = arith.constant 0.000000e+00 : f32
    %cst_73 = arith.constant -1.000000e+30 : f32
    %147 = vector.broadcast %cst_72 : f32 to vector<16x16xf32>
    %148 = vector.broadcast %cst_73 : f32 to vector<16x16xf32>
    %149 = arith.select %146, %147, %148 : vector<16x16xi1>, vector<16x16xf32>
    %150 = vector.extract_strided_slice %138 {offsets = [0, 0], sizes = [1, 16], strides = [1, 1]} : vector<4x16xf32> to vector<1x16xf32>
    %151 = vector.extract_strided_slice %141 {offsets = [0, 0], sizes = [16, 1], strides = [1, 1]} : vector<16x4xf32> to vector<16x1xf32>
    %152 = vector.broadcast %150 : vector<1x16xf32> to vector<16x16xf32>
    %153 = vector.broadcast %151 : vector<16x1xf32> to vector<16x16xf32>
    %154 = arith.addf %152, %153 : vector<16x16xf32>
    %cst_74 = arith.constant 0.000000e+00 : f32
    %155 = vector.broadcast %cst_74 : f32 to vector<16x16xf32>
    %156 = arith.cmpf oge, %154, %155 : vector<16x16xf32>
    %cst_75 = arith.constant 2.000000e-01 : f32
    %157 = vector.broadcast %cst_75 : f32 to vector<16x16xf32>
    %158 = arith.mulf %157, %154 : vector<16x16xf32>
    %159 = arith.select %156, %154, %158 : vector<16x16xi1>, vector<16x16xf32>
    %160 = arith.addf %159, %149 : vector<16x16xf32>
    %cst_76 = arith.constant dense<0xFF800000> : vector<16xf32>
    %161 = vector.multi_reduction <maximumf>, %160, %cst_76 [1] : vector<16x16xf32> to vector<16xf32>
    %162 = vector.shape_cast %161 : vector<16xf32> to vector<16x1xf32>
    %163 = vector.broadcast %162 : vector<16x1xf32> to vector<16x16xf32>
    %164 = arith.subf %160, %163 : vector<16x16xf32>
    %165 = math.exp %164 : vector<16x16xf32>
    %cst_77 = arith.constant dense<0.000000e+00> : vector<16xf32>
    %166 = vector.multi_reduction <add>, %165, %cst_77 [1] : vector<16x16xf32> to vector<16xf32>
    %167 = vector.shape_cast %166 : vector<16xf32> to vector<16x1xf32>
    %cst_78 = arith.constant 1.000000e-30 : f32
    %168 = vector.broadcast %cst_78 : f32 to vector<16x1xf32>
    %169 = arith.maximumf %167, %168 : vector<16x1xf32>
    %170 = tpu.reciprocal %169 {approx = true} : vector<16x1xf32> -> vector<16x1xf32>
    %171 = vector.broadcast %170 : vector<16x1xf32> to vector<16x16xf32>
    %172 = arith.mulf %165, %171 : vector<16x16xf32>
    %173 = arith.truncf %172 : vector<16x16xf32> to vector<16x16xbf16>
    %c1_79 = arith.constant 1 : index
    %c0_80 = arith.constant 0 : index
    %c0_81 = arith.constant 0 : index
    %c0_82 = arith.constant 0 : index
    %174 = vector.load %arg2[%c1_79, %c0_80, %c0_81, %c0_82] : memref<4x4x16x8xbf16, #tpu.memory_space<vmem>>, vector<1x1x16x8xbf16>
    %175 = vector.shape_cast %174 : vector<1x1x16x8xbf16> to vector<16x8xbf16>
    %cst_83 = arith.constant dense<0.000000e+00> : vector<16x8xf32>
    %176 = tpu.matmul %173, %175, %cst_83 {dimension_numbers = #tpu.dot_dimension_numbers<[1], [0], [0], [1], [0, 0, 1, 1], [], []>} : vector<16x16xbf16>, vector<16x8xbf16>, vector<16x8xf32> -> vector<16x8xf32>
    %177 = vector.extract_strided_slice %138 {offsets = [1, 0], sizes = [1, 16], strides = [1, 1]} : vector<4x16xf32> to vector<1x16xf32>
    %178 = vector.extract_strided_slice %141 {offsets = [0, 1], sizes = [16, 1], strides = [1, 1]} : vector<16x4xf32> to vector<16x1xf32>
    %179 = vector.broadcast %177 : vector<1x16xf32> to vector<16x16xf32>
    %180 = vector.broadcast %178 : vector<16x1xf32> to vector<16x16xf32>
    %181 = arith.addf %179, %180 : vector<16x16xf32>
    %cst_84 = arith.constant 0.000000e+00 : f32
    %182 = vector.broadcast %cst_84 : f32 to vector<16x16xf32>
    %183 = arith.cmpf oge, %181, %182 : vector<16x16xf32>
    %cst_85 = arith.constant 2.000000e-01 : f32
    %184 = vector.broadcast %cst_85 : f32 to vector<16x16xf32>
    %185 = arith.mulf %184, %181 : vector<16x16xf32>
    %186 = arith.select %183, %181, %185 : vector<16x16xi1>, vector<16x16xf32>
    %187 = arith.addf %186, %149 : vector<16x16xf32>
    %cst_86 = arith.constant dense<0xFF800000> : vector<16xf32>
    %188 = vector.multi_reduction <maximumf>, %187, %cst_86 [1] : vector<16x16xf32> to vector<16xf32>
    %189 = vector.shape_cast %188 : vector<16xf32> to vector<16x1xf32>
    %190 = vector.broadcast %189 : vector<16x1xf32> to vector<16x16xf32>
    %191 = arith.subf %187, %190 : vector<16x16xf32>
    %192 = math.exp %191 : vector<16x16xf32>
    %cst_87 = arith.constant dense<0.000000e+00> : vector<16xf32>
    %193 = vector.multi_reduction <add>, %192, %cst_87 [1] : vector<16x16xf32> to vector<16xf32>
    %194 = vector.shape_cast %193 : vector<16xf32> to vector<16x1xf32>
    %cst_88 = arith.constant 1.000000e-30 : f32
    %195 = vector.broadcast %cst_88 : f32 to vector<16x1xf32>
    %196 = arith.maximumf %194, %195 : vector<16x1xf32>
    %197 = tpu.reciprocal %196 {approx = true} : vector<16x1xf32> -> vector<16x1xf32>
    %198 = vector.broadcast %197 : vector<16x1xf32> to vector<16x16xf32>
    %199 = arith.mulf %192, %198 : vector<16x16xf32>
    %200 = arith.truncf %199 : vector<16x16xf32> to vector<16x16xbf16>
    %c1_89 = arith.constant 1 : index
    %c1_90 = arith.constant 1 : index
    %c0_91 = arith.constant 0 : index
    %c0_92 = arith.constant 0 : index
    %201 = vector.load %arg2[%c1_89, %c1_90, %c0_91, %c0_92] : memref<4x4x16x8xbf16, #tpu.memory_space<vmem>>, vector<1x1x16x8xbf16>
    %202 = vector.shape_cast %201 : vector<1x1x16x8xbf16> to vector<16x8xbf16>
    %cst_93 = arith.constant dense<0.000000e+00> : vector<16x8xf32>
    %203 = tpu.matmul %200, %202, %cst_93 {dimension_numbers = #tpu.dot_dimension_numbers<[1], [0], [0], [1], [0, 0, 1, 1], [], []>} : vector<16x16xbf16>, vector<16x8xbf16>, vector<16x8xf32> -> vector<16x8xf32>
    %204 = vector.extract_strided_slice %138 {offsets = [2, 0], sizes = [1, 16], strides = [1, 1]} : vector<4x16xf32> to vector<1x16xf32>
    %205 = vector.extract_strided_slice %141 {offsets = [0, 2], sizes = [16, 1], strides = [1, 1]} : vector<16x4xf32> to vector<16x1xf32>
    %206 = vector.broadcast %204 : vector<1x16xf32> to vector<16x16xf32>
    %207 = vector.broadcast %205 : vector<16x1xf32> to vector<16x16xf32>
    %208 = arith.addf %206, %207 : vector<16x16xf32>
    %cst_94 = arith.constant 0.000000e+00 : f32
    %209 = vector.broadcast %cst_94 : f32 to vector<16x16xf32>
    %210 = arith.cmpf oge, %208, %209 : vector<16x16xf32>
    %cst_95 = arith.constant 2.000000e-01 : f32
    %211 = vector.broadcast %cst_95 : f32 to vector<16x16xf32>
    %212 = arith.mulf %211, %208 : vector<16x16xf32>
    %213 = arith.select %210, %208, %212 : vector<16x16xi1>, vector<16x16xf32>
    %214 = arith.addf %213, %149 : vector<16x16xf32>
    %cst_96 = arith.constant dense<0xFF800000> : vector<16xf32>
    %215 = vector.multi_reduction <maximumf>, %214, %cst_96 [1] : vector<16x16xf32> to vector<16xf32>
    %216 = vector.shape_cast %215 : vector<16xf32> to vector<16x1xf32>
    %217 = vector.broadcast %216 : vector<16x1xf32> to vector<16x16xf32>
    %218 = arith.subf %214, %217 : vector<16x16xf32>
    %219 = math.exp %218 : vector<16x16xf32>
    %cst_97 = arith.constant dense<0.000000e+00> : vector<16xf32>
    %220 = vector.multi_reduction <add>, %219, %cst_97 [1] : vector<16x16xf32> to vector<16xf32>
    %221 = vector.shape_cast %220 : vector<16xf32> to vector<16x1xf32>
    %cst_98 = arith.constant 1.000000e-30 : f32
    %222 = vector.broadcast %cst_98 : f32 to vector<16x1xf32>
    %223 = arith.maximumf %221, %222 : vector<16x1xf32>
    %224 = tpu.reciprocal %223 {approx = true} : vector<16x1xf32> -> vector<16x1xf32>
    %225 = vector.broadcast %224 : vector<16x1xf32> to vector<16x16xf32>
    %226 = arith.mulf %219, %225 : vector<16x16xf32>
    %227 = arith.truncf %226 : vector<16x16xf32> to vector<16x16xbf16>
    %c1_99 = arith.constant 1 : index
    %c2_100 = arith.constant 2 : index
    %c0_101 = arith.constant 0 : index
    %c0_102 = arith.constant 0 : index
    %228 = vector.load %arg2[%c1_99, %c2_100, %c0_101, %c0_102] : memref<4x4x16x8xbf16, #tpu.memory_space<vmem>>, vector<1x1x16x8xbf16>
    %229 = vector.shape_cast %228 : vector<1x1x16x8xbf16> to vector<16x8xbf16>
    %cst_103 = arith.constant dense<0.000000e+00> : vector<16x8xf32>
    %230 = tpu.matmul %227, %229, %cst_103 {dimension_numbers = #tpu.dot_dimension_numbers<[1], [0], [0], [1], [0, 0, 1, 1], [], []>} : vector<16x16xbf16>, vector<16x8xbf16>, vector<16x8xf32> -> vector<16x8xf32>
    %231 = vector.extract_strided_slice %138 {offsets = [3, 0], sizes = [1, 16], strides = [1, 1]} : vector<4x16xf32> to vector<1x16xf32>
    %232 = vector.extract_strided_slice %141 {offsets = [0, 3], sizes = [16, 1], strides = [1, 1]} : vector<16x4xf32> to vector<16x1xf32>
    %233 = vector.broadcast %231 : vector<1x16xf32> to vector<16x16xf32>
    %234 = vector.broadcast %232 : vector<16x1xf32> to vector<16x16xf32>
    %235 = arith.addf %233, %234 : vector<16x16xf32>
    %cst_104 = arith.constant 0.000000e+00 : f32
    %236 = vector.broadcast %cst_104 : f32 to vector<16x16xf32>
    %237 = arith.cmpf oge, %235, %236 : vector<16x16xf32>
    %cst_105 = arith.constant 2.000000e-01 : f32
    %238 = vector.broadcast %cst_105 : f32 to vector<16x16xf32>
    %239 = arith.mulf %238, %235 : vector<16x16xf32>
    %240 = arith.select %237, %235, %239 : vector<16x16xi1>, vector<16x16xf32>
    %241 = arith.addf %240, %149 : vector<16x16xf32>
    %cst_106 = arith.constant dense<0xFF800000> : vector<16xf32>
    %242 = vector.multi_reduction <maximumf>, %241, %cst_106 [1] : vector<16x16xf32> to vector<16xf32>
    %243 = vector.shape_cast %242 : vector<16xf32> to vector<16x1xf32>
    %244 = vector.broadcast %243 : vector<16x1xf32> to vector<16x16xf32>
    %245 = arith.subf %241, %244 : vector<16x16xf32>
    %246 = math.exp %245 : vector<16x16xf32>
    %cst_107 = arith.constant dense<0.000000e+00> : vector<16xf32>
    %247 = vector.multi_reduction <add>, %246, %cst_107 [1] : vector<16x16xf32> to vector<16xf32>
    %248 = vector.shape_cast %247 : vector<16xf32> to vector<16x1xf32>
    %cst_108 = arith.constant 1.000000e-30 : f32
    %249 = vector.broadcast %cst_108 : f32 to vector<16x1xf32>
    %250 = arith.maximumf %248, %249 : vector<16x1xf32>
    %251 = tpu.reciprocal %250 {approx = true} : vector<16x1xf32> -> vector<16x1xf32>
    %252 = vector.broadcast %251 : vector<16x1xf32> to vector<16x16xf32>
    %253 = arith.mulf %246, %252 : vector<16x16xf32>
    %254 = arith.truncf %253 : vector<16x16xf32> to vector<16x16xbf16>
    %c1_109 = arith.constant 1 : index
    %c3_110 = arith.constant 3 : index
    %c0_111 = arith.constant 0 : index
    %c0_112 = arith.constant 0 : index
    %255 = vector.load %arg2[%c1_109, %c3_110, %c0_111, %c0_112] : memref<4x4x16x8xbf16, #tpu.memory_space<vmem>>, vector<1x1x16x8xbf16>
    %256 = vector.shape_cast %255 : vector<1x1x16x8xbf16> to vector<16x8xbf16>
    %cst_113 = arith.constant dense<0.000000e+00> : vector<16x8xf32>
    %257 = tpu.matmul %254, %256, %cst_113 {dimension_numbers = #tpu.dot_dimension_numbers<[1], [0], [0], [1], [0, 0, 1, 1], [], []>} : vector<16x16xbf16>, vector<16x8xbf16>, vector<16x8xf32> -> vector<16x8xf32>
    %258 = tpu.concatenate %176, %203, %230, %257 in 1 : vector<16x8xf32>, vector<16x8xf32>, vector<16x8xf32>, vector<16x8xf32> -> vector<16x32xf32>
    %cst_114 = arith.constant 0.000000e+00 : f32
    %259 = vector.broadcast %cst_114 : f32 to vector<16x32xf32>
    %260 = arith.cmpf ogt, %258, %259 : vector<16x32xf32>
    %cst_115 = arith.constant 0.000000e+00 : f32
    %261 = vector.broadcast %cst_115 : f32 to vector<16x32xf32>
    %262 = arith.minimumf %258, %261 : vector<16x32xf32>
    %263 = math.exp %262 : vector<16x32xf32>
    %cst_116 = arith.constant 1.000000e+00 : f32
    %264 = vector.broadcast %cst_116 : f32 to vector<16x32xf32>
    %265 = arith.subf %263, %264 : vector<16x32xf32>
    %266 = arith.select %260, %258, %265 : vector<16x32xi1>, vector<16x32xf32>
    %c2_117 = arith.constant 2 : index
    %c0_118 = arith.constant 0 : index
    %c0_119 = arith.constant 0 : index
    %267 = vector.load %arg1[%c2_117, %c0_118, %c0_119] : memref<4x16x32xbf16, #tpu.memory_space<vmem>>, vector<1x16x32xbf16>
    %268 = vector.shape_cast %267 : vector<1x16x32xbf16> to vector<16x32xbf16>
    %c2_120 = arith.constant 2 : index
    %c0_121 = arith.constant 0 : index
    %c0_122 = arith.constant 0 : index
    %269 = vector.load %arg4[%c2_120, %c0_121, %c0_122] : memref<4x4x32xbf16, #tpu.memory_space<vmem>>, vector<1x4x32xbf16>
    %270 = vector.shape_cast %269 : vector<1x4x32xbf16> to vector<4x32xbf16>
    %cst_123 = arith.constant dense<0.000000e+00> : vector<4x16xf32>
    %271 = tpu.matmul %270, %268, %cst_123 {dimension_numbers = #tpu.dot_dimension_numbers<[1], [1], [0], [0], [0, 0, 1, 0], [], []>} : vector<4x32xbf16>, vector<16x32xbf16>, vector<4x16xf32> -> vector<4x16xf32>
    %c2_124 = arith.constant 2 : index
    %c0_125 = arith.constant 0 : index
    %c0_126 = arith.constant 0 : index
    %272 = vector.load %arg6[%c2_124, %c0_125, %c0_126] : memref<4x16x16xi8, #tpu.memory_space<vmem>>, vector<1x16x16xi8>
    %273 = vector.shape_cast %272 : vector<1x16x16xi8> to vector<16x16xi8>
    %274 = arith.sitofp %273 : vector<16x16xi8> to vector<16x16xf32>
    %cst_127 = arith.constant 0.000000e+00 : f32
    %275 = vector.broadcast %cst_127 : f32 to vector<16x16xf32>
    %276 = arith.cmpf ogt, %274, %275 : vector<16x16xf32>
    %cst_128 = arith.constant 0.000000e+00 : f32
    %cst_129 = arith.constant -1.000000e+30 : f32
    %277 = vector.broadcast %cst_128 : f32 to vector<16x16xf32>
    %278 = vector.broadcast %cst_129 : f32 to vector<16x16xf32>
    %279 = arith.select %276, %277, %278 : vector<16x16xi1>, vector<16x16xf32>
    %280 = vector.extract_strided_slice %271 {offsets = [0, 0], sizes = [1, 16], strides = [1, 1]} : vector<4x16xf32> to vector<1x16xf32>
    %cst_130 = arith.constant 0.000000e+00 : f32
    %281 = vector.broadcast %cst_130 : f32 to vector<1x16xf32>
    %282 = arith.cmpf oge, %280, %281 : vector<1x16xf32>
    %cst_131 = arith.constant 2.000000e-01 : f32
    %283 = vector.broadcast %cst_131 : f32 to vector<1x16xf32>
    %284 = arith.mulf %283, %280 : vector<1x16xf32>
    %285 = arith.select %282, %280, %284 : vector<1x16xi1>, vector<1x16xf32>
    %286 = vector.broadcast %285 : vector<1x16xf32> to vector<16x16xf32>
    %287 = arith.addf %286, %279 : vector<16x16xf32>
    %cst_132 = arith.constant dense<0xFF800000> : vector<16xf32>
    %288 = vector.multi_reduction <maximumf>, %287, %cst_132 [1] : vector<16x16xf32> to vector<16xf32>
    %289 = vector.shape_cast %288 : vector<16xf32> to vector<16x1xf32>
    %290 = vector.broadcast %289 : vector<16x1xf32> to vector<16x16xf32>
    %291 = arith.subf %287, %290 : vector<16x16xf32>
    %292 = math.exp %291 : vector<16x16xf32>
    %cst_133 = arith.constant dense<0.000000e+00> : vector<16xf32>
    %293 = vector.multi_reduction <add>, %292, %cst_133 [1] : vector<16x16xf32> to vector<16xf32>
    %294 = vector.shape_cast %293 : vector<16xf32> to vector<16x1xf32>
    %cst_134 = arith.constant 1.000000e-30 : f32
    %295 = vector.broadcast %cst_134 : f32 to vector<16x1xf32>
    %296 = arith.maximumf %294, %295 : vector<16x1xf32>
    %297 = tpu.reciprocal %296 {approx = true} : vector<16x1xf32> -> vector<16x1xf32>
    %298 = vector.broadcast %297 : vector<16x1xf32> to vector<16x16xf32>
    %299 = arith.mulf %292, %298 : vector<16x16xf32>
    %300 = arith.truncf %299 : vector<16x16xf32> to vector<16x16xbf16>
    %c2_135 = arith.constant 2 : index
    %c0_136 = arith.constant 0 : index
    %c0_137 = arith.constant 0 : index
    %c0_138 = arith.constant 0 : index
    %301 = vector.load %arg2[%c2_135, %c0_136, %c0_137, %c0_138] : memref<4x4x16x8xbf16, #tpu.memory_space<vmem>>, vector<1x1x16x8xbf16>
    %302 = vector.shape_cast %301 : vector<1x1x16x8xbf16> to vector<16x8xbf16>
    %cst_139 = arith.constant dense<0.000000e+00> : vector<16x8xf32>
    %303 = tpu.matmul %300, %302, %cst_139 {dimension_numbers = #tpu.dot_dimension_numbers<[1], [0], [0], [1], [0, 0, 1, 1], [], []>} : vector<16x16xbf16>, vector<16x8xbf16>, vector<16x8xf32> -> vector<16x8xf32>
    %304 = vector.extract_strided_slice %271 {offsets = [1, 0], sizes = [1, 16], strides = [1, 1]} : vector<4x16xf32> to vector<1x16xf32>
    %cst_140 = arith.constant 0.000000e+00 : f32
    %305 = vector.broadcast %cst_140 : f32 to vector<1x16xf32>
    %306 = arith.cmpf oge, %304, %305 : vector<1x16xf32>
    %cst_141 = arith.constant 2.000000e-01 : f32
    %307 = vector.broadcast %cst_141 : f32 to vector<1x16xf32>
    %308 = arith.mulf %307, %304 : vector<1x16xf32>
    %309 = arith.select %306, %304, %308 : vector<1x16xi1>, vector<1x16xf32>
    %310 = vector.broadcast %309 : vector<1x16xf32> to vector<16x16xf32>
    %311 = arith.addf %310, %279 : vector<16x16xf32>
    %cst_142 = arith.constant dense<0xFF800000> : vector<16xf32>
    %312 = vector.multi_reduction <maximumf>, %311, %cst_142 [1] : vector<16x16xf32> to vector<16xf32>
    %313 = vector.shape_cast %312 : vector<16xf32> to vector<16x1xf32>
    %314 = vector.broadcast %313 : vector<16x1xf32> to vector<16x16xf32>
    %315 = arith.subf %311, %314 : vector<16x16xf32>
    %316 = math.exp %315 : vector<16x16xf32>
    %cst_143 = arith.constant dense<0.000000e+00> : vector<16xf32>
    %317 = vector.multi_reduction <add>, %316, %cst_143 [1] : vector<16x16xf32> to vector<16xf32>
    %318 = vector.shape_cast %317 : vector<16xf32> to vector<16x1xf32>
    %cst_144 = arith.constant 1.000000e-30 : f32
    %319 = vector.broadcast %cst_144 : f32 to vector<16x1xf32>
    %320 = arith.maximumf %318, %319 : vector<16x1xf32>
    %321 = tpu.reciprocal %320 {approx = true} : vector<16x1xf32> -> vector<16x1xf32>
    %322 = vector.broadcast %321 : vector<16x1xf32> to vector<16x16xf32>
    %323 = arith.mulf %316, %322 : vector<16x16xf32>
    %324 = arith.truncf %323 : vector<16x16xf32> to vector<16x16xbf16>
    %c2_145 = arith.constant 2 : index
    %c1_146 = arith.constant 1 : index
    %c0_147 = arith.constant 0 : index
    %c0_148 = arith.constant 0 : index
    %325 = vector.load %arg2[%c2_145, %c1_146, %c0_147, %c0_148] : memref<4x4x16x8xbf16, #tpu.memory_space<vmem>>, vector<1x1x16x8xbf16>
    %326 = vector.shape_cast %325 : vector<1x1x16x8xbf16> to vector<16x8xbf16>
    %cst_149 = arith.constant dense<0.000000e+00> : vector<16x8xf32>
    %327 = tpu.matmul %324, %326, %cst_149 {dimension_numbers = #tpu.dot_dimension_numbers<[1], [0], [0], [1], [0, 0, 1, 1], [], []>} : vector<16x16xbf16>, vector<16x8xbf16>, vector<16x8xf32> -> vector<16x8xf32>
    %328 = vector.extract_strided_slice %271 {offsets = [2, 0], sizes = [1, 16], strides = [1, 1]} : vector<4x16xf32> to vector<1x16xf32>
    %cst_150 = arith.constant 0.000000e+00 : f32
    %329 = vector.broadcast %cst_150 : f32 to vector<1x16xf32>
    %330 = arith.cmpf oge, %328, %329 : vector<1x16xf32>
    %cst_151 = arith.constant 2.000000e-01 : f32
    %331 = vector.broadcast %cst_151 : f32 to vector<1x16xf32>
    %332 = arith.mulf %331, %328 : vector<1x16xf32>
    %333 = arith.select %330, %328, %332 : vector<1x16xi1>, vector<1x16xf32>
    %334 = vector.broadcast %333 : vector<1x16xf32> to vector<16x16xf32>
    %335 = arith.addf %334, %279 : vector<16x16xf32>
    %cst_152 = arith.constant dense<0xFF800000> : vector<16xf32>
    %336 = vector.multi_reduction <maximumf>, %335, %cst_152 [1] : vector<16x16xf32> to vector<16xf32>
    %337 = vector.shape_cast %336 : vector<16xf32> to vector<16x1xf32>
    %338 = vector.broadcast %337 : vector<16x1xf32> to vector<16x16xf32>
    %339 = arith.subf %335, %338 : vector<16x16xf32>
    %340 = math.exp %339 : vector<16x16xf32>
    %cst_153 = arith.constant dense<0.000000e+00> : vector<16xf32>
    %341 = vector.multi_reduction <add>, %340, %cst_153 [1] : vector<16x16xf32> to vector<16xf32>
    %342 = vector.shape_cast %341 : vector<16xf32> to vector<16x1xf32>
    %cst_154 = arith.constant 1.000000e-30 : f32
    %343 = vector.broadcast %cst_154 : f32 to vector<16x1xf32>
    %344 = arith.maximumf %342, %343 : vector<16x1xf32>
    %345 = tpu.reciprocal %344 {approx = true} : vector<16x1xf32> -> vector<16x1xf32>
    %346 = vector.broadcast %345 : vector<16x1xf32> to vector<16x16xf32>
    %347 = arith.mulf %340, %346 : vector<16x16xf32>
    %348 = arith.truncf %347 : vector<16x16xf32> to vector<16x16xbf16>
    %c2_155 = arith.constant 2 : index
    %c2_156 = arith.constant 2 : index
    %c0_157 = arith.constant 0 : index
    %c0_158 = arith.constant 0 : index
    %349 = vector.load %arg2[%c2_155, %c2_156, %c0_157, %c0_158] : memref<4x4x16x8xbf16, #tpu.memory_space<vmem>>, vector<1x1x16x8xbf16>
    %350 = vector.shape_cast %349 : vector<1x1x16x8xbf16> to vector<16x8xbf16>
    %cst_159 = arith.constant dense<0.000000e+00> : vector<16x8xf32>
    %351 = tpu.matmul %348, %350, %cst_159 {dimension_numbers = #tpu.dot_dimension_numbers<[1], [0], [0], [1], [0, 0, 1, 1], [], []>} : vector<16x16xbf16>, vector<16x8xbf16>, vector<16x8xf32> -> vector<16x8xf32>
    %352 = vector.extract_strided_slice %271 {offsets = [3, 0], sizes = [1, 16], strides = [1, 1]} : vector<4x16xf32> to vector<1x16xf32>
    %cst_160 = arith.constant 0.000000e+00 : f32
    %353 = vector.broadcast %cst_160 : f32 to vector<1x16xf32>
    %354 = arith.cmpf oge, %352, %353 : vector<1x16xf32>
    %cst_161 = arith.constant 2.000000e-01 : f32
    %355 = vector.broadcast %cst_161 : f32 to vector<1x16xf32>
    %356 = arith.mulf %355, %352 : vector<1x16xf32>
    %357 = arith.select %354, %352, %356 : vector<1x16xi1>, vector<1x16xf32>
    %358 = vector.broadcast %357 : vector<1x16xf32> to vector<16x16xf32>
    %359 = arith.addf %358, %279 : vector<16x16xf32>
    %cst_162 = arith.constant dense<0xFF800000> : vector<16xf32>
    %360 = vector.multi_reduction <maximumf>, %359, %cst_162 [1] : vector<16x16xf32> to vector<16xf32>
    %361 = vector.shape_cast %360 : vector<16xf32> to vector<16x1xf32>
    %362 = vector.broadcast %361 : vector<16x1xf32> to vector<16x16xf32>
    %363 = arith.subf %359, %362 : vector<16x16xf32>
    %364 = math.exp %363 : vector<16x16xf32>
    %cst_163 = arith.constant dense<0.000000e+00> : vector<16xf32>
    %365 = vector.multi_reduction <add>, %364, %cst_163 [1] : vector<16x16xf32> to vector<16xf32>
    %366 = vector.shape_cast %365 : vector<16xf32> to vector<16x1xf32>
    %cst_164 = arith.constant 1.000000e-30 : f32
    %367 = vector.broadcast %cst_164 : f32 to vector<16x1xf32>
    %368 = arith.maximumf %366, %367 : vector<16x1xf32>
    %369 = tpu.reciprocal %368 {approx = true} : vector<16x1xf32> -> vector<16x1xf32>
    %370 = vector.broadcast %369 : vector<16x1xf32> to vector<16x16xf32>
    %371 = arith.mulf %364, %370 : vector<16x16xf32>
    %372 = arith.truncf %371 : vector<16x16xf32> to vector<16x16xbf16>
    %c2_165 = arith.constant 2 : index
    %c3_166 = arith.constant 3 : index
    %c0_167 = arith.constant 0 : index
    %c0_168 = arith.constant 0 : index
    %373 = vector.load %arg2[%c2_165, %c3_166, %c0_167, %c0_168] : memref<4x4x16x8xbf16, #tpu.memory_space<vmem>>, vector<1x1x16x8xbf16>
    %374 = vector.shape_cast %373 : vector<1x1x16x8xbf16> to vector<16x8xbf16>
    %cst_169 = arith.constant dense<0.000000e+00> : vector<16x8xf32>
    %375 = tpu.matmul %372, %374, %cst_169 {dimension_numbers = #tpu.dot_dimension_numbers<[1], [0], [0], [1], [0, 0, 1, 1], [], []>} : vector<16x16xbf16>, vector<16x8xbf16>, vector<16x8xf32> -> vector<16x8xf32>
    %376 = tpu.concatenate %303, %327, %351, %375 in 1 : vector<16x8xf32>, vector<16x8xf32>, vector<16x8xf32>, vector<16x8xf32> -> vector<16x32xf32>
    %cst_170 = arith.constant 0.000000e+00 : f32
    %377 = vector.broadcast %cst_170 : f32 to vector<16x32xf32>
    %378 = arith.cmpf ogt, %376, %377 : vector<16x32xf32>
    %cst_171 = arith.constant 0.000000e+00 : f32
    %379 = vector.broadcast %cst_171 : f32 to vector<16x32xf32>
    %380 = arith.minimumf %376, %379 : vector<16x32xf32>
    %381 = math.exp %380 : vector<16x32xf32>
    %cst_172 = arith.constant 1.000000e+00 : f32
    %382 = vector.broadcast %cst_172 : f32 to vector<16x32xf32>
    %383 = arith.subf %381, %382 : vector<16x32xf32>
    %384 = arith.select %378, %376, %383 : vector<16x32xi1>, vector<16x32xf32>
    %c3_173 = arith.constant 3 : index
    %c0_174 = arith.constant 0 : index
    %c0_175 = arith.constant 0 : index
    %385 = vector.load %arg1[%c3_173, %c0_174, %c0_175] : memref<4x16x32xbf16, #tpu.memory_space<vmem>>, vector<1x16x32xbf16>
    %386 = vector.shape_cast %385 : vector<1x16x32xbf16> to vector<16x32xbf16>
    %c3_176 = arith.constant 3 : index
    %c0_177 = arith.constant 0 : index
    %c0_178 = arith.constant 0 : index
    %387 = vector.load %arg4[%c3_176, %c0_177, %c0_178] : memref<4x4x32xbf16, #tpu.memory_space<vmem>>, vector<1x4x32xbf16>
    %388 = vector.shape_cast %387 : vector<1x4x32xbf16> to vector<4x32xbf16>
    %cst_179 = arith.constant dense<0.000000e+00> : vector<4x16xf32>
    %389 = tpu.matmul %388, %386, %cst_179 {dimension_numbers = #tpu.dot_dimension_numbers<[1], [1], [0], [0], [0, 0, 1, 0], [], []>} : vector<4x32xbf16>, vector<16x32xbf16>, vector<4x16xf32> -> vector<4x16xf32>
    %c3_180 = arith.constant 3 : index
    %c0_181 = arith.constant 0 : index
    %c0_182 = arith.constant 0 : index
    %390 = vector.load %arg6[%c3_180, %c0_181, %c0_182] : memref<4x16x16xi8, #tpu.memory_space<vmem>>, vector<1x16x16xi8>
    %391 = vector.shape_cast %390 : vector<1x16x16xi8> to vector<16x16xi8>
    %392 = arith.sitofp %391 : vector<16x16xi8> to vector<16x16xf32>
    %cst_183 = arith.constant 0.000000e+00 : f32
    %393 = vector.broadcast %cst_183 : f32 to vector<16x16xf32>
    %394 = arith.cmpf ogt, %392, %393 : vector<16x16xf32>
    %cst_184 = arith.constant 0.000000e+00 : f32
    %cst_185 = arith.constant -1.000000e+30 : f32
    %395 = vector.broadcast %cst_184 : f32 to vector<16x16xf32>
    %396 = vector.broadcast %cst_185 : f32 to vector<16x16xf32>
    %397 = arith.select %394, %395, %396 : vector<16x16xi1>, vector<16x16xf32>
    %398 = vector.extract_strided_slice %389 {offsets = [0, 0], sizes = [1, 16], strides = [1, 1]} : vector<4x16xf32> to vector<1x16xf32>
    %cst_186 = arith.constant 0.000000e+00 : f32
    %399 = vector.broadcast %cst_186 : f32 to vector<1x16xf32>
    %400 = arith.cmpf oge, %398, %399 : vector<1x16xf32>
    %cst_187 = arith.constant 2.000000e-01 : f32
    %401 = vector.broadcast %cst_187 : f32 to vector<1x16xf32>
    %402 = arith.mulf %401, %398 : vector<1x16xf32>
    %403 = arith.select %400, %398, %402 : vector<1x16xi1>, vector<1x16xf32>
    %404 = vector.broadcast %403 : vector<1x16xf32> to vector<16x16xf32>
    %405 = arith.addf %404, %397 : vector<16x16xf32>
    %cst_188 = arith.constant dense<0xFF800000> : vector<16xf32>
    %406 = vector.multi_reduction <maximumf>, %405, %cst_188 [1] : vector<16x16xf32> to vector<16xf32>
    %407 = vector.shape_cast %406 : vector<16xf32> to vector<16x1xf32>
    %408 = vector.broadcast %407 : vector<16x1xf32> to vector<16x16xf32>
    %409 = arith.subf %405, %408 : vector<16x16xf32>
    %410 = math.exp %409 : vector<16x16xf32>
    %cst_189 = arith.constant dense<0.000000e+00> : vector<16xf32>
    %411 = vector.multi_reduction <add>, %410, %cst_189 [1] : vector<16x16xf32> to vector<16xf32>
    %412 = vector.shape_cast %411 : vector<16xf32> to vector<16x1xf32>
    %cst_190 = arith.constant 1.000000e-30 : f32
    %413 = vector.broadcast %cst_190 : f32 to vector<16x1xf32>
    %414 = arith.maximumf %412, %413 : vector<16x1xf32>
    %415 = tpu.reciprocal %414 {approx = true} : vector<16x1xf32> -> vector<16x1xf32>
    %416 = vector.broadcast %415 : vector<16x1xf32> to vector<16x16xf32>
    %417 = arith.mulf %410, %416 : vector<16x16xf32>
    %418 = arith.truncf %417 : vector<16x16xf32> to vector<16x16xbf16>
    %c3_191 = arith.constant 3 : index
    %c0_192 = arith.constant 0 : index
    %c0_193 = arith.constant 0 : index
    %c0_194 = arith.constant 0 : index
    %419 = vector.load %arg2[%c3_191, %c0_192, %c0_193, %c0_194] : memref<4x4x16x8xbf16, #tpu.memory_space<vmem>>, vector<1x1x16x8xbf16>
    %420 = vector.shape_cast %419 : vector<1x1x16x8xbf16> to vector<16x8xbf16>
    %cst_195 = arith.constant dense<0.000000e+00> : vector<16x8xf32>
    %421 = tpu.matmul %418, %420, %cst_195 {dimension_numbers = #tpu.dot_dimension_numbers<[1], [0], [0], [1], [0, 0, 1, 1], [], []>} : vector<16x16xbf16>, vector<16x8xbf16>, vector<16x8xf32> -> vector<16x8xf32>
    %422 = vector.extract_strided_slice %389 {offsets = [1, 0], sizes = [1, 16], strides = [1, 1]} : vector<4x16xf32> to vector<1x16xf32>
    %cst_196 = arith.constant 0.000000e+00 : f32
    %423 = vector.broadcast %cst_196 : f32 to vector<1x16xf32>
    %424 = arith.cmpf oge, %422, %423 : vector<1x16xf32>
    %cst_197 = arith.constant 2.000000e-01 : f32
    %425 = vector.broadcast %cst_197 : f32 to vector<1x16xf32>
    %426 = arith.mulf %425, %422 : vector<1x16xf32>
    %427 = arith.select %424, %422, %426 : vector<1x16xi1>, vector<1x16xf32>
    %428 = vector.broadcast %427 : vector<1x16xf32> to vector<16x16xf32>
    %429 = arith.addf %428, %397 : vector<16x16xf32>
    %cst_198 = arith.constant dense<0xFF800000> : vector<16xf32>
    %430 = vector.multi_reduction <maximumf>, %429, %cst_198 [1] : vector<16x16xf32> to vector<16xf32>
    %431 = vector.shape_cast %430 : vector<16xf32> to vector<16x1xf32>
    %432 = vector.broadcast %431 : vector<16x1xf32> to vector<16x16xf32>
    %433 = arith.subf %429, %432 : vector<16x16xf32>
    %434 = math.exp %433 : vector<16x16xf32>
    %cst_199 = arith.constant dense<0.000000e+00> : vector<16xf32>
    %435 = vector.multi_reduction <add>, %434, %cst_199 [1] : vector<16x16xf32> to vector<16xf32>
    %436 = vector.shape_cast %435 : vector<16xf32> to vector<16x1xf32>
    %cst_200 = arith.constant 1.000000e-30 : f32
    %437 = vector.broadcast %cst_200 : f32 to vector<16x1xf32>
    %438 = arith.maximumf %436, %437 : vector<16x1xf32>
    %439 = tpu.reciprocal %438 {approx = true} : vector<16x1xf32> -> vector<16x1xf32>
    %440 = vector.broadcast %439 : vector<16x1xf32> to vector<16x16xf32>
    %441 = arith.mulf %434, %440 : vector<16x16xf32>
    %442 = arith.truncf %441 : vector<16x16xf32> to vector<16x16xbf16>
    %c3_201 = arith.constant 3 : index
    %c1_202 = arith.constant 1 : index
    %c0_203 = arith.constant 0 : index
    %c0_204 = arith.constant 0 : index
    %443 = vector.load %arg2[%c3_201, %c1_202, %c0_203, %c0_204] : memref<4x4x16x8xbf16, #tpu.memory_space<vmem>>, vector<1x1x16x8xbf16>
    %444 = vector.shape_cast %443 : vector<1x1x16x8xbf16> to vector<16x8xbf16>
    %cst_205 = arith.constant dense<0.000000e+00> : vector<16x8xf32>
    %445 = tpu.matmul %442, %444, %cst_205 {dimension_numbers = #tpu.dot_dimension_numbers<[1], [0], [0], [1], [0, 0, 1, 1], [], []>} : vector<16x16xbf16>, vector<16x8xbf16>, vector<16x8xf32> -> vector<16x8xf32>
    %446 = vector.extract_strided_slice %389 {offsets = [2, 0], sizes = [1, 16], strides = [1, 1]} : vector<4x16xf32> to vector<1x16xf32>
    %cst_206 = arith.constant 0.000000e+00 : f32
    %447 = vector.broadcast %cst_206 : f32 to vector<1x16xf32>
    %448 = arith.cmpf oge, %446, %447 : vector<1x16xf32>
    %cst_207 = arith.constant 2.000000e-01 : f32
    %449 = vector.broadcast %cst_207 : f32 to vector<1x16xf32>
    %450 = arith.mulf %449, %446 : vector<1x16xf32>
    %451 = arith.select %448, %446, %450 : vector<1x16xi1>, vector<1x16xf32>
    %452 = vector.broadcast %451 : vector<1x16xf32> to vector<16x16xf32>
    %453 = arith.addf %452, %397 : vector<16x16xf32>
    %cst_208 = arith.constant dense<0xFF800000> : vector<16xf32>
    %454 = vector.multi_reduction <maximumf>, %453, %cst_208 [1] : vector<16x16xf32> to vector<16xf32>
    %455 = vector.shape_cast %454 : vector<16xf32> to vector<16x1xf32>
    %456 = vector.broadcast %455 : vector<16x1xf32> to vector<16x16xf32>
    %457 = arith.subf %453, %456 : vector<16x16xf32>
    %458 = math.exp %457 : vector<16x16xf32>
    %cst_209 = arith.constant dense<0.000000e+00> : vector<16xf32>
    %459 = vector.multi_reduction <add>, %458, %cst_209 [1] : vector<16x16xf32> to vector<16xf32>
    %460 = vector.shape_cast %459 : vector<16xf32> to vector<16x1xf32>
    %cst_210 = arith.constant 1.000000e-30 : f32
    %461 = vector.broadcast %cst_210 : f32 to vector<16x1xf32>
    %462 = arith.maximumf %460, %461 : vector<16x1xf32>
    %463 = tpu.reciprocal %462 {approx = true} : vector<16x1xf32> -> vector<16x1xf32>
    %464 = vector.broadcast %463 : vector<16x1xf32> to vector<16x16xf32>
    %465 = arith.mulf %458, %464 : vector<16x16xf32>
    %466 = arith.truncf %465 : vector<16x16xf32> to vector<16x16xbf16>
    %c3_211 = arith.constant 3 : index
    %c2_212 = arith.constant 2 : index
    %c0_213 = arith.constant 0 : index
    %c0_214 = arith.constant 0 : index
    %467 = vector.load %arg2[%c3_211, %c2_212, %c0_213, %c0_214] : memref<4x4x16x8xbf16, #tpu.memory_space<vmem>>, vector<1x1x16x8xbf16>
    %468 = vector.shape_cast %467 : vector<1x1x16x8xbf16> to vector<16x8xbf16>
    %cst_215 = arith.constant dense<0.000000e+00> : vector<16x8xf32>
    %469 = tpu.matmul %466, %468, %cst_215 {dimension_numbers = #tpu.dot_dimension_numbers<[1], [0], [0], [1], [0, 0, 1, 1], [], []>} : vector<16x16xbf16>, vector<16x8xbf16>, vector<16x8xf32> -> vector<16x8xf32>
    %470 = vector.extract_strided_slice %389 {offsets = [3, 0], sizes = [1, 16], strides = [1, 1]} : vector<4x16xf32> to vector<1x16xf32>
    %cst_216 = arith.constant 0.000000e+00 : f32
    %471 = vector.broadcast %cst_216 : f32 to vector<1x16xf32>
    %472 = arith.cmpf oge, %470, %471 : vector<1x16xf32>
    %cst_217 = arith.constant 2.000000e-01 : f32
    %473 = vector.broadcast %cst_217 : f32 to vector<1x16xf32>
    %474 = arith.mulf %473, %470 : vector<1x16xf32>
    %475 = arith.select %472, %470, %474 : vector<1x16xi1>, vector<1x16xf32>
    %476 = vector.broadcast %475 : vector<1x16xf32> to vector<16x16xf32>
    %477 = arith.addf %476, %397 : vector<16x16xf32>
    %cst_218 = arith.constant dense<0xFF800000> : vector<16xf32>
    %478 = vector.multi_reduction <maximumf>, %477, %cst_218 [1] : vector<16x16xf32> to vector<16xf32>
    %479 = vector.shape_cast %478 : vector<16xf32> to vector<16x1xf32>
    %480 = vector.broadcast %479 : vector<16x1xf32> to vector<16x16xf32>
    %481 = arith.subf %477, %480 : vector<16x16xf32>
    %482 = math.exp %481 : vector<16x16xf32>
    %cst_219 = arith.constant dense<0.000000e+00> : vector<16xf32>
    %483 = vector.multi_reduction <add>, %482, %cst_219 [1] : vector<16x16xf32> to vector<16xf32>
    %484 = vector.shape_cast %483 : vector<16xf32> to vector<16x1xf32>
    %cst_220 = arith.constant 1.000000e-30 : f32
    %485 = vector.broadcast %cst_220 : f32 to vector<16x1xf32>
    %486 = arith.maximumf %484, %485 : vector<16x1xf32>
    %487 = tpu.reciprocal %486 {approx = true} : vector<16x1xf32> -> vector<16x1xf32>
    %488 = vector.broadcast %487 : vector<16x1xf32> to vector<16x16xf32>
    %489 = arith.mulf %482, %488 : vector<16x16xf32>
    %490 = arith.truncf %489 : vector<16x16xf32> to vector<16x16xbf16>
    %c3_221 = arith.constant 3 : index
    %c3_222 = arith.constant 3 : index
    %c0_223 = arith.constant 0 : index
    %c0_224 = arith.constant 0 : index
    %491 = vector.load %arg2[%c3_221, %c3_222, %c0_223, %c0_224] : memref<4x4x16x8xbf16, #tpu.memory_space<vmem>>, vector<1x1x16x8xbf16>
    %492 = vector.shape_cast %491 : vector<1x1x16x8xbf16> to vector<16x8xbf16>
    %cst_225 = arith.constant dense<0.000000e+00> : vector<16x8xf32>
    %493 = tpu.matmul %490, %492, %cst_225 {dimension_numbers = #tpu.dot_dimension_numbers<[1], [0], [0], [1], [0, 0, 1, 1], [], []>} : vector<16x16xbf16>, vector<16x8xbf16>, vector<16x8xf32> -> vector<16x8xf32>
    %494 = tpu.concatenate %421, %445, %469, %493 in 1 : vector<16x8xf32>, vector<16x8xf32>, vector<16x8xf32>, vector<16x8xf32> -> vector<16x32xf32>
    %cst_226 = arith.constant 0.000000e+00 : f32
    %495 = vector.broadcast %cst_226 : f32 to vector<16x32xf32>
    %496 = arith.cmpf ogt, %494, %495 : vector<16x32xf32>
    %cst_227 = arith.constant 0.000000e+00 : f32
    %497 = vector.broadcast %cst_227 : f32 to vector<16x32xf32>
    %498 = arith.minimumf %494, %497 : vector<16x32xf32>
    %499 = math.exp %498 : vector<16x32xf32>
    %cst_228 = arith.constant 1.000000e+00 : f32
    %500 = vector.broadcast %cst_228 : f32 to vector<16x32xf32>
    %501 = arith.subf %499, %500 : vector<16x32xf32>
    %502 = arith.select %496, %494, %501 : vector<16x32xi1>, vector<16x32xf32>
    %c0_229 = arith.constant 0 : index
    %c0_230 = arith.constant 0 : index
    %503 = vector.load %arg7[%c0_229, %c0_230] : memref<32x128xbf16, #tpu.memory_space<vmem>>, vector<32x128xbf16>
    %c0_231 = arith.constant 0 : index
    %c0_232 = arith.constant 0 : index
    %504 = vector.load %arg8[%c0_231, %c0_232] : memref<1x128xf32, #tpu.memory_space<vmem>>, vector<1x128xf32>
    %c0_233 = arith.constant 0 : index
    %c0_234 = arith.constant 0 : index
    %505 = vector.load %arg9[%c0_233, %c0_234] : memref<1x128xf32, #tpu.memory_space<vmem>>, vector<1x128xf32>
    %506 = tpu.concatenate %133, %266, %384, %502 in 0 : vector<16x32xf32>, vector<16x32xf32>, vector<16x32xf32>, vector<16x32xf32> -> vector<64x32xf32>
    %507 = arith.truncf %506 : vector<64x32xf32> to vector<64x32xbf16>
    %cst_235 = arith.constant dense<0.000000e+00> : vector<64x128xf32>
    %508 = tpu.matmul %507, %503, %cst_235 {dimension_numbers = #tpu.dot_dimension_numbers<[1], [0], [0], [1], [0, 0, 1, 1], [], []>} : vector<64x32xbf16>, vector<32x128xbf16>, vector<64x128xf32> -> vector<64x128xf32>
    %509 = vector.broadcast %504 : vector<1x128xf32> to vector<64x128xf32>
    %510 = arith.addf %508, %509 : vector<64x128xf32>
    %511 = math.tanh %510 : vector<64x128xf32>
    %cst_236 = arith.constant dense<0.000000e+00> : vector<64x1xf32>
    %512 = tpu.matmul %511, %505, %cst_236 {dimension_numbers = #tpu.dot_dimension_numbers<[1], [1], [0], [0], [0, 0, 1, 0], [], []>} : vector<64x128xf32>, vector<1x128xf32>, vector<64x1xf32> -> vector<64x1xf32>
    %513 = vector.extract_strided_slice %512 {offsets = [0, 0], sizes = [16, 1], strides = [1, 1]} : vector<64x1xf32> to vector<16x1xf32>
    %cst_237 = arith.constant dense<0.000000e+00> : vector<1xf32>
    %514 = vector.multi_reduction <add>, %513, %cst_237 [0] : vector<16x1xf32> to vector<1xf32>
    %515 = vector.shape_cast %514 : vector<1xf32> to vector<1x1xf32>
    %cst_238 = arith.constant 6.250000e-02 : f32
    %516 = vector.broadcast %cst_238 : f32 to vector<1x1xf32>
    %517 = arith.mulf %515, %516 : vector<1x1xf32>
    %518 = vector.extract_strided_slice %512 {offsets = [16, 0], sizes = [16, 1], strides = [1, 1]} : vector<64x1xf32> to vector<16x1xf32>
    %cst_239 = arith.constant dense<0.000000e+00> : vector<1xf32>
    %519 = vector.multi_reduction <add>, %518, %cst_239 [0] : vector<16x1xf32> to vector<1xf32>
    %520 = vector.shape_cast %519 : vector<1xf32> to vector<1x1xf32>
    %cst_240 = arith.constant 6.250000e-02 : f32
    %521 = vector.broadcast %cst_240 : f32 to vector<1x1xf32>
    %522 = arith.mulf %520, %521 : vector<1x1xf32>
    %523 = vector.extract_strided_slice %512 {offsets = [32, 0], sizes = [16, 1], strides = [1, 1]} : vector<64x1xf32> to vector<16x1xf32>
    %cst_241 = arith.constant dense<0.000000e+00> : vector<1xf32>
    %524 = vector.multi_reduction <add>, %523, %cst_241 [0] : vector<16x1xf32> to vector<1xf32>
    %525 = vector.shape_cast %524 : vector<1xf32> to vector<1x1xf32>
    %cst_242 = arith.constant 6.250000e-02 : f32
    %526 = vector.broadcast %cst_242 : f32 to vector<1x1xf32>
    %527 = arith.mulf %525, %526 : vector<1x1xf32>
    %528 = vector.extract_strided_slice %512 {offsets = [48, 0], sizes = [16, 1], strides = [1, 1]} : vector<64x1xf32> to vector<16x1xf32>
    %cst_243 = arith.constant dense<0.000000e+00> : vector<1xf32>
    %529 = vector.multi_reduction <add>, %528, %cst_243 [0] : vector<16x1xf32> to vector<1xf32>
    %530 = vector.shape_cast %529 : vector<1xf32> to vector<1x1xf32>
    %cst_244 = arith.constant 6.250000e-02 : f32
    %531 = vector.broadcast %cst_244 : f32 to vector<1x1xf32>
    %532 = arith.mulf %530, %531 : vector<1x1xf32>
    %533 = arith.maximumf %517, %522 : vector<1x1xf32>
    %534 = arith.maximumf %533, %527 : vector<1x1xf32>
    %535 = arith.maximumf %534, %532 : vector<1x1xf32>
    %536 = arith.subf %517, %535 : vector<1x1xf32>
    %537 = math.exp %536 : vector<1x1xf32>
    %538 = arith.subf %522, %535 : vector<1x1xf32>
    %539 = math.exp %538 : vector<1x1xf32>
    %540 = arith.subf %527, %535 : vector<1x1xf32>
    %541 = math.exp %540 : vector<1x1xf32>
    %542 = arith.subf %532, %535 : vector<1x1xf32>
    %543 = math.exp %542 : vector<1x1xf32>
    %544 = arith.addf %537, %539 : vector<1x1xf32>
    %545 = arith.addf %544, %541 : vector<1x1xf32>
    %546 = arith.addf %545, %543 : vector<1x1xf32>
    %cst_245 = arith.constant 1.000000e+00 : f32
    %547 = vector.broadcast %cst_245 : f32 to vector<1x1xf32>
    %548 = arith.divf %547, %546 : vector<1x1xf32>
    %549 = arith.mulf %537, %548 : vector<1x1xf32>
    %550 = vector.broadcast %549 : vector<1x1xf32> to vector<16x32xf32>
    %551 = arith.mulf %550, %133 : vector<16x32xf32>
    %552 = arith.mulf %539, %548 : vector<1x1xf32>
    %553 = vector.broadcast %552 : vector<1x1xf32> to vector<16x32xf32>
    %554 = arith.mulf %553, %266 : vector<16x32xf32>
    %555 = arith.addf %551, %554 : vector<16x32xf32>
    %556 = arith.mulf %541, %548 : vector<1x1xf32>
    %557 = vector.broadcast %556 : vector<1x1xf32> to vector<16x32xf32>
    %558 = arith.mulf %557, %384 : vector<16x32xf32>
    %559 = arith.addf %555, %558 : vector<16x32xf32>
    %560 = arith.mulf %543, %548 : vector<1x1xf32>
    %561 = vector.broadcast %560 : vector<1x1xf32> to vector<16x32xf32>
    %562 = arith.mulf %561, %502 : vector<16x32xf32>
    %563 = arith.addf %559, %562 : vector<16x32xf32>
    %c0_246 = arith.constant 0 : index
    %c0_247 = arith.constant 0 : index
    %564 = vector.load %arg10[%c0_246, %c0_247] : memref<16x32xf32, #tpu.memory_space<vmem>>, vector<16x32xf32>
    tpu.vector_store %arg10[%c0_246, %c0_247], %563 {strides = array<i32>} : memref<16x32xf32, #tpu.memory_space<vmem>>, vector<16x32xf32>,
    return
  }
  func.func @transform_0(%arg0: i32) -> (i32, i32, i32) {
    %c0_i32 = arith.constant 0 : i32
    %c0_i32_0 = arith.constant 0 : i32
    %c0_i32_1 = arith.constant 0 : i32
    %c0_i32_2 = arith.constant 0 : i32
    return %c0_i32, %c0_i32_0, %c0_i32_1 : i32, i32, i32
  }
  func.func @transform_1(%arg0: i32) -> (i32, i32, i32, i32) {
    %c0_i32 = arith.constant 0 : i32
    %c0_i32_0 = arith.constant 0 : i32
    %c0_i32_1 = arith.constant 0 : i32
    %c0_i32_2 = arith.constant 0 : i32
    %c0_i32_3 = arith.constant 0 : i32
    return %c0_i32, %c0_i32_0, %c0_i32_1, %c0_i32_2 : i32, i32, i32, i32
  }
  func.func @transform_2(%arg0: i32) -> (i32, i32) {
    %c0_i32 = arith.constant 0 : i32
    %c0_i32_0 = arith.constant 0 : i32
    %c0_i32_1 = arith.constant 0 : i32
    return %c0_i32, %c0_i32_0 : i32, i32
  }
  func.func @transform_3(%arg0: i32) -> (i32, i32, i32) {
    %c0_i32 = arith.constant 0 : i32
    %c0_i32_0 = arith.constant 0 : i32
    %c0_i32_1 = arith.constant 0 : i32
    %c0_i32_2 = arith.constant 0 : i32
    return %c0_i32, %c0_i32_0, %c0_i32_1 : i32, i32, i32
  }
  func.func @transform_4(%arg0: i32) -> (i32, i32, i32) {
    %c0_i32 = arith.constant 0 : i32
    %c0_i32_0 = arith.constant 0 : i32
    %c0_i32_1 = arith.constant 0 : i32
    %c0_i32_2 = arith.constant 0 : i32
    return %c0_i32, %c0_i32_0, %c0_i32_1 : i32, i32, i32
  }
  func.func @transform_5(%arg0: i32) -> (i32, i32, i32) {
    %c0_i32 = arith.constant 0 : i32
    %c0_i32_0 = arith.constant 0 : i32
    %c0_i32_1 = arith.constant 0 : i32
    %c0_i32_2 = arith.constant 0 : i32
    return %c0_i32, %c0_i32_0, %c0_i32_1 : i32, i32, i32
  }
  func.func @transform_6(%arg0: i32) -> (i32, i32) {
    %c0_i32 = arith.constant 0 : i32
    %c0_i32_0 = arith.constant 0 : i32
    %c0_i32_1 = arith.constant 0 : i32
    return %c0_i32, %c0_i32_0 : i32, i32
  }
  func.func @transform_7(%arg0: i32) -> (i32, i32) {
    %c0_i32 = arith.constant 0 : i32
    %c0_i32_0 = arith.constant 0 : i32
    %c0_i32_1 = arith.constant 0 : i32
    return %c0_i32, %c0_i32_0 : i32, i32
  }
  func.func @transform_8(%arg0: i32) -> (i32, i32) {
    %c0_i32 = arith.constant 0 : i32
    %c0_i32_0 = arith.constant 0 : i32
    %c0_i32_1 = arith.constant 0 : i32
    return %c0_i32, %c0_i32_0 : i32, i32
  }
  func.func @transform_9(%arg0: i32) -> (i32, i32) {
    %c0_i32 = arith.constant 0 : i32
    %c0_i32_0 = arith.constant 0 : i32
    %c0_i32_1 = arith.constant 0 : i32
    return %c0_i32, %c0_i32_0 : i32, i32
  }
}

</mosaic_0001>

<bundles_post_ra>
// kernel: tpu_custom_call.1
= control target key start
LH: loop header
LB: loop body
LE: loop exit
PB: predicated region body
PF: predicated region fallthrough
CT: control target
= control target key end

     0   :  { %v2844_v1 = vmov 0.0   ;;  %vm44_vm0 = vcmask 261120   ;;  %vm2845_vm1 = vmmov 0   ;;  %s3537_s0 = inlined_call_operand.vmem [shape: bf16[4,16,32], index: 0, kind: input, shape index: {}]   ;;  %s3538_s1 = inlined_call_operand.vmem [shape: bf16[4,4,16,8], index: 1, kind: input, shape index: {}]   ;;  %s3539_s2 = inlined_call_operand.vmem [shape: bf16[16,32], index: 2, kind: input, shape index: {}]   ;;  %s3540_s3 = inlined_call_operand.vmem [shape: bf16[4,4,32], index: 3, kind: input, shape index: {}]   ;;  %s3541_s4 = inlined_call_operand.vmem [shape: bf16[4,4,32], index: 4, kind: input, shape index: {}]   ;;  %s3542_s5 = inlined_call_operand.vmem [shape: s8[4,16,16], index: 5, kind: input, shape index: {}]   ;;  %s3543_s6 = inlined_call_operand.vmem [shape: bf16[32,128], index: 6, kind: input, shape index: {}]   ;;  %s3544_s7 = inlined_call_operand.vmem [shape: f32[1,128], index: 7, kind: input, shape index: {}]   ;;  %s3545_s8 = inlined_call_operand.vmem [shape: f32[1,128], index: 8, kind: input, shape index: {}]   ;;  %s3546_s9 = inlined_call_operand.hbm [shape: f32[16,32], index: 9, kind: output, shape index: {}]  }
   0x1   :  { %v2627_v0 = vld [vmem:[%s3537_s0] sm:$0xff]   ;;  %2455 = vmatprep.subr.bf16.mxu1 %v2844_v1  ;;  %2467 = vmatprep.subr.bf16.mxu0 %v2844_v1 }
   0x2   :  { %v91_v2 = vld [vmem:[%s3541_s4] sm:$0x3]  ;;  %v49_v3 = vsel %vm44_vm0, %v2627_v0, 0  ;;  %2457 = vmatprep.mubr.msk.bf16.mxu1 %vm2845_vm1, %v2844_v1  ;;  %2469 = vmatprep.mubr.msk.bf16.mxu0 %vm2845_vm1, %v2844_v1 }
   0x3   :  { %2456 = vmatpush3.bf16.xpose.msra.mxu1 %v49_v3  ;;  %v101_v4 = vsel %vm44_vm0, %v91_v2, 0  ;;  %v38_v5 = vld [vmem:[%s3540_s3] sm:$0x3] }
   0x4   :  { %2461 = vmatprep.subr.bf16.mxu1 %v2844_v1  ;;  %v2930_v6 = vld [vmem:[%s3539_s2] sm:$0xff]  }
   0xa   :  { %2458 = vmatmul.mubr.msk.bf16.vlgmr.msra.gmra.mrb[0].mxu1 %vm44_vm0, %v38_v5 }
   0xb   :  { %2462 = vmatpush3.bf16.xpose.msra.mxu1 %v101_v4  ;;  %2463 = vmatprep.mubr.msk.bf16.mxu1 %vm2845_vm1, %v2844_v1 }
   0xc   :  { %2473 = vmatprep.subr.bf16.mxu1 %v2844_v1 }
   0xd   :  { %14 = vsyncpa [#allocation3], 0  ;;  %v2846_v7 = vmov 3   ;;  %v2847_v8 = vmov 1   ;;  %v2848_v17 = vmov 2   ;;  %v2849_v18 = vmov 0  }
   0xe   :  { %2615 = vset.pattern.permute.xlu1 %v2846_v7  ;;  %2614 = vset.pattern.permute.xlu0 %v2847_v8  ;;  %v154_v19 = vlaneseq  ;;  %v2947_v20 = vld [vmem:[%s3542_s5] sm:$0xff]   ;;  %v2850_v30 = vmov -1e+30   ;;  %vm178_vm4 = vcmask 130048   ;;  %s2851_s12 = smov 8   ;;  %s2852_s15 = smov 16  }
   0xf   :  { %v2391_v22 = vunpack.c.0.s8 %v2947_v20  ;;  %v2392_v33 = vunpack.c.1.s8 %v2947_v20  ;;  %s2853_s16 = smov 24  }
  0x10   :  { %v155_v21 = vshrl.u32 %v154_v19, 7 }
  0x11   :  { %v148_v24 = vcvt.s32.f32 %v2391_v22  ;;  %v149_v39 = vcvt.s32.f32 %v2392_v33 }
  0x12   :  { %2464 = vmatmul.mubr.msk.bf16.vlgmr.msra.gmra.mrb[4].mxu1 %vm44_vm0, %v2930_v6  ;;  %v2950_v23 = vsub.s32 1, %v155_v21  ;;  %v2954_v27 = vsub.s32 2, %v155_v21  ;;  %v2968_v47 = vsub.s32 3, %v155_v21  ;;  %v2975_v61 = vsub.s32 0, %v155_v21 }
  0x13   :  { %2475 = vmatprep.mubr.msk.bf16.mxu1 %vm2845_vm1, %v2844_v1  ;;  %vm150_vm2 = vcmp.gt.f32.partialorder %v148_v24, 0.0  ;;  %vm151_vm5 = vcmp.gt.f32.partialorder %v149_v39, 0.0 }
  0x14   :  { %v2957_v31 = vsel %vm150_vm2, 0.0, %v2850_v30  ;;  %v153_v43 = vsel %vm151_vm5, 0.0, %v2850_v30 }
  0xdd   :  { %v2939_v9 = vpop.f32.mrb[0].mxu1 }
  0xde   :  { %v2459_v10 = vpop.f32.mrb[1].mxu1  ;;  %v259_v25 = vrot.slane %v2939_v9, %v2950_v23  ;;  %v359_v32 = vrot.slane %v2939_v9, %v2954_v27  ;;  %v459_v49 = vrot.slane %v2939_v9, %v2968_v47  ;;  %v157_v63 = vrot.slane %v2939_v9, %v2975_v61 }
  0xdf   :  { %v88_v11 = vpop.f32.mrb[2].mxu1 }
  0xe0   :  { %v2460_v12 = vpop.f32.mrb[3].mxu1 }
  0xe5   :  { %v137_v13 = vpop.f32.mrb[4].mxu1 }
  0xe6   :  { %461 = vperm.xlu1 %2615, %v137_v13   ;;  %261 = vperm.xlu0 %2614, %v137_v13   ;;  %v2465_v14 = vpop.f32.mrb[5].mxu1 }
  0xe7   :  { %v140_v15 = vpop.f32.mrb[6].mxu1 }
  0xe8   :  { %v2466_v16 = vpop.f32.mrb[7].mxu1 }
  0xea   :  { %2616 = vset.pattern.permute.xlu0 %v2848_v17  ;;  %465 = vperm.xlu1 %2615, %v140_v15  }
  0xeb   :  { %361 = vperm.xlu0 %2616, %v137_v13  }
  0xee   :  { %2618 = vset.pattern.permute.xlu1 %v2849_v18 }
  0xef   :  { %2617 = vset.pattern.permute.xlu0 %v2847_v8  ;;  %165 = vperm.xlu1 %2618, %v140_v15  }
  0xf0   :  { %265 = vperm.xlu0 %2617, %v140_v15  }
  0xf3   :  { %2620 = vset.pattern.permute.xlu1 %v2848_v17 }
  0xf4   :  { %2619 = vset.pattern.permute.xlu0 %v2849_v18 }
 0x165   :  { %v262_v26 = vpop.permute.xlu0 %261  ;;  %v462_v48 = vpop.permute.xlu1 %461 }
 0x166   :  { %v268_v28 = vadd.f32 %v262_v26, %v259_v25  ;;  %v468_v50 = vadd.f32 %v462_v48, %v459_v49 }
 0x168   :  { %vm270_vm3 = vcmp.ge.f32.partialorder %v268_v28, 0.0  ;;  %v272_v29 = vmul.f32 0.2, %v268_v28  ;;  %v472_v51 = vmul.f32 0.2, %v468_v50  ;;  %vm470_vm7 = vcmp.ge.f32.partialorder %v468_v50, 0.0 }
 0x169   :  { %v466_v52 = vpop.permute.xlu1 %465 }
 0x16a   :  { %v362_v34 = vpop.permute.xlu0 %361  ;;  %v274_v35 = vsel %vm270_vm3, %v268_v28, %v272_v29  ;;  %v474_v53 = vsel %vm470_vm7, %v468_v50, %v472_v51  ;;  %v469_v54 = vadd.f32 %v466_v52, %v459_v49  ;;  %v2629_v49 = vld [vmem:[%s3538_s1 + $0x8] sm:$0xff]  }
 0x16b   :  { %v2962_v36 = vadd.f32 %v362_v34, %v359_v32  ;;  %v276_v37 = vadd.f32 %v274_v35, %v2957_v31  ;;  %v476_v55 = vadd.f32 %v474_v53, %v2957_v31  ;;  %2474 = vmatpush3.bf16.msra.mxu1 %v2629_v49 }
 0x16c   :  { %v473_v56 = vmul.f32 0.2, %v469_v54  ;;  %vm471_vm8 = vcmp.ge.f32.partialorder %v469_v54, 0.0  ;;  %2485 = vmatprep.subr.bf16.mxu1 %v2844_v1 }
 0x16d   :  { %v278_v38 = vsel %vm178_vm4, %v276_v37, -inf  ;;  %v478_v57 = vsel %vm178_vm4, %v476_v55, -inf  ;;  %v372_v14 = vmul.f32 0.2, %v2962_v36  ;;  %vm370_vm11 = vcmp.ge.f32.partialorder %v2962_v36, 0.0 }
 0x16e   :  { %279 = vmax.xlane.f32.xlu1 %v278_v38  ;;  %v475_v58 = vsel %vm471_vm8, %v469_v54, %v473_v56  ;;  %v166_v62 = vpop.permute.xlu1 %165 }
 0x16f   :  { %v266_v40 = vpop.permute.xlu0 %265  ;;  %v477_v59 = vadd.f32 %v475_v58, %v153_v43  ;;  %v169_v3 = vadd.f32 %v166_v62, %v157_v63  ;;  %v374_v26 = vsel %vm370_vm11, %v2962_v36, %v372_v14 }
 0x170   :  { %v269_v41 = vadd.f32 %v266_v40, %v259_v25 }
 0x171   :  { %v481_v60 = vsel %vm178_vm4, %v477_v59, -inf  ;;  %v173_v5 = vmul.f32 0.2, %v169_v3  ;;  %vm171_vm9 = vcmp.ge.f32.partialorder %v169_v3, 0.0 }
 0x172   :  { %vm271_vm6 = vcmp.ge.f32.partialorder %v269_v41, 0.0  ;;  %v273_v42 = vmul.f32 0.2, %v269_v41 }
 0x174   :  { %v275_v44 = vsel %vm271_vm6, %v269_v41, %v273_v42 }
 0x175   :  { %v277_v45 = vadd.f32 %v275_v44, %v153_v43 }
 0x177   :  { %v281_v46 = vsel %vm178_vm4, %v277_v45, -inf }
 0x178   :  { %282 = vmax.xlane.f32.xlu0 %v281_v46 }
 0x17f   :  { %365 = vperm.xlu1 %2620, %v140_v15  }
 0x183   :  { %2621 = vset.pattern.permute.xlu1 %v2849_v18  ;;  %v175_v18 = vsel %vm171_vm9, %v169_v3, %v173_v5 }
 0x184   :  { %v177_v24 = vadd.f32 %v175_v18, %v153_v43 }
 0x186   :  { %v182_v29 = vsel %vm178_vm4, %v177_v24, -inf }
 0x18e   :  { %160 = vperm.xlu0 %2619, %v137_v13  }
 0x1a3   :  { %479 = vmax.xlane.f32.xlu1 %v478_v57 }
 0x1ad   :  { %482 = vmax.xlane.f32.xlu0 %v481_v60 }
 0x1fb   :  { %v280_v0 = vpop.xlane.xlu1 %279 }
 0x1fc   :  { %v284_v12 = vsub.f32 %v276_v37, %v280_v0 }
 0x1fe   :  { %v286_v19 = vmul.f32 1.442695, %v284_v12 }
 0x1ff   :  { %v366_v11 = vpop.permute.xlu1 %365 }
 0x200   :  { %v369_v15 = vadd.f32 %v366_v11, %v359_v32  ;;  %2650 = vpow2.f32 %v286_v19  ;;  %v376_v32 = vadd.f32 %v374_v26, %v2957_v31 }
 0x202   :  { %v373_v25 = vmul.f32 0.2, %v369_v15  ;;  %vm371_vm12 = vcmp.ge.f32.partialorder %v369_v15, 0.0  ;;  %v378_v34 = vsel %vm178_vm4, %v376_v32, -inf }
 0x204   :  { %v375_v33 = vsel %vm371_vm12, %v369_v15, %v373_v25 }
 0x205   :  { %v283_v2 = vpop.xlane.xlu0 %282  ;;  %v377_v35 = vadd.f32 %v375_v33, %v153_v43 }
 0x206   :  { %v285_v21 = vsub.f32 %v277_v45, %v283_v2 }
 0x207   :  { %v381_v37 = vsel %vm178_vm4, %v377_v35, -inf }
 0x208   :  { %v288_v28 = vmul.f32 1.442695, %v285_v21 }
 0x20a   :  { %2652 = vpow2.f32 %v288_v28  ;;  %v2651_v38 = vpop.eup %2650  ;;  %v2631_v28 = vld [vmem:[%s3538_s1] sm:$0xff]  }
 0x20b   :  { %v290_v36 = vsel %vm178_vm4, %v2651_v38, 0.0  ;;  %2468 = vmatpush3.bf16.msra.mxu0 %v2631_v28 }
 0x20c   :  { %2479 = vmatprep.subr.bf16.mxu0 %v2844_v1 }
 0x20d   :  { %v161_v4 = vpop.permute.xlu0 %160 }
 0x20e   :  { %v168_v10 = vadd.f32 %v161_v4, %v157_v63 }
 0x210   :  { %vm170_vm10 = vcmp.ge.f32.partialorder %v168_v10, 0.0  ;;  %v172_v13 = vmul.f32 0.2, %v168_v10 }
 0x212   :  { %v174_v16 = vsel %vm170_vm10, %v168_v10, %v172_v13 }
 0x213   :  { %v176_v9 = vadd.f32 %v174_v16, %v2957_v31 }
 0x214   :  { %v2653_v39 = vpop.eup %2652 }
 0x215   :  { %v179_v22 = vsel %vm178_vm4, %v176_v9, -inf  ;;  %v293_v40 = vsel %vm178_vm4, %v2653_v39, 0.0 }
 0x216   :  { %180 = vmax.xlane.f32.xlu1 %v179_v22 }
 0x21a   :  { %183 = vmax.xlane.f32.xlu1 %v182_v29 }
 0x21e   :  { %379 = vmax.xlane.f32.xlu1 %v378_v34 }
 0x222   :  { %382 = vmax.xlane.f32.xlu1 %v381_v37  ;;  %v2309_v37 = vld [vmem:[%s3541_s4 + $0x2] sm:$0x3] }
 0x226   :  { %291 = vadd.xlane.f32.xlu1 %v290_v36 }
 0x22a   :  { %294 = vadd.xlane.f32.xlu1 %v293_v40  ;;  %v659_v40 = vsel %vm44_vm0, %v2309_v37, 0 }
 0x230   :  { %v480_v41 = vpop.xlane.xlu1 %479 }
 0x231   :  { %v484_v31 = vsub.f32 %v476_v55, %v480_v41 }
 0x233   :  { %v486_v42 = vmul.f32 1.442695, %v484_v31 }
 0x235   :  { %2654 = vpow2.f32 %v486_v42 }
 0x23a   :  { %v483_v44 = vpop.xlane.xlu0 %482 }
 0x23b   :  { %v485_v45 = vsub.f32 %v477_v59, %v483_v44 }
 0x23d   :  { %v488_v46 = vmul.f32 1.442695, %v485_v45 }
 0x23f   :  { %v2990_v43 = vpop.eup %2654  ;;  %2656 = vpow2.f32 %v488_v46 }
 0x240   :  { %v490_v48 = vsel %vm178_vm4, %v2990_v43, 0.0 }
 0x241   :  { %491 = vadd.xlane.f32.xlu0 %v490_v48 }
 0x249   :  { %v2657_v50 = vpop.eup %2656 }
 0x24a   :  { %v493_v51 = vsel %vm178_vm4, %v2657_v50, 0.0 }
 0x24b   :  { %494 = vadd.xlane.f32.xlu1 %v493_v51 }
 0x2a3   :  { %v181_v52 = vpop.xlane.xlu1 %180 }
 0x2a4   :  { %v185_v53 = vsub.f32 %v176_v9, %v181_v52  ;;  %v2632_v52 = vld [vmem:[%s3538_s1 + $0x10] sm:$0xff]  }
 0x2a6   :  { %v187_v54 = vmul.f32 1.442695, %v185_v53 }
 0x2a7   :  { %v184_v55 = vpop.xlane.xlu1 %183 }
 0x2a8   :  { %2658 = vpow2.f32 %v187_v54  ;;  %v186_v56 = vsub.f32 %v177_v24, %v184_v55  ;;  %v2630_v24 = vld [vmem:[%s3538_s1 + $0x18] sm:$0xff]  }
 0x2aa   :  { %v189_v57 = vmul.f32 1.442695, %v186_v56  ;;  %v2633_v56 = vld [vmem:[%s3537_s0 + $0x8] sm:$0xff]  }
 0x2ab   :  { %v380_v58 = vpop.xlane.xlu1 %379 }
 0x2ac   :  { %2660 = vpow2.f32 %v189_v57  ;;  %v384_v59 = vsub.f32 %v376_v32, %v380_v58 }
 0x2ae   :  { %v386_v60 = vmul.f32 1.442695, %v384_v59 }
 0x2af   :  { %v383_v62 = vpop.xlane.xlu1 %382 }
 0x2b0   :  { %2662 = vpow2.f32 %v386_v60  ;;  %v385_v63 = vsub.f32 %v377_v35, %v383_v62  ;;  %v614_v60 = vsel %vm44_vm0, %v2633_v56, 0  ;;  %v2306_v62 = vld [vmem:[%s3540_s3 + $0x2] sm:$0x3] }
 0x2b2   :  { %v2999_v0 = vpop.eup %2658  ;;  %v388_v2 = vmul.f32 1.442695, %v385_v63 }
 0x2b3   :  { %v292_v3 = vpop.xlane.xlu1 %291  ;;  %v191_v4 = vsel %vm178_vm4, %v2999_v0, 0.0 }
 0x2b4   :  { %2664 = vpow2.f32 %v388_v2  ;;  %v296_v5 = vmax.f32 %v292_v3, 1e-30  ;;  %192 = vadd.xlane.f32.xlu0 %v191_v4 }
 0x2b6   :  { %v2661_v10 = vpop.eup %2660  ;;  %2666 = vrcp.f32 %v296_v5 }
 0x2b7   :  { %v295_v11 = vpop.xlane.xlu1 %294  ;;  %v194_v12 = vsel %vm178_vm4, %v2661_v10, 0.0 }
 0x2b8   :  { %v297_v13 = vmax.f32 %v295_v11, 1e-30  ;;  %195 = vadd.xlane.f32.xlu1 %v194_v12 }
 0x2ba   :  { %v3004_v14 = vpop.eup %2662  ;;  %2668 = vrcp.f32 %v297_v13 }
 0x2bb   :  { %v390_v15 = vsel %vm178_vm4, %v3004_v14, 0.0 }
 0x2bc   :  { %391 = vadd.xlane.f32.xlu0 %v390_v15 }
 0x2be   :  { %v2665_v16 = vpop.eup %2664 }
 0x2bf   :  { %v393_v18 = vsel %vm178_vm4, %v2665_v16, 0.0 }
 0x2c0   :  { %394 = vadd.xlane.f32.xlu1 %v393_v18  ;;  %v2667_v9 = vpop.eup %2666 }
 0x2c1   :  { %v300_v21 = vmul.f32 %v2667_v9, %v2651_v38 }
 0x2c4   :  { %v2669_v19 = vpop.eup %2668 }
 0x2c5   :  { %v301_v22 = vmul.f32 %v2669_v19, %v2653_v39 }
 0x2c7   :  { %v302_v25 = vpack.c.bf16 %v301_v22, %v300_v21 }
 0x2c9   :  { %2476 = vmatmul.mubr.msk.bf16.vlgmr.msra.gmra.mrb[8].mxu1 %vm178_vm4, %v302_v25 }
 0x2ca   :  { %2486 = vmatpush3.bf16.msra.mxu1 %v2630_v24  ;;  %2487 = vmatprep.mubr.msk.bf16.mxu1 %vm2845_vm1, %v2844_v1 }
 0x2cb   :  { %2497 = vmatprep.subr.bf16.mxu1 %v2844_v1 }
 0x2ce   :  { %v492_v26 = vpop.xlane.xlu0 %491 }
 0x2cf   :  { %v496_v29 = vmax.f32 %v492_v26, 1e-30 }
 0x2d1   :  { %2670 = vrcp.f32 %v496_v29  ;;  %v2395_v29 = vunpack.c.2.s8 %v2947_v20 }
 0x2d8   :  { %v495_v32 = vpop.xlane.xlu1 %494 }
 0x2d9   :  { %v497_v33 = vmax.f32 %v495_v32, 1e-30 }
 0x2db   :  { %2672 = vrcp.f32 %v497_v33  ;;  %v2671_v34 = vpop.eup %2670  ;;  %v707_v33 = vcvt.s32.f32 %v2395_v29 }
 0x2dc   :  { %v500_v38 = vmul.f32 %v2671_v34, %v2990_v43 }
 0x2dd   :  { %vm709_vm13 = vcmp.gt.f32.partialorder %v707_v33, 0.0 }
 0x2e5   :  { %v2673_v35 = vpop.eup %2672 }
 0x2e6   :  { %v501_v36 = vmul.f32 %v2673_v35, %v2657_v50 }
 0x2e8   :  { %v502_v39 = vpack.c.bf16 %v501_v36, %v500_v38 }
 0x2ea   :  { %2488 = vmatmul.mubr.msk.bf16.vlgmr.msra.gmra.mrb[12].mxu1 %vm178_vm4, %v502_v39 }
 0x2eb   :  { %2498 = vmatpush3.bf16.xpose.msra.mxu1 %v659_v40  ;;  %2499 = vmatprep.mubr.msk.bf16.mxu1 %vm2845_vm1, %v2844_v1 }
 0x2ec   :  { %2509 = vmatprep.subr.bf16.mxu1 %v2844_v1 }
 0x2f2   :  { %2500 = vmatmul.mubr.msk.bf16.vlgmr.msra.gmra.mrb[16].mxu1 %vm44_vm0, %v2930_v6 }
 0x2f3   :  { %2511 = vmatprep.mubr.msk.bf16.mxu1 %vm2845_vm1, %v2844_v1 }
 0x341   :  { %v193_v41 = vpop.xlane.xlu0 %192 }
 0x342   :  { %v197_v31 = vmax.f32 %v193_v41, 1e-30  ;;  %v3090_v41 = vsel %vm709_vm13, 0.0, %v2850_v30 }
 0x344   :  { %2674 = vrcp.f32 %v197_v31 }
 0x345   :  { %v196_v42 = vpop.xlane.xlu1 %195 }
 0x346   :  { %v198_v44 = vmax.f32 %v196_v42, 1e-30 }
 0x348   :  { %2676 = vrcp.f32 %v198_v44 }
 0x349   :  { %v392_v45 = vpop.xlane.xlu0 %391 }
 0x34a   :  { %v396_v46 = vmax.f32 %v392_v45, 1e-30 }
 0x34c   :  { %2678 = vrcp.f32 %v396_v46 }
 0x34d   :  { %v395_v43 = vpop.xlane.xlu1 %394 }
 0x34e   :  { %v397_v48 = vmax.f32 %v395_v43, 1e-30  ;;  %v2675_v49 = vpop.eup %2674 }
 0x34f   :  { %v201_v51 = vmul.f32 %v2675_v49, %v2999_v0 }
 0x350   :  { %2680 = vrcp.f32 %v397_v48 }
 0x352   :  { %v2677_v50 = vpop.eup %2676 }
 0x353   :  { %v202_v6 = vmul.f32 %v2677_v50, %v2661_v10 }
 0x355   :  { %v203_v53 = vpack.c.bf16 %v202_v6, %v201_v51 }
 0x356   :  { %v2679_v54 = vpop.eup %2678 }
 0x357   :  { %2470 = vmatmul.mubr.msk.bf16.vlgmr.msra.gmra.mrb[0].mxu0 %vm178_vm4, %v203_v53  ;;  %v400_v57 = vmul.f32 %v2679_v54, %v3004_v14 }
 0x358   :  { %2480 = vmatpush3.bf16.msra.mxu0 %v2632_v52  ;;  %2481 = vmatprep.mubr.msk.bf16.mxu0 %vm2845_vm1, %v2844_v1 }
 0x359   :  { %2491 = vmatprep.subr.bf16.mxu0 %v2844_v1 }
 0x35a   :  { %v2681_v55 = vpop.eup %2680 }
 0x35b   :  { %v401_v58 = vmul.f32 %v2681_v55, %v2665_v16 }
 0x35d   :  { %v402_v59 = vpack.c.bf16 %v401_v58, %v400_v57 }
 0x35f   :  { %2482 = vmatmul.mubr.msk.bf16.vlgmr.msra.gmra.mrb[4].mxu0 %vm178_vm4, %v402_v59 }
 0x360   :  { %2493 = vmatprep.mubr.msk.bf16.mxu0 %vm2845_vm1, %v2844_v1 }
 0x361   :  { %2492 = vmatpush3.bf16.xpose.msra.mxu0 %v614_v60 }
 0x362   :  { %2503 = vmatprep.subr.bf16.mxu0 %v2844_v1 }
 0x368   :  { %2494 = vmatmul.mubr.msk.bf16.vlgmr.msra.gmra.mrb[8].mxu0 %vm44_vm0, %v2306_v62 }
 0x369   :  { %2505 = vmatprep.mubr.msk.bf16.mxu0 %vm2845_vm1, %v2844_v1 }
 0x39c   :  { %v3056_v63 = vpop.f32.mrb[8].mxu1 }
 0x39d   :  { %v2477_v0 = vpop.f32.mrb[9].mxu1 }
 0x39e   :  { %v3058_v2 = vpop.f32.mrb[10].mxu1 }
 0x39f   :  { %v2478_v3 = vpop.f32.mrb[11].mxu1 }
 0x3bd   :  { %v3060_v4 = vpop.f32.mrb[12].mxu1 }
 0x3be   :  { %v2489_v5 = vpop.f32.mrb[13].mxu1 }
 0x3bf   :  { %v3062_v10 = vpop.f32.mrb[14].mxu1 }
 0x3c0   :  { %v2490_v11 = vpop.f32.mrb[15].mxu1 }
 0x3c5   :  { %v3064_v12 = vpop.f32.mrb[16].mxu1 }
 0x3c6   :  { %719 = vperm.xlu0 %2619, %v3064_v12   ;;  %v2501_v13 = vpop.f32.mrb[17].mxu1 }
 0x3c7   :  { %v3067_v14 = vpop.f32.mrb[18].mxu1 }
 0x3c8   :  { %724 = vperm.xlu1 %2621, %v3067_v14   ;;  %v2502_v15 = vpop.f32.mrb[19].mxu1 }
 0x3ca   :  { %2624 = vset.pattern.permute.xlu0 %v2847_v8 }
 0x3cc   :  { %2622 = vset.pattern.permute.xlu1 %v2848_v17 }
 0x3cd   :  { %920 = vperm.xlu1 %2622, %v3064_v12  }
 0x3d1   :  { %924 = vperm.xlu1 %2622, %v3067_v14  }
 0x3d5   :  { %2623 = vset.pattern.permute.xlu1 %v2847_v8  ;;  %v2396_v8 = vunpack.c.3.s8 %v2947_v20 }
 0x3d7   :  { %v708_v35 = vcvt.s32.f32 %v2396_v8 }
 0x3d9   :  { %vm710_vm14 = vcmp.gt.f32.partialorder %v708_v35, 0.0 }
 0x3da   :  { %v3093_v20 = vsel %vm710_vm14, 0.0, %v2850_v30 }
 0x42a   :  { %v3075_v16 = vpop.f32.mrb[0].mxu0 }
 0x42b   :  { %v2471_v18 = vpop.f32.mrb[1].mxu0 }
 0x42c   :  { %v3077_v9 = vpop.f32.mrb[2].mxu0 }
 0x42d   :  { %v2472_v19 = vpop.f32.mrb[3].mxu0 }
 0x432   :  { %v3079_v21 = vpop.f32.mrb[4].mxu0 }
 0x433   :  { %v2483_v22 = vpop.f32.mrb[5].mxu0 }
 0x434   :  { %v3081_v24 = vpop.f32.mrb[6].mxu0 }
 0x435   :  { %v2484_v25 = vpop.f32.mrb[7].mxu0 }
 0x43b   :  { %v3083_v26 = vpop.f32.mrb[8].mxu0 }
 0x43c   :  { %v2495_v17 = vpop.f32.mrb[9].mxu0  ;;  %v716_v34 = vrot.slane %v3083_v26, %v2975_v61  ;;  %v918_v44 = vrot.slane %v3083_v26, %v2954_v27 }
 0x43d   :  { %v653_v28 = vpop.f32.mrb[10].mxu0 }
 0x43e   :  { %v2496_v32 = vpop.f32.mrb[11].mxu0 }
 0x445   :  { %v720_v37 = vpop.permute.xlu0 %719 }
 0x446   :  { %v727_v38 = vadd.f32 %v720_v37, %v716_v34 }
 0x447   :  { %v725_v36 = vpop.permute.xlu1 %724 }
 0x448   :  { %vm729_vm15 = vcmp.ge.f32.partialorder %v727_v38, 0.0  ;;  %v731_v39 = vmul.f32 0.2, %v727_v38  ;;  %v728_v40 = vadd.f32 %v725_v36, %v716_v34 }
 0x44a   :  { %vm730_vm2 = vcmp.ge.f32.partialorder %v728_v40, 0.0  ;;  %v732_v31 = vmul.f32 0.2, %v728_v40  ;;  %v733_v42 = vsel %vm729_vm15, %v727_v38, %v731_v39  ;;  %v2634_v38 = vld [vmem:[%s3538_s1 + $0x20] sm:$0xff]  }
 0x44b   :  { %v735_v45 = vadd.f32 %v733_v42, %v3090_v41  ;;  %2504 = vmatpush3.bf16.msra.mxu0 %v2634_v38 }
 0x44c   :  { %v921_v46 = vpop.permute.xlu1 %920  ;;  %v734_v43 = vsel %vm730_vm2, %v728_v40, %v732_v31  ;;  %2515 = vmatprep.subr.bf16.mxu0 %v2844_v1  ;;  %vm580_vm2 = vcmask 64512  }
 0x44d   :  { %v927_v48 = vadd.f32 %v921_v46, %v918_v44  ;;  %v737_v49 = vsel %vm178_vm4, %v735_v45, -inf  ;;  %v736_v50 = vadd.f32 %v734_v43, %v3093_v20 }
 0x44e   :  { %738 = vmax.xlane.f32.xlu1 %v737_v49 }
 0x44f   :  { %vm929_vm3 = vcmp.ge.f32.partialorder %v927_v48, 0.0  ;;  %v931_v51 = vmul.f32 0.2, %v927_v48  ;;  %v740_v6 = vsel %vm178_vm4, %v736_v50, -inf }
 0x450   :  { %741 = vmax.xlane.f32.xlu0 %v740_v6  ;;  %v925_v52 = vpop.permute.xlu1 %924 }
 0x451   :  { %v928_v53 = vadd.f32 %v925_v52, %v918_v44  ;;  %v933_v54 = vsel %vm929_vm3, %v927_v48, %v931_v51  ;;  %vm585_vm3 = vcmask 195584  }
 0x452   :  { %v935_v55 = vadd.f32 %v933_v54, %v3090_v41 }
 0x453   :  { %vm930_vm5 = vcmp.ge.f32.partialorder %v928_v53, 0.0  ;;  %v932_v56 = vmul.f32 0.2, %v928_v53 }
 0x454   :  { %v937_v57 = vsel %vm178_vm4, %v935_v55, -inf }
 0x455   :  { %938 = vmax.xlane.f32.xlu1 %v937_v57  ;;  %v934_v58 = vsel %vm930_vm5, %v928_v53, %v932_v56  ;;  %v2635_v56 = vld [vmem:[%s3538_s1 + $0x30] sm:$0xff]  }
 0x456   :  { %v936_v59 = vadd.f32 %v934_v58, %v3093_v20 }
 0x458   :  { %v940_v60 = vsel %vm178_vm4, %v936_v59, -inf }
 0x459   :  { %941 = vmax.xlane.f32.xlu1 %v940_v60 }
 0x4db   :  { %v739_v62 = vpop.xlane.xlu1 %738 }
 0x4dc   :  { %v743_v0 = vsub.f32 %v735_v45, %v739_v62 }
 0x4dd   :  { %v742_v3 = vpop.xlane.xlu0 %741 }
 0x4de   :  { %v745_v5 = vmul.f32 1.442695, %v743_v0  ;;  %v744_v11 = vsub.f32 %v736_v50, %v742_v3 }
 0x4e0   :  { %2682 = vpow2.f32 %v745_v5  ;;  %v747_v13 = vmul.f32 1.442695, %v744_v11 }
 0x4e2   :  { %2684 = vpow2.f32 %v747_v13  ;;  %v939_v15 = vpop.xlane.xlu1 %938 }
 0x4e3   :  { %v943_v18 = vsub.f32 %v935_v55, %v939_v15 }
 0x4e5   :  { %v945_v19 = vmul.f32 1.442695, %v943_v18 }
 0x4e6   :  { %v942_v22 = vpop.xlane.xlu1 %941 }
 0x4e7   :  { %2686 = vpow2.f32 %v945_v19  ;;  %v944_v25 = vsub.f32 %v936_v59, %v942_v22  ;;  %v2636_v19 = vld [vmem:[%s3537_s0 + $0x10] sm:$0xff]  }
 0x4e8   :  { %v1171_v38 = vsel %vm44_vm0, %v2636_v19, 0 }
 0x4e9   :  { %v947_v17 = vmul.f32 1.442695, %v944_v25 }
 0x4ea   :  { %v2683_v28 = vpop.eup %2682 }
 0x4eb   :  { %2688 = vpow2.f32 %v947_v17  ;;  %v749_v29 = vsel %vm178_vm4, %v2683_v28, 0.0 }
 0x4ec   :  { %v2685_v32 = vpop.eup %2684  ;;  %750 = vadd.xlane.f32.xlu1 %v749_v29 }
 0x4ed   :  { %v752_v8 = vsel %vm178_vm4, %v2685_v32, 0.0 }
 0x4ee   :  { %753 = vadd.xlane.f32.xlu0 %v752_v8 }
 0x4f1   :  { %v3107_v33 = vpop.eup %2686 }
 0x4f2   :  { %v949_v34 = vsel %vm178_vm4, %v3107_v33, 0.0 }
 0x4f3   :  { %950 = vadd.xlane.f32.xlu1 %v949_v34 }
 0x4f5   :  { %v3111_v35 = vpop.eup %2688 }
 0x4f6   :  { %v952_v37 = vsel %vm178_vm4, %v3111_v35, 0.0 }
 0x4f7   :  { %953 = vadd.xlane.f32.xlu0 %v952_v37 }
 0x504   :  { %820 = vperm.xlu1 %2623, %v3064_v12  }
 0x508   :  { %2625 = vset.pattern.permute.xlu1 %v2846_v7 }
 0x509   :  { %1020 = vperm.xlu1 %2625, %v3064_v12   ;;  %v818_v12 = vrot.slane %v3083_v26, %v2950_v23 }
 0x50d   :  { %1024 = vperm.xlu1 %2625, %v3067_v14   ;;  %824 = vperm.xlu0 %2624, %v3067_v14   ;;  %v1018_v14 = vrot.slane %v3083_v26, %v2968_v47 }
 0x511   :  { %2626 = vset.pattern.permute.xlu0 %v2846_v7 }
 0x579   :  { %v751_v36 = vpop.xlane.xlu1 %750 }
 0x57a   :  { %v755_v39 = vmax.f32 %v751_v36, 1e-30 }
 0x57b   :  { %v754_v40 = vpop.xlane.xlu0 %753 }
 0x57c   :  { %2690 = vrcp.f32 %v755_v39  ;;  %v756_v31 = vmax.f32 %v754_v40, 1e-30 }
 0x57e   :  { %2692 = vrcp.f32 %v756_v31 }
 0x580   :  { %v951_v42 = vpop.xlane.xlu1 %950 }
 0x581   :  { %v955_v44 = vmax.f32 %v951_v42, 1e-30 }
 0x583   :  { %2694 = vrcp.f32 %v955_v44  ;;  %v3173_v44 = vld [vmem:[%s3542_s5 + $0x8] sm:$0xff]  }
 0x584   :  { %v954_v45 = vpop.xlane.xlu0 %953  ;;  %v821_v46 = vpop.permute.xlu1 %820 }
 0x585   :  { %v956_v43 = vmax.f32 %v954_v45, 1e-30  ;;  %v827_v48 = vadd.f32 %v821_v46, %v818_v12 }
 0x586   :  { %v2691_v49 = vpop.eup %2690 }
 0x587   :  { %2696 = vrcp.f32 %v956_v43  ;;  %vm829_vm6 = vcmp.ge.f32.partialorder %v827_v48, 0.0  ;;  %v831_v7 = vmul.f32 0.2, %v827_v48  ;;  %v759_v6 = vmul.f32 %v2691_v49, %v2683_v28 }
 0x588   :  { %v2693_v50 = vpop.eup %2692  ;;  %v1021_v51 = vpop.permute.xlu1 %1020  ;;  %v2400_v43 = vunpack.c.1.s8 %v3173_v44 }
 0x589   :  { %v760_v52 = vmul.f32 %v2693_v50, %v2685_v32  ;;  %v1027_v53 = vadd.f32 %v1021_v51, %v1018_v14  ;;  %v833_v54 = vsel %vm829_vm6, %v827_v48, %v831_v7  ;;  %v2399_v48 = vunpack.c.0.s8 %v3173_v44 }
 0x58a   :  { %v3130_v55 = vadd.f32 %v833_v54, %v3090_v41 }
 0x58b   :  { %vm1029_vm7 = vcmp.ge.f32.partialorder %v1027_v53, 0.0  ;;  %v1031_v57 = vmul.f32 0.2, %v1027_v53  ;;  %v761_v58 = vpack.c.bf16 %v760_v52, %v759_v6  ;;  %v1219_v6 = vcvt.s32.f32 %v2400_v43  ;;  %v2637_v43 = vld [vmem:[%s3538_s1 + $0x28] sm:$0xff]  }
 0x58c   :  { %v825_v59 = vpop.permute.xlu0 %824  ;;  %v1025_v60 = vpop.permute.xlu1 %1024  ;;  %v837_v26 = vsel %vm178_vm4, %v3130_v55, -inf  ;;  %v1218_v52 = vcvt.s32.f32 %v2399_v48  ;;  %2510 = vmatpush3.bf16.msra.mxu1 %v2637_v43 }
 0x58d   :  { %v828_v62 = vadd.f32 %v825_v59, %v818_v12  ;;  %v1028_v0 = vadd.f32 %v1025_v60, %v1018_v14  ;;  %2506 = vmatmul.mubr.msk.bf16.vlgmr.msra.gmra.mrb[12].mxu0 %vm178_vm4, %v761_v58  ;;  %838 = vmax.xlane.f32.xlu1 %v837_v26  ;;  %v1033_v3 = vsel %vm1029_vm7, %v1027_v53, %v1031_v57  ;;  %v2695_v11 = vpop.eup %2694  ;;  %vm1221_vm10 = vcmp.gt.f32.partialorder %v1219_v6, 0.0 }
 0x58e   :  { %2516 = vmatpush3.bf16.msra.mxu0 %v2635_v56  ;;  %v3139_v5 = vadd.f32 %v1033_v3, %v3090_v41  ;;  %2517 = vmatprep.mubr.msk.bf16.mxu0 %vm2845_vm1, %v2844_v1  ;;  %v959_v17 = vmul.f32 %v2695_v11, %v3107_v33  ;;  %vm1220_vm11 = vcmp.gt.f32.partialorder %v1218_v52, 0.0  ;;  %v1223_v3 = vsel %vm1221_vm10, 0.0, %v2850_v30 }
 0x58f   :  { %vm830_vm8 = vcmp.ge.f32.partialorder %v828_v62, 0.0  ;;  %v832_v13 = vmul.f32 0.2, %v828_v62  ;;  %vm1030_vm9 = vcmp.ge.f32.partialorder %v1028_v0, 0.0  ;;  %v1032_v15 = vmul.f32 0.2, %v1028_v0  ;;  %2527 = vmatprep.subr.bf16.mxu0 %v2844_v1  ;;  %2521 = vmatprep.subr.bf16.mxu1 %v2844_v1 }
 0x590   :  { %v1037_v18 = vsel %vm178_vm4, %v3139_v5, -inf  ;;  %v1222_v11 = vsel %vm1220_vm11, 0.0, %v2850_v30 }
 0x591   :  { %v2697_v22 = vpop.eup %2696  ;;  %1038 = vmax.xlane.f32.xlu1 %v1037_v18  ;;  %v834_v41 = vsel %vm830_vm8, %v828_v62, %v832_v13  ;;  %v1034_v25 = vsel %vm1030_vm9, %v1028_v0, %v1032_v15 }
 0x592   :  { %v960_v28 = vmul.f32 %v2697_v22, %v3111_v35  ;;  %v836_v29 = vadd.f32 %v834_v41, %v3093_v20  ;;  %v1036_v32 = vadd.f32 %v1034_v25, %v3093_v20  ;;  %v2333_v20 = vld [vmem:[%s3540_s3 + $0x4] sm:$0x3] }
 0x594   :  { %v840_v8 = vsel %vm178_vm4, %v836_v29, -inf  ;;  %v1040_v34 = vsel %vm178_vm4, %v1036_v32, -inf  ;;  %v961_v37 = vpack.c.bf16 %v960_v28, %v959_v17 }
 0x595   :  { %841 = vmax.xlane.f32.xlu0 %v840_v8  ;;  %1041 = vmax.xlane.f32.xlu1 %v1040_v34 }
 0x596   :  { %2518 = vmatmul.mubr.msk.bf16.vlgmr.msra.gmra.mrb[16].mxu0 %vm178_vm4, %v961_v37 }
 0x597   :  { %2528 = vmatpush3.bf16.xpose.msra.mxu0 %v1171_v38  ;;  %2529 = vmatprep.mubr.msk.bf16.mxu0 %vm2845_vm1, %v2844_v1 }
 0x598   :  { %2539 = vmatprep.subr.bf16.mxu0 %v2844_v1 }
 0x59e   :  { %2530 = vmatmul.mubr.msk.bf16.vlgmr.msra.gmra.mrb[20].mxu0 %vm44_vm0, %v2333_v20 }
 0x59f   :  { %2541 = vmatprep.mubr.msk.bf16.mxu0 %vm2845_vm1, %v2844_v1 }
 0x61a   :  { %v839_v33 = vpop.xlane.xlu1 %838 }
 0x61b   :  { %v843_v53 = vsub.f32 %v3130_v55, %v839_v33 }
 0x61d   :  { %v845_v59 = vmul.f32 1.442695, %v843_v53 }
 0x61e   :  { %v1039_v40 = vpop.xlane.xlu1 %1038 }
 0x61f   :  { %v1043_v60 = vsub.f32 %v3139_v5, %v1039_v40 }
 0x621   :  { %v1045_v19 = vmul.f32 1.442695, %v1043_v60 }
 0x622   :  { %v842_v42 = vpop.xlane.xlu0 %841  ;;  %v1042_v45 = vpop.xlane.xlu1 %1041 }
 0x623   :  { %v844_v12 = vsub.f32 %v836_v29, %v842_v42  ;;  %v1044_v50 = vsub.f32 %v1036_v32, %v1042_v45 }
 0x625   :  { %v847_v14 = vmul.f32 1.442695, %v844_v12  ;;  %v1047_v54 = vmul.f32 1.442695, %v1044_v50 }
 0x627   :  { %2698 = vpow2.f32 %v847_v14 }
 0x628   :  { %2700 = vpow2.f32 %v1047_v54 }
 0x629   :  { %2702 = vpow2.f32 %v845_v59 }
 0x62a   :  { %2704 = vpow2.f32 %v1045_v19 }
 0x631   :  { %v3199_v34 = vpop.eup %2698 }
 0x632   :  { %v852_v37 = vsel %vm178_vm4, %v3199_v34, 0.0  ;;  %v3204_v33 = vpop.eup %2700 }
 0x660   :  { %v3166_v35 = vpop.f32.mrb[12].mxu0 }
 0x661   :  { %v2507_v36 = vpop.f32.mrb[13].mxu0 }
 0x662   :  { %v3168_v39 = vpop.f32.mrb[14].mxu0  ;;  %v2703_v36 = vpop.eup %2702 }
 0x663   :  { %v2508_v31 = vpop.f32.mrb[15].mxu0  ;;  %v849_v42 = vsel %vm178_vm4, %v2703_v36, 0.0  ;;  %v2705_v12 = vpop.eup %2704 }
 0x664   :  { %v1052_v31 = vsel %vm178_vm4, %v3204_v33, 0.0  ;;  %v1049_v45 = vsel %vm178_vm4, %v2705_v12, 0.0 }
 0x669   :  { %v3175_v46 = vpop.f32.mrb[16].mxu0 }
 0x66a   :  { %v2519_v49 = vpop.f32.mrb[17].mxu0 }
 0x66b   :  { %v3179_v7 = vpop.f32.mrb[18].mxu0 }
 0x66c   :  { %v2520_v51 = vpop.f32.mrb[19].mxu0 }
 0x671   :  { %v1207_v56 = vpop.f32.mrb[20].mxu0 }
 0x672   :  { %vm1224_vm12 = vcmp.ge.f32.partialorder %v1207_v56, 0.0  ;;  %v1225_v57 = vmul.f32 0.2, %v1207_v56  ;;  %v2531_v58 = vpop.f32.mrb[21].mxu0 }
 0x673   :  { %v1210_v26 = vpop.f32.mrb[22].mxu0 }
 0x674   :  { %v1226_v62 = vsel %vm1224_vm12, %v1207_v56, %v1225_v57  ;;  %v2532_v0 = vpop.f32.mrb[23].mxu0 }
 0x675   :  { %v1398_v55 = vrot.slane %v1226_v62, %v2954_v27  ;;  %v1230_v13 = vrot.slane %v1226_v62, %v2975_v61  ;;  %v1314_v15 = vrot.slane %v1226_v62, %v2950_v23  ;;  %v1482_v18 = vrot.slane %v1226_v62, %v2968_v47 }
 0x677   :  { %v1400_v22 = vadd.f32 %v1398_v55, %v1223_v3  ;;  %v1231_v5 = vadd.f32 %v1230_v13, %v1222_v11  ;;  %v3189_v41 = vadd.f32 %v1314_v15, %v1223_v3  ;;  %v3191_v25 = vadd.f32 %v1314_v15, %v1222_v11 }
 0x678   :  { %v3193_v17 = vadd.f32 %v1482_v18, %v1223_v3  ;;  %v3195_v28 = vadd.f32 %v1482_v18, %v1222_v11  ;;  %v1232_v8 = vadd.f32 %v1230_v13, %v1223_v3  ;;  %v1399_v20 = vadd.f32 %v1398_v55, %v1222_v11 }
 0x679   :  { %v1404_v29 = vsel %vm178_vm4, %v1400_v22, -inf  ;;  %v1233_v32 = vsel %vm178_vm4, %v1231_v5, -inf }
 0x67a   :  { %1405 = vmax.xlane.f32.xlu0 %v1404_v29  ;;  %1234 = vmax.xlane.f32.xlu1 %v1233_v32  ;;  %v1236_v38 = vsel %vm178_vm4, %v1232_v8, -inf  ;;  %v1401_v40 = vsel %vm178_vm4, %v1399_v20, -inf }
 0x67e   :  { %853 = vadd.xlane.f32.xlu0 %v852_v37  ;;  %1237 = vmax.xlane.f32.xlu1 %v1236_v38 }
 0x682   :  { %1402 = vmax.xlane.f32.xlu1 %v1401_v40  ;;  %1053 = vadd.xlane.f32.xlu0 %v1052_v31  ;;  %v2638_v40 = vld [vmem:[%s3538_s1 + $0x38] sm:$0xff]   ;;  %v1320_v31 = vsel %vm178_vm4, %v3189_v41, -inf }
 0x686   :  { %850 = vadd.xlane.f32.xlu1 %v849_v42  ;;  %v1317_v42 = vsel %vm178_vm4, %v3191_v25, -inf }
 0x68a   :  { %1050 = vadd.xlane.f32.xlu1 %v1049_v45 }
 0x707   :  { %v1406_v48 = vpop.xlane.xlu0 %1405  ;;  %v1235_v49 = vpop.xlane.xlu1 %1234 }
 0x708   :  { %v1239_v14 = vsub.f32 %v1231_v5, %v1235_v49  ;;  %v1408_v50 = vsub.f32 %v1400_v22, %v1406_v48  ;;  %v1485_v49 = vsel %vm178_vm4, %v3195_v28, -inf }
 0x70a   :  { %v1241_v51 = vmul.f32 1.442695, %v1239_v14  ;;  %v1411_v54 = vmul.f32 1.442695, %v1408_v50 }
 0x70b   :  { %v1238_v6 = vpop.xlane.xlu1 %1237  ;;  %v854_v52 = vpop.xlane.xlu0 %853 }
 0x70c   :  { %v1240_v53 = vsub.f32 %v1232_v8, %v1238_v6  ;;  %2706 = vpow2.f32 %v1241_v51  ;;  %v856_v57 = vmax.f32 %v854_v52, 1e-30 }
 0x70e   :  { %v1243_v56 = vmul.f32 1.442695, %v1240_v53 }
 0x70f   :  { %v1403_v58 = vpop.xlane.xlu1 %1402  ;;  %v1054_v0 = vpop.xlane.xlu0 %1053 }
 0x710   :  { %2708 = vpow2.f32 %v1243_v56  ;;  %v1407_v59 = vsub.f32 %v1399_v20, %v1403_v58  ;;  %v1056_v55 = vmax.f32 %v1054_v0, 1e-30 }
 0x711   :  { %2710 = vpow2.f32 %v1411_v54 }
 0x712   :  { %v1409_v60 = vmul.f32 1.442695, %v1407_v59  ;;  %2712 = vrcp.f32 %v856_v57 }
 0x713   :  { %v851_v26 = vpop.xlane.xlu1 %850 }
 0x714   :  { %2714 = vpow2.f32 %v1409_v60  ;;  %v855_v62 = vmax.f32 %v851_v26, 1e-30 }
 0x716   :  { %2716 = vrcp.f32 %v855_v62  ;;  %v2707_v3 = vpop.eup %2706  ;;  %v2640_v62 = vld [vmem:[%s3538_s1 + $0x50] sm:$0xff]  }
 0x717   :  { %v1051_v11 = vpop.xlane.xlu1 %1050  ;;  %v1245_v15 = vsel %vm178_vm4, %v2707_v3, 0.0 }
 0x718   :  { %v1055_v13 = vmax.f32 %v1051_v11, 1e-30  ;;  %1246 = vadd.xlane.f32.xlu1 %v1245_v15 }
 0x71a   :  { %v2709_v18 = vpop.eup %2708  ;;  %2718 = vrcp.f32 %v1055_v13 }
 0x71b   :  { %v1248_v19 = vsel %vm178_vm4, %v2709_v18, 0.0  ;;  %v2711_v22 = vpop.eup %2710  ;;  %2720 = vrcp.f32 %v1056_v55 }
 0x71c   :  { %1249 = vadd.xlane.f32.xlu0 %v1248_v19  ;;  %v2713_v5 = vpop.eup %2712  ;;  %v1416_v32 = vsel %vm178_vm4, %v2711_v22, 0.0 }
 0x71d   :  { %v860_v38 = vmul.f32 %v2713_v5, %v3199_v34 }
 0x71e   :  { %v2715_v29 = vpop.eup %2714 }
 0x71f   :  { %v1413_v8 = vsel %vm178_vm4, %v2715_v29, 0.0 }
 0x720   :  { %v2717_v37 = vpop.eup %2716  ;;  %1417 = vadd.xlane.f32.xlu0 %v1416_v32  ;;  %1414 = vadd.xlane.f32.xlu1 %v1413_v8 }
 0x721   :  { %v859_v20 = vmul.f32 %v2717_v37, %v2703_v36  ;;  %v1488_v36 = vsel %vm178_vm4, %v3193_v17, -inf }
 0x723   :  { %v861_v45 = vpack.c.bf16 %v860_v38, %v859_v20 }
 0x724   :  { %v2719_v43 = vpop.eup %2718  ;;  %1321 = vmax.xlane.f32.xlu0 %v1320_v31  ;;  %1318 = vmax.xlane.f32.xlu1 %v1317_v42 }
 0x725   :  { %2512 = vmatmul.mubr.msk.bf16.vlgmr.msra.gmra.mrb[20].mxu1 %vm178_vm4, %v861_v45  ;;  %v2721_v48 = vpop.eup %2720  ;;  %v1059_v34 = vmul.f32 %v2719_v43, %v2705_v12  ;;  %v2639_v12 = vld [vmem:[%s3538_s1 + $0x40] sm:$0xff]  }
 0x726   :  { %2522 = vmatpush3.bf16.msra.mxu1 %v2638_v40  ;;  %2523 = vmatprep.mubr.msk.bf16.mxu1 %vm2845_vm1, %v2844_v1  ;;  %v1060_v14 = vmul.f32 %v2721_v48, %v3204_v33 }
 0x727   :  { %2533 = vmatprep.subr.bf16.mxu1 %v2844_v1 }
 0x728   :  { %1489 = vmax.xlane.f32.xlu0 %v1488_v36  ;;  %1486 = vmax.xlane.f32.xlu1 %v1485_v49  ;;  %v1061_v50 = vpack.c.bf16 %v1060_v14, %v1059_v34  ;;  %v2404_v36 = vunpack.c.3.s8 %v3173_v44  ;;  %v2403_v49 = vunpack.c.2.s8 %v3173_v44 }
 0x72d   :  { %2524 = vmatmul.mubr.msk.bf16.vlgmr.msra.gmra.mrb[24].mxu1 %vm178_vm4, %v1061_v50 }
 0x72e   :  { %2535 = vmatprep.mubr.msk.bf16.mxu1 %vm2845_vm1, %v2844_v1  ;;  %2534 = vmatpush3.bf16.msra.mxu1 %v2639_v12  ;;  %v1667_v12 = vcvt.s32.f32 %v2404_v36 }
 0x72f   :  { %2545 = vmatprep.subr.bf16.mxu1 %v2844_v1 }
 0x730   :  { %vm1669_vm13 = vcmp.gt.f32.partialorder %v1667_v12, 0.0 }
 0x7a5   :  { %v1247_v51 = vpop.xlane.xlu1 %1246 }
 0x7a6   :  { %v1251_v6 = vmax.f32 %v1247_v51, 1e-30  ;;  %v1666_v51 = vcvt.s32.f32 %v2403_v49 }
 0x7a8   :  { %2722 = vrcp.f32 %v1251_v6  ;;  %vm1668_vm14 = vcmp.gt.f32.partialorder %v1666_v51, 0.0 }
 0x7a9   :  { %v1250_v52 = vpop.xlane.xlu0 %1249 }
 0x7aa   :  { %v1252_v53 = vmax.f32 %v1250_v52, 1e-30 }
 0x7ac   :  { %2724 = vrcp.f32 %v1252_v53 }
 0x7ad   :  { %v1418_v33 = vpop.xlane.xlu0 %1417  ;;  %v1415_v54 = vpop.xlane.xlu1 %1414 }
 0x7ae   :  { %v1420_v56 = vmax.f32 %v1418_v33, 1e-30  ;;  %v1419_v57 = vmax.f32 %v1415_v54, 1e-30 }
 0x7b0   :  { %2726 = vrcp.f32 %v1420_v56 }
 0x7b1   :  { %2728 = vrcp.f32 %v1419_v57  ;;  %v1322_v6 = vpop.xlane.xlu0 %1321  ;;  %v1319_v52 = vpop.xlane.xlu1 %1318 }
 0x7b2   :  { %v2723_v58 = vpop.eup %2722  ;;  %v1324_v56 = vsub.f32 %v3189_v41, %v1322_v6 }
 0x7b3   :  { %v1255_v60 = vmul.f32 %v2723_v58, %v2707_v3  ;;  %v2641_v3 = vld [vmem:[%s3537_s0 + $0x18] sm:$0xff]   ;;  %v1323_v58 = vsub.f32 %v3191_v25, %v1319_v52 }
 0x7b4   :  { %v1619_v19 = vsel %vm44_vm0, %v2641_v3, 0 }
 0x7b6   :  { %v2725_v59 = vpop.eup %2724 }
 0x7b7   :  { %v1256_v26 = vmul.f32 %v2725_v59, %v2709_v18  ;;  %v1490_v59 = vpop.xlane.xlu0 %1489 }
 0x7b9   :  { %v1257_v0 = vpack.c.bf16 %v1256_v26, %v1255_v60  ;;  %v1671_v26 = vsel %vm1669_vm13, 0.0, %v2850_v30 }
 0x7ba   :  { %v2727_v11 = vpop.eup %2726 }
 0x7bb   :  { %v2729_v55 = vpop.eup %2728  ;;  %2536 = vmatmul.mubr.msk.bf16.vlgmr.msra.gmra.mrb[28].mxu1 %vm178_vm4, %v1257_v0  ;;  %v1424_v13 = vmul.f32 %v2727_v11, %v2711_v22  ;;  %v2358_v22 = vld [vmem:[%s3540_s3 + $0x6] sm:$0x3]  ;;  %v1487_v0 = vpop.xlane.xlu1 %1486 }
 0x7bc   :  { %2546 = vmatpush3.bf16.msra.mxu1 %v2640_v62  ;;  %2547 = vmatprep.mubr.msk.bf16.mxu1 %vm2845_vm1, %v2844_v1  ;;  %v1423_v15 = vmul.f32 %v2729_v55, %v2715_v29  ;;  %v1670_v62 = vsel %vm1668_vm14, 0.0, %v2850_v30  ;;  %v1491_v25 = vsub.f32 %v3195_v28, %v1487_v0 }
 0x7bd   :  { %2557 = vmatprep.subr.bf16.mxu1 %v2844_v1 }
 0x7be   :  { %v1425_v18 = vpack.c.bf16 %v1424_v13, %v1423_v15  ;;  %v1327_v13 = vmul.f32 1.442695, %v1324_v56  ;;  %v1492_v15 = vsub.f32 %v3193_v17, %v1490_v59  ;;  %v2642_v56 = vld [vmem:[%s3538_s1 + $0x48] sm:$0xff]  }
 0x7bf   :  { %2540 = vmatpush3.bf16.msra.mxu0 %v2642_v56 }
 0x7c0   :  { %2730 = vpow2.f32 %v1327_v13  ;;  %2551 = vmatprep.subr.bf16.mxu0 %v2844_v1 }
 0x7c3   :  { %2548 = vmatmul.mubr.msk.bf16.vlgmr.msra.gmra.mrb[32].mxu1 %vm178_vm4, %v1425_v18  ;;  %v1325_v18 = vmul.f32 1.442695, %v1323_v58 }
 0x7c4   :  { %2559 = vmatprep.mubr.msk.bf16.mxu1 %vm2845_vm1, %v2844_v1 }
 0x7c5   :  { %2558 = vmatpush3.bf16.xpose.msra.mxu1 %v1619_v19  ;;  %2732 = vpow2.f32 %v1325_v18 }
 0x7c6   :  { %2569 = vmatprep.subr.bf16.mxu1 %v2844_v1 }
 0x7ca   :  { %v3298_v49 = vpop.eup %2730 }
 0x7cb   :  { %v1332_v6 = vsel %vm178_vm4, %v3298_v49, 0.0 }
 0x7cc   :  { %2560 = vmatmul.mubr.msk.bf16.vlgmr.msra.gmra.mrb[36].mxu1 %vm44_vm0, %v2358_v22 }
 0x7cd   :  { %2571 = vmatprep.mubr.msk.bf16.mxu1 %vm2845_vm1, %v2844_v1 }
 0x7cf   :  { %v3302_v12 = vpop.eup %2732 }
 0x7d0   :  { %v1329_v52 = vsel %vm178_vm4, %v3302_v12, 0.0 }
 0x7f8   :  { %v3264_v5 = vpop.f32.mrb[20].mxu1 }
 0x7f9   :  { %v2513_v29 = vpop.f32.mrb[21].mxu1 }
 0x7fa   :  { %v3266_v32 = vpop.f32.mrb[22].mxu1 }
 0x7fb   :  { %v2514_v8 = vpop.f32.mrb[23].mxu1 }
 0x800   :  { %v3268_v37 = vpop.f32.mrb[24].mxu1 }
 0x801   :  { %v2525_v38 = vpop.f32.mrb[25].mxu1 }
 0x802   :  { %v3270_v20 = vpop.f32.mrb[26].mxu1 }
 0x803   :  { %v2526_v40 = vpop.f32.mrb[27].mxu1 }
 0x88e   :  { %v3272_v31 = vpop.f32.mrb[28].mxu1 }
 0x88f   :  { %v2537_v42 = vpop.f32.mrb[29].mxu1 }
 0x890   :  { %v3274_v45 = vpop.f32.mrb[30].mxu1 }
 0x891   :  { %v2538_v43 = vpop.f32.mrb[31].mxu1 }
 0x896   :  { %v3276_v48 = vpop.f32.mrb[32].mxu1 }
 0x897   :  { %v2549_v34 = vpop.f32.mrb[33].mxu1 }
 0x898   :  { %v3280_v14 = vpop.f32.mrb[34].mxu1 }
 0x899   :  { %v2550_v50 = vpop.f32.mrb[35].mxu1 }
 0x89f   :  { %v1655_v53 = vpop.f32.mrb[36].mxu1 }
 0x8a0   :  { %vm1672_vm15 = vcmp.ge.f32.partialorder %v1655_v53, 0.0  ;;  %v1673_v33 = vmul.f32 0.2, %v1655_v53  ;;  %v2561_v54 = vpop.f32.mrb[37].mxu1 }
 0x8a1   :  { %v1658_v57 = vpop.f32.mrb[38].mxu1 }
 0x8a2   :  { %v1674_v44 = vsel %vm1672_vm15, %v1655_v53, %v1673_v33  ;;  %v2562_v60 = vpop.f32.mrb[39].mxu1 }
 0x8a3   :  { %v1678_v11 = vrot.slane %v1674_v44, %v2975_v61  ;;  %v1762_v55 = vrot.slane %v1674_v44, %v2950_v23  ;;  %v1846_v19 = vrot.slane %v1674_v44, %v2954_v27  ;;  %v1495_v23 = vmul.f32 1.442695, %v1492_v15 }
 0x8a4   :  { %v1493_v61 = vmul.f32 1.442695, %v1491_v25  ;;  %v1930_v17 = vrot.slane %v1674_v44, %v2968_v47 }
 0x8a5   :  { %v1680_v3 = vadd.f32 %v1678_v11, %v1671_v26  ;;  %v1679_v41 = vadd.f32 %v1678_v11, %v1670_v62  ;;  %v1764_v30 = vadd.f32 %v1762_v55, %v1671_v26  ;;  %v1763_v8 = vadd.f32 %v1762_v55, %v1670_v62 }
 0x8a6   :  { %v1848_v40 = vadd.f32 %v1846_v19, %v1671_v26  ;;  %v1847_v27 = vadd.f32 %v1846_v19, %v1670_v62  ;;  %2734 = vpow2.f32 %v1495_v23  ;;  %v1932_v34 = vadd.f32 %v1930_v17, %v1671_v26 }
 0x8a7   :  { %v1684_v22 = vsel %vm178_vm4, %v1680_v3, -inf  ;;  %v1681_v29 = vsel %vm178_vm4, %v1679_v41, -inf  ;;  %v1768_v38 = vsel %vm178_vm4, %v1764_v30, -inf  ;;  %v1765_v28 = vsel %vm178_vm4, %v1763_v8, -inf }
 0x8a8   :  { %1685 = vmax.xlane.f32.xlu0 %v1684_v22  ;;  %1682 = vmax.xlane.f32.xlu1 %v1681_v29  ;;  %2736 = vpow2.f32 %v1493_v61  ;;  %v1852_v42 = vsel %vm178_vm4, %v1848_v40, -inf  ;;  %v1849_v43 = vsel %vm178_vm4, %v1847_v27, -inf  ;;  %v1931_v36 = vadd.f32 %v1930_v17, %v1670_v62 }
 0x8a9   :  { %v1936_v47 = vsel %vm178_vm4, %v1932_v34, -inf }
 0x8aa   :  { %v1933_v50 = vsel %vm178_vm4, %v1931_v36, -inf }
 0x8ac   :  { %1769 = vmax.xlane.f32.xlu0 %v1768_v38  ;;  %1766 = vmax.xlane.f32.xlu1 %v1765_v28 }
 0x8b0   :  { %1853 = vmax.xlane.f32.xlu0 %v1852_v42  ;;  %1850 = vmax.xlane.f32.xlu1 %v1849_v43  ;;  %v3304_v51 = vpop.eup %2734 }
 0x8b1   :  { %v1500_v33 = vsel %vm178_vm4, %v3304_v51, 0.0 }
 0x8b2   :  { %v3310_v53 = vpop.eup %2736 }
 0x8b3   :  { %v1497_v54 = vsel %vm178_vm4, %v3310_v53, 0.0 }
 0x8b4   :  { %1937 = vmax.xlane.f32.xlu0 %v1936_v47  ;;  %1934 = vmax.xlane.f32.xlu1 %v1933_v50 }
 0x8b8   :  { %1333 = vadd.xlane.f32.xlu0 %v1332_v6  ;;  %1330 = vadd.xlane.f32.xlu1 %v1329_v52 }
 0x8bc   :  { %1501 = vadd.xlane.f32.xlu0 %v1500_v33  ;;  %1498 = vadd.xlane.f32.xlu1 %v1497_v54 }
 0x935   :  { %v1686_v57 = vpop.xlane.xlu0 %1685  ;;  %v1683_v58 = vpop.xlane.xlu1 %1682 }
 0x936   :  { %v1688_v59 = vsub.f32 %v1680_v3, %v1686_v57  ;;  %v1687_v44 = vsub.f32 %v1679_v41, %v1683_v58 }
 0x938   :  { %v1691_v60 = vmul.f32 1.442695, %v1688_v59  ;;  %v1689_v26 = vmul.f32 1.442695, %v1687_v44 }
 0x939   :  { %v1770_v62 = vpop.xlane.xlu0 %1769  ;;  %v1767_v0 = vpop.xlane.xlu1 %1766 }
 0x93a   :  { %2738 = vpow2.f32 %v1691_v60  ;;  %v1772_v11 = vsub.f32 %v1764_v30, %v1770_v62  ;;  %v1771_v55 = vsub.f32 %v1763_v8, %v1767_v0 }
 0x93b   :  { %2740 = vpow2.f32 %v1689_v26 }
 0x93c   :  { %v1775_v13 = vmul.f32 1.442695, %v1772_v11  ;;  %v1773_v15 = vmul.f32 1.442695, %v1771_v55 }
 0x93d   :  { %v1854_v18 = vpop.xlane.xlu0 %1853  ;;  %v1851_v25 = vpop.xlane.xlu1 %1850 }
 0x93e   :  { %2742 = vpow2.f32 %v1775_v13  ;;  %v1856_v19 = vsub.f32 %v1848_v40, %v1854_v18  ;;  %v1855_v22 = vsub.f32 %v1847_v27, %v1851_v25  ;;  %v2643_v25 = vld [vmem:[%s3538_s1 + $0x58] sm:$0xff]  }
 0x93f   :  { %2744 = vpow2.f32 %v1773_v15 }
 0x940   :  { %v1859_v29 = vmul.f32 1.442695, %v1856_v19  ;;  %v1857_v23 = vmul.f32 1.442695, %v1855_v22 }
 0x941   :  { %v1938_v3 = vpop.xlane.xlu0 %1937  ;;  %v1935_v41 = vpop.xlane.xlu1 %1934 }
 0x942   :  { %2746 = vpow2.f32 %v1859_v29  ;;  %v1940_v61 = vsub.f32 %v1932_v34, %v1938_v3  ;;  %v1939_v17 = vsub.f32 %v1931_v36, %v1935_v41  ;;  %v2644_v3 = vld [vmem:[%s3538_s1 + $0x60] sm:$0xff]  }
 0x943   :  { %2748 = vpow2.f32 %v1857_v23 }
 0x944   :  { %v3320_v38 = vpop.eup %2738  ;;  %v1943_v30 = vmul.f32 1.442695, %v1940_v61  ;;  %v1941_v8 = vmul.f32 1.442695, %v1939_v17 }
 0x945   :  { %v3322_v28 = vpop.eup %2740  ;;  %v1334_v42 = vpop.xlane.xlu0 %1333  ;;  %v1696_v40 = vsel %vm178_vm4, %v3320_v38, 0.0 }
 0x946   :  { %v1331_v43 = vpop.xlane.xlu1 %1330  ;;  %2750 = vpow2.f32 %v1943_v30  ;;  %v1336_v27 = vmax.f32 %v1334_v42, 1e-30  ;;  %1697 = vadd.xlane.f32.xlu0 %v1696_v40  ;;  %v1693_v34 = vsel %vm178_vm4, %v3322_v28, 0.0 }
 0x947   :  { %v1335_v47 = vmax.f32 %v1331_v43, 1e-30  ;;  %2752 = vpow2.f32 %v1941_v8  ;;  %1694 = vadd.xlane.f32.xlu1 %v1693_v34 }
 0x948   :  { %v3328_v36 = vpop.eup %2742  ;;  %2754 = vrcp.f32 %v1336_v27  ;;  %v2646_v27 = vld [vmem:[%s3538_s1 + $0x70] sm:$0xff]  }
 0x949   :  { %v3330_v50 = vpop.eup %2744  ;;  %2756 = vrcp.f32 %v1335_v47  ;;  %v1502_v6 = vpop.xlane.xlu0 %1501  ;;  %v1780_v33 = vsel %vm178_vm4, %v3328_v36, 0.0 }
 0x94a   :  { %v1499_v52 = vpop.xlane.xlu1 %1498  ;;  %v1504_v54 = vmax.f32 %v1502_v6, 1e-30  ;;  %1781 = vadd.xlane.f32.xlu0 %v1780_v33  ;;  %v1777_v57 = vsel %vm178_vm4, %v3330_v50, 0.0 }
 0x94b   :  { %v1503_v56 = vmax.f32 %v1499_v52, 1e-30  ;;  %1778 = vadd.xlane.f32.xlu1 %v1777_v57  ;;  %v2648_v52 = vld [vmem:[%s3543_s6] sm:$0xff]  }
 0x94c   :  { %v3336_v58 = vpop.eup %2746  ;;  %2758 = vrcp.f32 %v1504_v54 }
 0x94d   :  { %v3338_v59 = vpop.eup %2748  ;;  %2760 = vrcp.f32 %v1503_v56  ;;  %v1864_v44 = vsel %vm178_vm4, %v3336_v58, 0.0  ;;  %v2647_v56 = vld [vmem:[%s3538_s1 + $0x78] sm:$0xff]  }
 0x94e   :  { %1865 = vadd.xlane.f32.xlu0 %v1864_v44  ;;  %v1861_v60 = vsel %vm178_vm4, %v3338_v59, 0.0 }
 0x94f   :  { %1862 = vadd.xlane.f32.xlu1 %v1861_v60 }
 0x950   :  { %v3344_v26 = vpop.eup %2750 }
 0x951   :  { %v3346_v62 = vpop.eup %2752  ;;  %v1948_v0 = vsel %vm178_vm4, %v3344_v26, 0.0 }
 0x952   :  { %v2755_v11 = vpop.eup %2754  ;;  %1949 = vadd.xlane.f32.xlu0 %v1948_v0  ;;  %v1945_v55 = vsel %vm178_vm4, %v3346_v62, 0.0 }
 0x953   :  { %v2757_v13 = vpop.eup %2756  ;;  %v1340_v15 = vmul.f32 %v2755_v11, %v3298_v49  ;;  %1946 = vadd.xlane.f32.xlu1 %v1945_v55 }
 0x954   :  { %v1339_v18 = vmul.f32 %v2757_v13, %v3302_v12 }
 0x956   :  { %v2759_v19 = vpop.eup %2758  ;;  %v1341_v22 = vpack.c.bf16 %v1340_v15, %v1339_v18 }
 0x957   :  { %v2761_v29 = vpop.eup %2760  ;;  %v1508_v23 = vmul.f32 %v2759_v19, %v3304_v51  ;;  %v2645_v51 = vld [vmem:[%s3538_s1 + $0x68] sm:$0xff]  }
 0x958   :  { %2542 = vmatmul.mubr.msk.bf16.vlgmr.msra.gmra.mrb[24].mxu0 %vm178_vm4, %v1341_v22  ;;  %v1507_v49 = vmul.f32 %v2761_v29, %v3310_v53  ;;  %2570 = vmatpush3.bf16.msra.mxu1 %v2645_v51 }
 0x959   :  { %2552 = vmatpush3.bf16.msra.mxu0 %v2643_v25  ;;  %2553 = vmatprep.mubr.msk.bf16.mxu0 %vm2845_vm1, %v2844_v1 }
 0x95a   :  { %2563 = vmatprep.subr.bf16.mxu0 %v2844_v1  ;;  %v1509_v12 = vpack.c.bf16 %v1508_v23, %v1507_v49  ;;  %2581 = vmatprep.subr.bf16.mxu1 %v2844_v1 }
 0x960   :  { %2554 = vmatmul.mubr.msk.bf16.vlgmr.msra.gmra.mrb[28].mxu0 %vm178_vm4, %v1509_v12 }
 0x961   :  { %2565 = vmatprep.mubr.msk.bf16.mxu0 %vm2845_vm1, %v2844_v1  ;;  %2564 = vmatpush3.bf16.msra.mxu0 %v2644_v3 }
 0x962   :  { %2575 = vmatprep.subr.bf16.mxu0 %v2844_v1 }
 0x964   :  { %558 = vrot.lane.b32.xlu1 %v3056_v63, %s2851_s12 }
 0x968   :  { %566 = vrot.lane.b32.xlu1 %v3079_v21, %s2852_s15  ;;  %560 = vrot.lane.b32.xlu0 %v3058_v2, %s2851_s12 }
 0x96c   :  { %568 = vrot.lane.b32.xlu1 %v3081_v24, %s2852_s15  ;;  %1117 = vrot.lane.b32.xlu0 %v3264_v5, %s2851_s12 }
 0x970   :  { %1119 = vrot.lane.b32.xlu1 %v3266_v32, %s2851_s12  ;;  %574 = vrot.lane.b32.xlu0 %v3060_v4, %s2853_s16 }
 0x974   :  { %576 = vrot.lane.b32.xlu1 %v3062_v10, %s2853_s16  ;;  %1125 = vrot.lane.b32.xlu0 %v3175_v46, %s2852_s15 }
 0x978   :  { %1127 = vrot.lane.b32.xlu1 %v3179_v7, %s2852_s15  ;;  %1133 = vrot.lane.b32.xlu0 %v3268_v37, %s2853_s16 }
 0x97c   :  { %1135 = vrot.lane.b32.xlu1 %v3270_v20, %s2853_s16 }
 0x9d3   :  { %v1698_v63 = vpop.xlane.xlu0 %1697 }
 0x9d4   :  { %v1700_v2 = vmax.f32 %v1698_v63, 1e-30  ;;  %v1695_v21 = vpop.xlane.xlu1 %1694 }
 0x9d5   :  { %v1699_v24 = vmax.f32 %v1695_v21, 1e-30 }
 0x9d6   :  { %2762 = vrcp.f32 %v1700_v2 }
 0x9d7   :  { %2764 = vrcp.f32 %v1699_v24  ;;  %v1782_v4 = vpop.xlane.xlu0 %1781 }
 0x9d8   :  { %v1784_v10 = vmax.f32 %v1782_v4, 1e-30  ;;  %v1779_v5 = vpop.xlane.xlu1 %1778 }
 0x9d9   :  { %v1783_v32 = vmax.f32 %v1779_v5, 1e-30 }
 0x9da   :  { %2766 = vrcp.f32 %v1784_v10 }
 0x9db   :  { %2768 = vrcp.f32 %v1783_v32  ;;  %v1866_v46 = vpop.xlane.xlu0 %1865 }
 0x9dc   :  { %v1868_v7 = vmax.f32 %v1866_v46, 1e-30  ;;  %v1863_v53 = vpop.xlane.xlu1 %1862 }
 0x9dd   :  { %v1867_v41 = vmax.f32 %v1863_v53, 1e-30 }
 0x9de   :  { %2770 = vrcp.f32 %v1868_v7 }
 0x9df   :  { %2772 = vrcp.f32 %v1867_v41  ;;  %v1950_v37 = vpop.xlane.xlu0 %1949 }
 0x9e0   :  { %v2763_v20 = vpop.eup %2762  ;;  %v1952_v61 = vmax.f32 %v1950_v37, 1e-30  ;;  %v1947_v17 = vpop.xlane.xlu1 %1946 }
 0x9e1   :  { %v2765_v30 = vpop.eup %2764  ;;  %v1704_v8 = vmul.f32 %v2763_v20, %v3320_v38  ;;  %v1951_v42 = vmax.f32 %v1947_v17, 1e-30 }
 0x9e2   :  { %v1703_v43 = vmul.f32 %v2765_v30, %v3322_v28  ;;  %2774 = vrcp.f32 %v1952_v61 }
 0x9e3   :  { %2776 = vrcp.f32 %v1951_v42  ;;  %v561_v40 = vpop.permute.xlu0 %560 }
 0x9e4   :  { %v2767_v47 = vpop.eup %2766  ;;  %v559_v34 = vpop.permute.xlu1 %558  ;;  %v1705_v6 = vpack.c.bf16 %v1704_v8, %v1703_v43  ;;  %v582_v51 = vsel %vm580_vm2, %v3077_v9, %v561_v40 }
 0x9e5   :  { %v2769_v33 = vpop.eup %2768  ;;  %v1788_v38 = vmul.f32 %v2767_v47, %v3328_v36  ;;  %v581_v11 = vsel %vm580_vm2, %v3075_v16, %v559_v34 }
 0x9e6   :  { %v1787_v54 = vmul.f32 %v2769_v33, %v3330_v50  ;;  %2566 = vmatmul.mubr.msk.bf16.vlgmr.msra.gmra.mrb[32].mxu0 %vm178_vm4, %v1705_v6 }
 0x9e7   :  { %2576 = vmatpush3.bf16.msra.mxu0 %v2646_v27  ;;  %v1118_v28 = vpop.permute.xlu0 %1117  ;;  %2577 = vmatprep.mubr.msk.bf16.mxu0 %vm2845_vm1, %v2844_v1 }
 0x9e8   :  { %v2771_v57 = vpop.eup %2770  ;;  %v567_v44 = vpop.permute.xlu1 %566  ;;  %v1789_v60 = vpack.c.bf16 %v1788_v38, %v1787_v54  ;;  %2587 = vmatprep.subr.bf16.mxu0 %v2648_v52  ;;  %v1139_v12 = vsel %vm580_vm2, %v3166_v35, %v1118_v28 }
 0x9e9   :  { %v2773_v0 = vpop.eup %2772  ;;  %v1872_v36 = vmul.f32 %v2771_v57, %v3336_v58  ;;  %v583_v55 = vsel %vm178_vm4, %v581_v11, %v567_v44 }
 0x9ea   :  { %v1871_v50 = vmul.f32 %v2773_v0, %v3338_v59  ;;  %2572 = vmatmul.mubr.msk.bf16.vlgmr.msra.gmra.mrb[40].mxu1 %vm178_vm4, %v1789_v60  ;;  %v2649_v59 = vld [vmem:[%s3543_s6 + $0x8] sm:$0xff]  }
 0x9eb   :  { %2582 = vmatpush3.bf16.msra.mxu1 %v2647_v56  ;;  %v575_v13 = vpop.permute.xlu0 %574  ;;  %2583 = vmatprep.mubr.msk.bf16.mxu1 %vm2845_vm1, %v2844_v1 }
 0x9ec   :  { %v2775_v15 = vpop.eup %2774  ;;  %v586_v18 = vsel %vm585_vm3, %v583_v55, %v575_v13  ;;  %v569_v25 = vpop.permute.xlu1 %568  ;;  %v1873_v58 = vpack.c.bf16 %v1872_v36, %v1871_v50 }
 0x9ed   :  { %v2777_v19 = vpop.eup %2776  ;;  %v1956_v16 = vmul.f32 %v2775_v15, %v3344_v26  ;;  %v590_v29 = vmin.f32 %v586_v18, 0.0  ;;  %v584_v63 = vsel %vm178_vm4, %v582_v51, %v569_v25  ;;  %vm588_vm1 = vcmp.gt.f32.partialorder %v586_v18, 0.0 }
 0x9ee   :  { %v1955_v22 = vmul.f32 %v2777_v19, %v3346_v62  ;;  %2578 = vmatmul.mubr.msk.bf16.vlgmr.msra.gmra.mrb[36].mxu0 %vm178_vm4, %v1873_v58 }
 0x9ef   :  { %v1126_v23 = vpop.permute.xlu0 %1125  ;;  %2588 = vmatpush3.bf16.msra.mxu0 %v2648_v52  ;;  %v592_v3 = vmul.f32 1.442695, %v590_v29 }
 0x9f0   :  { %v1120_v1 = vpop.permute.xlu1 %1119  ;;  %v1957_v49 = vpack.c.bf16 %v1956_v16, %v1955_v22  ;;  %2589 = vmatprep.subr.bf16.mxu0 %v2649_v59  ;;  %v1141_v26 = vsel %vm178_vm4, %v1139_v12, %v1126_v23 }
 0x9f1   :  { %2778 = vpow2.f32 %v592_v3  ;;  %v1140_v9 = vsel %vm580_vm2, %v3168_v39, %v1120_v1 }
 0x9f2   :  { %2584 = vmatmul.mubr.msk.bf16.vlgmr.msra.gmra.mrb[44].mxu1 %vm178_vm4, %v1957_v49 }
 0x9f3   :  { %v1134_v62 = vpop.permute.xlu0 %1133  ;;  %2590 = vmatpush3.bf16.msra.mxu0 %v2649_v59 }
 0x9f4   :  { %v1143_v2 = vsel %vm585_vm3, %v1141_v26, %v1134_v62  ;;  %v577_v21 = vpop.permute.xlu1 %576 }
 0x9f5   :  { %v587_v24 = vsel %vm585_vm3, %v584_v63, %v577_v21  ;;  %v1147_v4 = vmin.f32 %v1143_v2, 0.0  ;;  %vm1145_vm6 = vcmp.gt.f32.partialorder %v1143_v2, 0.0 }
 0x9f6   :  { %v591_v35 = vmin.f32 %v587_v24, 0.0  ;;  %vm589_vm5 = vcmp.gt.f32.partialorder %v587_v24, 0.0 }
 0x9f7   :  { %v1149_v32 = vmul.f32 1.442695, %v1147_v4 }
 0x9f8   :  { %v594_v10 = vmul.f32 1.442695, %v591_v35  ;;  %v1128_v5 = vpop.permute.xlu1 %1127 }
 0x9f9   :  { %v1142_v46 = vsel %vm178_vm4, %v1140_v9, %v1128_v5 }
 0x9fa   :  { %2780 = vpow2.f32 %v594_v10 }
 0x9fb   :  { %2782 = vpow2.f32 %v1149_v32  ;;  %v2779_v37 = vpop.eup %2778 }
 0x9fc   :  { %v1136_v7 = vpop.permute.xlu1 %1135  ;;  %v2302_v61 = vadd.f32 -1.0, %v2779_v37 }
 0x9fd   :  { %v1144_v53 = vsel %vm585_vm3, %v1142_v46, %v1136_v7 }
 0x9fe   :  { %v1148_v41 = vmin.f32 %v1144_v53, 0.0  ;;  %v3442_v8 = vsel %vm588_vm1, %v586_v18, %v2302_v61  ;;  %vm1146_vm7 = vcmp.gt.f32.partialorder %v1144_v53, 0.0 }
 0xa00   :  { %v1151_v20 = vmul.f32 1.442695, %v1148_v41 }
 0xa02   :  { %2784 = vpow2.f32 %v1151_v20 }
 0xa04   :  { %v2781_v17 = vpop.eup %2780 }
 0xa05   :  { %v2303_v30 = vadd.f32 -1.0, %v2781_v17  ;;  %v2783_v39 = vpop.eup %2782 }
 0xa06   :  { %v2329_v40 = vadd.f32 -1.0, %v2783_v39 }
 0xa07   :  { %v3444_v42 = vsel %vm589_vm5, %v587_v24, %v2303_v30 }
 0xa08   :  { %v2059_v43 = vpack.c.bf16 %v3444_v42, %v3442_v8  ;;  %v3449_v34 = vsel %vm1145_vm6, %v1143_v2, %v2329_v40  ;;  %v3491_v40 = vld [vmem:[%s3545_s8] ss:$0 sm:$0xff] }
 0xa0a   :  { %2591 = vmatprep.mubr.msk.bf16.mxu0 %vm44_vm0, %v2059_v43 }
 0xa0c   :  { %v2785_v27 = vpop.eup %2784 }
 0xa0d   :  { %v2330_v47 = vadd.f32 -1.0, %v2785_v27 }
 0xa0f   :  { %v3451_v6 = vsel %vm1146_vm7, %v1144_v53, %v2330_v47  ;;  %v2381_v53 = vld [vmem:[%s3544_s7] ss:$0 sm:$0xff]  ;;  %s2854_s7 = smov [#allocation2]  }
 0xa10   :  { %v2060_v52 = vpack.c.bf16 %v3451_v6, %v3449_v34  ;;  %s2273_s8 = sshll.u32 %s2854_s7, 4  ;;  %s2274_s8 = int_to_ptr.vmem [resolvable:$true] %s2273_s8 }
 0xa11   :  { %s2820_s25 = scalar_lea.vmem %s2274_s8, 256  ;;  %p2825_p1 = scmp.lt.s32.totalorder %s2274_s8, %s2274_s8 }
 0xa12   :  { %2592 = vmatmul.mubr.msk.bf16.vlgmr.msra.gmra.mrb[40].mxu0 %vm44_vm0, %v2060_v52  ;;  %p2821_p0 = scmp.ne.s32.totalorder %s2274_s8, %s2820_s25  ;;  %p2826_p2 = scmp.lt.s32.totalorder %s2820_s25, %s2820_s25 }
 0xa14   :  { %p2827_p3 = por %p2826_p2, %p2825_p1 }
 0xa16   :  { %p2828_p4 = pnand %p2827_p3, %p2821_p0 }
 0xa2b   :  { %v1388_v33 = vpop.f32.mrb[24].mxu0 }
 0xa2c   :  { %1565 = vrot.lane.b32.xlu0 %v1388_v33, %s2851_s12  ;;  %v2543_v38 = vpop.f32.mrb[25].mxu0 }
 0xa2d   :  { %v1391_v54 = vpop.f32.mrb[26].mxu0 }
 0xa2e   :  { %1567 = vrot.lane.b32.xlu1 %v1391_v54, %s2851_s12  ;;  %v2544_v28 = vpop.f32.mrb[27].mxu0 }
 0xa30   :  { %1573 = vrot.lane.b32.xlu0 %v3276_v48, %s2852_s15 }
 0xa32   :  { %1575 = vrot.lane.b32.xlu1 %v3280_v14, %s2852_s15 }
 0xa33   :  { %v1556_v56 = vpop.f32.mrb[28].mxu0 }
 0xa34   :  { %1581 = vrot.lane.b32.xlu0 %v1556_v56, %s2853_s16  ;;  %v2555_v57 = vpop.f32.mrb[29].mxu0 }
 0xa35   :  { %v1559_v44 = vpop.f32.mrb[30].mxu0 }
 0xa36   :  { %1583 = vrot.lane.b32.xlu1 %v1559_v44, %s2853_s16  ;;  %v2556_v60 = vpop.f32.mrb[31].mxu0 }
 0xa9e   :  { %v1566_v0 = vpop.permute.xlu0 %1565 }
 0xa9f   :  { %v1587_v55 = vsel %vm580_vm2, %v3272_v31, %v1566_v0 }
 0xaa0   :  { %v1568_v36 = vpop.permute.xlu1 %1567 }
 0xaa1   :  { %v1588_v14 = vsel %vm580_vm2, %v3274_v45, %v1568_v36 }
 0xaa2   :  { %v1574_v50 = vpop.permute.xlu0 %1573 }
 0xaa3   :  { %v1589_v48 = vsel %vm178_vm4, %v1587_v55, %v1574_v50 }
 0xaa4   :  { %v1576_v11 = vpop.permute.xlu1 %1575 }
 0xaa5   :  { %v1590_v18 = vsel %vm178_vm4, %v1588_v14, %v1576_v11 }
 0xaa6   :  { %v1582_v13 = vpop.permute.xlu0 %1581 }
 0xaa7   :  { %v1591_v15 = vsel %vm585_vm3, %v1589_v48, %v1582_v13 }
 0xaa8   :  { %v1595_v25 = vmin.f32 %v1591_v15, 0.0  ;;  %v1584_v58 = vpop.permute.xlu1 %1583  ;;  %vm1593_vm8 = vcmp.gt.f32.partialorder %v1591_v15, 0.0 }
 0xaa9   :  { %v1592_v59 = vsel %vm585_vm3, %v1590_v18, %v1584_v58 }
 0xaaa   :  { %v1597_v19 = vmul.f32 1.442695, %v1595_v25  ;;  %v1596_v16 = vmin.f32 %v1592_v59, 0.0  ;;  %vm1594_vm9 = vcmp.gt.f32.partialorder %v1592_v59, 0.0 }
 0xaac   :  { %2786 = vpow2.f32 %v1597_v19  ;;  %v1599_v22 = vmul.f32 1.442695, %v1596_v16 }
 0xaae   :  { %2788 = vpow2.f32 %v1599_v22 }
 0xab6   :  { %v2787_v31 = vpop.eup %2786 }
 0xab7   :  { %v2354_v29 = vadd.f32 -1.0, %v2787_v31 }
 0xab8   :  { %v2789_v23 = vpop.eup %2788 }
 0xab9   :  { %v2355_v1 = vadd.f32 -1.0, %v2789_v23  ;;  %v1752_v49 = vpop.f32.mrb[32].mxu0  ;;  %v3472_v12 = vsel %vm1593_vm8, %v1591_v15, %v2354_v29 }
 0xaba   :  { %v2567_v45 = vpop.f32.mrb[33].mxu0 }
 0xabb   :  { %v3474_v3 = vsel %vm1594_vm9, %v1592_v59, %v2355_v1  ;;  %v1755_v51 = vpop.f32.mrb[34].mxu0 }
 0xabc   :  { %v2061_v26 = vpack.c.bf16 %v3474_v3, %v3472_v12  ;;  %v2568_v62 = vpop.f32.mrb[35].mxu0 }
 0xabd   :  { %v1836_v63 = vpop.f32.mrb[40].mxu1 }
 0xabe   :  { %2595 = vmatprep.mubr.msk.bf16.mxu0 %vm44_vm0, %v2061_v26  ;;  %2013 = vrot.lane.b32.xlu0 %v1836_v63, %s2851_s12  ;;  %v2573_v2 = vpop.f32.mrb[41].mxu1 }
 0xabf   :  { %v1839_v21 = vpop.f32.mrb[42].mxu1 }
 0xac0   :  { %2015 = vrot.lane.b32.xlu1 %v1839_v21, %s2851_s12  ;;  %v2574_v24 = vpop.f32.mrb[43].mxu1 }
 0xac1   :  { %v1920_v4 = vpop.f32.mrb[36].mxu0 }
 0xac2   :  { %v2579_v35 = vpop.f32.mrb[37].mxu0  ;;  %2021 = vrot.lane.b32.xlu0 %v1920_v4, %s2852_s15 }
 0xac3   :  { %v1923_v10 = vpop.f32.mrb[38].mxu0 }
 0xac4   :  { %v2580_v5 = vpop.f32.mrb[39].mxu0  ;;  %2023 = vrot.lane.b32.xlu1 %v1923_v10, %s2852_s15 }
 0xac5   :  { %v2004_v32 = vpop.f32.mrb[44].mxu1 }
 0xac6   :  { %2029 = vrot.lane.b32.xlu0 %v2004_v32, %s2853_s16  ;;  %v2585_v9 = vpop.f32.mrb[45].mxu1 }
 0xac7   :  { %v2007_v46 = vpop.f32.mrb[46].mxu1 }
 0xac8   :  { %2031 = vrot.lane.b32.xlu1 %v2007_v46, %s2853_s16  ;;  %v2586_v7 = vpop.f32.mrb[47].mxu1 }
 0xae5   :  { %v2593_v41 = vpop.f32.mrb[40].mxu0 }
 0xae6   :  { %v2136_v37 = vadd.f32 %v2593_v41, %v2381_v53  ;;  %v2127_v20 = vpop.f32.mrb[41].mxu0 }
 0xae7   :  { %v2128_v61 = vadd.f32 %v2381_v53, %v2127_v20  ;;  %v2594_v17 = vpop.f32.mrb[42].mxu0 }
 0xae8   :  { %2790 = vtanh.f32 %v2136_v37  ;;  %v2130_v30 = vpop.f32.mrb[43].mxu0  ;;  %v2139_v43 = vadd.f32 %v2594_v17, %v2381_v53 }
 0xae9   :  { %v2131_v39 = vadd.f32 %v2381_v53, %v2130_v30  ;;  %2792 = vtanh.f32 %v2128_v61 }
 0xaeb   :  { %2794 = vtanh.f32 %v2131_v39 }
 0xaec   :  { %2796 = vtanh.f32 %v2139_v43 }
 0xaf2   :  { %v2791_v27 = vpop.eup %2790 }
 0xaf3   :  { %v2174_v47 = vmul.f32 %v2791_v27, %v3491_v40  ;;  %v2793_v52 = vpop.eup %2792 }
 0xaf4   :  { %v2172_v54 = vmul.f32 %v2793_v52, %v3491_v40 }
 0xaf5   :  { %v2795_v33 = vpop.eup %2794  ;;  %2184 = vadd.xlane.f32.xlu0 %v2174_v47 }
 0xaf6   :  { %v2173_v38 = vmul.f32 %v2795_v33, %v3491_v40  ;;  %v2797_v28 = vpop.eup %2796 }
 0xaf7   :  { %v2175_v56 = vmul.f32 %v2797_v28, %v3491_v40 }
 0xaf8   :  { %2182 = vadd.xlane.f32.xlu1 %v2173_v38 }
 0xaf9   :  { %2180 = vadd.xlane.f32.xlu0 %v2172_v54 }
 0xafd   :  { %2186 = vadd.xlane.f32.xlu0 %v2175_v56 }
 0xb30   :  { %v2014_v57 = vpop.permute.xlu0 %2013 }
 0xb31   :  { %v2035_v36 = vsel %vm580_vm2, %v1752_v49, %v2014_v57 }
 0xb32   :  { %v2016_v44 = vpop.permute.xlu1 %2015 }
 0xb33   :  { %v2036_v55 = vsel %vm580_vm2, %v1755_v51, %v2016_v44 }
 0xb34   :  { %v2022_v60 = vpop.permute.xlu0 %2021 }
 0xb35   :  { %v2037_v50 = vsel %vm178_vm4, %v2035_v36, %v2022_v60 }
 0xb36   :  { %v2024_v0 = vpop.permute.xlu1 %2023 }
 0xb37   :  { %v2038_v13 = vsel %vm178_vm4, %v2036_v55, %v2024_v0 }
 0xb38   :  { %v2030_v11 = vpop.permute.xlu0 %2029 }
 0xb39   :  { %v2039_v48 = vsel %vm585_vm3, %v2037_v50, %v2030_v11 }
 0xb3a   :  { %v2043_v14 = vmin.f32 %v2039_v48, 0.0  ;;  %v2032_v15 = vpop.permute.xlu1 %2031  ;;  %vm2041_vm10 = vcmp.gt.f32.partialorder %v2039_v48, 0.0 }
 0xb3b   :  { %v2040_v18 = vsel %vm585_vm3, %v2038_v13, %v2032_v15 }
 0xb3c   :  { %v2045_v25 = vmul.f32 1.442695, %v2043_v14  ;;  %v2044_v58 = vmin.f32 %v2040_v18, 0.0  ;;  %vm2042_vm11 = vcmp.gt.f32.partialorder %v2040_v18, 0.0 }
 0xb3e   :  { %2798 = vpow2.f32 %v2045_v25  ;;  %v2047_v59 = vmul.f32 1.442695, %v2044_v58 }
 0xb40   :  { %2800 = vpow2.f32 %v2047_v59 }
 0xb48   :  { %v2799_v19 = vpop.eup %2798 }
 0xb49   :  { %v2379_v16 = vadd.f32 -1.0, %v2799_v19 }
 0xb4a   :  { %v2801_v22 = vpop.eup %2800 }
 0xb4b   :  { %v2380_v31 = vadd.f32 -1.0, %v2801_v22  ;;  %v3503_v29 = vsel %vm2041_vm10, %v2039_v48, %v2379_v16 }
 0xb4d   :  { %v3505_v23 = vsel %vm2042_vm11, %v2040_v18, %v2380_v31 }
 0xb4e   :  { %v2062_v1 = vpack.c.bf16 %v3505_v23, %v3503_v29 }
 0xb50   :  { %2596 = vmatmul.mubr.msk.bf16.gmra.mrb[44].mxu0 %vm44_vm0, %v2062_v1 }
 0xb82   :  { %v2185_v7 = vpop.xlane.xlu0 %2184 }
 0xb85   :  { %v2183_v37 = vpop.xlane.xlu1 %2182 }
 0xc23   :  { %v2597_v49 = vpop.f32.mrb[44].mxu0 }
 0xc24   :  { %v2152_v45 = vadd.f32 %v2597_v49, %v2381_v53  ;;  %v2143_v51 = vpop.f32.mrb[45].mxu0 }
 0xc25   :  { %v2144_v26 = vadd.f32 %v2381_v53, %v2143_v51  ;;  %v2598_v62 = vpop.f32.mrb[46].mxu0 }
 0xc26   :  { %v2146_v63 = vpop.f32.mrb[47].mxu0  ;;  %v2155_v2 = vadd.f32 %v2598_v62, %v2381_v53 }
 0xc27   :  { %2802 = vtanh.f32 %v2144_v26  ;;  %v2147_v21 = vadd.f32 %v2381_v53, %v2146_v63  ;;  %v2181_v53 = vpop.xlane.xlu0 %2180 }
 0xc28   :  { %2804 = vtanh.f32 %v2152_v45  ;;  %v2196_v61 = vadd.f32 %v2183_v37, %v2181_v53 }
 0xc29   :  { %2806 = vtanh.f32 %v2147_v21 }
 0xc2a   :  { %2808 = vtanh.f32 %v2155_v2  ;;  %v2197_v30 = vrot.slane %v2196_v61, 4 }
 0xc2b   :  { %v2187_v41 = vpop.xlane.xlu0 %2186 }
 0xc2c   :  { %v2204_v20 = vadd.f32 %v2187_v41, %v2185_v7  ;;  %v2198_v43 = vadd.f32 %v2197_v30, %v2196_v61 }
 0xc2e   :  { %v2205_v17 = vrot.slane %v2204_v20, 4  ;;  %v2199_v52 = vrot.slane %v2198_v43, 2 }
 0xc30   :  { %v2206_v39 = vadd.f32 %v2205_v17, %v2204_v20  ;;  %v2200_v28 = vadd.f32 %v2199_v52, %v2198_v43 }
 0xc31   :  { %v2803_v24 = vpop.eup %2802 }
 0xc32   :  { %v2805_v4 = vpop.eup %2804  ;;  %v2176_v35 = vmul.f32 %v2803_v24, %v3491_v40  ;;  %v2207_v27 = vrot.slane %v2206_v39, 2  ;;  %v2201_v36 = vrot.slane %v2200_v28, 1 }
 0xc33   :  { %v2807_v10 = vpop.eup %2806  ;;  %v2178_v9 = vmul.f32 %v2805_v4, %v3491_v40 }
 0xc34   :  { %2188 = vadd.xlane.f32.xlu1 %v2176_v35  ;;  %v2177_v5 = vmul.f32 %v2807_v10, %v3491_v40  ;;  %v2809_v32 = vpop.eup %2808  ;;  %v2208_v38 = vadd.f32 %v2207_v27, %v2206_v39  ;;  %v2202_v14 = vadd.f32 %v2201_v36, %v2200_v28 }
 0xc35   :  { %v2179_v46 = vmul.f32 %v2809_v32, %v3491_v40 }
 0xc36   :  { %2190 = vadd.xlane.f32.xlu0 %v2177_v5  ;;  %v2209_v44 = vrot.slane %v2208_v38, 1  ;;  %v2203_v19 = vmul.f32 0.0625, %v2202_v14 }
 0xc38   :  { %2192 = vadd.xlane.f32.xlu1 %v2178_v9  ;;  %v2210_v55 = vadd.f32 %v2209_v44, %v2208_v38 }
 0xc3a   :  { %2194 = vadd.xlane.f32.xlu0 %v2179_v46  ;;  %v2211_v25 = vmul.f32 0.0625, %v2210_v55 }
 0xc3c   :  { %v2228_v31 = vmax.f32 %v2203_v19, %v2211_v25 }
 0xcc1   :  { %v2189_v47 = vpop.xlane.xlu1 %2188 }
 0xcc3   :  { %v2191_v33 = vpop.xlane.xlu0 %2190 }
 0xcc4   :  { %v2212_v54 = vadd.f32 %v2191_v33, %v2189_v47 }
 0xcc5   :  { %v2193_v40 = vpop.xlane.xlu1 %2192 }
 0xcc6   :  { %v2213_v56 = vrot.slane %v2212_v54, 4 }
 0xcc7   :  { %v2195_v57 = vpop.xlane.xlu0 %2194 }
 0xcc8   :  { %v2214_v60 = vadd.f32 %v2213_v56, %v2212_v54  ;;  %v2220_v0 = vadd.f32 %v2195_v57, %v2193_v40 }
 0xcca   :  { %v2215_v50 = vrot.slane %v2214_v60, 2  ;;  %v2221_v11 = vrot.slane %v2220_v0, 4 }
 0xccc   :  { %v2216_v48 = vadd.f32 %v2215_v50, %v2214_v60  ;;  %v2222_v13 = vadd.f32 %v2221_v11, %v2220_v0 }
 0xcce   :  { %v2217_v15 = vrot.slane %v2216_v48, 1  ;;  %v2223_v18 = vrot.slane %v2222_v13, 2 }
 0xcd0   :  { %v2218_v58 = vadd.f32 %v2217_v15, %v2216_v48  ;;  %v2224_v59 = vadd.f32 %v2223_v18, %v2222_v13 }
 0xcd2   :  { %v2219_v16 = vmul.f32 0.0625, %v2218_v58  ;;  %v2225_v22 = vrot.slane %v2224_v59, 1 }
 0xcd4   :  { %v2226_v1 = vadd.f32 %v2225_v22, %v2224_v59  ;;  %v2229_v49 = vmax.f32 %v2228_v31, %v2219_v16 }
 0xcd6   :  { %v2227_v45 = vmul.f32 0.0625, %v2226_v1 }
 0xcd8   :  { %v2230_v51 = vmax.f32 %v2229_v49, %v2227_v45 }
 0xcda   :  { %v2231_v26 = vsub.f32 %v2203_v19, %v2230_v51  ;;  %v2234_v62 = vsub.f32 %v2211_v25, %v2230_v51  ;;  %v2237_v63 = vsub.f32 %v2219_v16, %v2230_v51  ;;  %v2240_v2 = vsub.f32 %v2227_v45, %v2230_v51 }
 0xcdc   :  { %v2232_v21 = vmul.f32 1.442695, %v2231_v26  ;;  %v2235_v24 = vmul.f32 1.442695, %v2234_v62  ;;  %v2238_v4 = vmul.f32 1.442695, %v2237_v63 }
 0xcdd   :  { %v2241_v35 = vmul.f32 1.442695, %v2240_v2 }
 0xcde   :  { %2810 = vpow2.f32 %v2232_v21 }
 0xcdf   :  { %2812 = vpow2.f32 %v2235_v24 }
 0xce0   :  { %2814 = vpow2.f32 %v2238_v4 }
 0xce1   :  { %2816 = vpow2.f32 %v2241_v35 }
 0xce8   :  { %v2811_v10 = vpop.eup %2810 }
 0xce9   :  { %v2813_v5 = vpop.eup %2812 }
 0xcea   :  { %v2243_v32 = vadd.f32 %v2813_v5, %v2811_v10  ;;  %v2815_v9 = vpop.eup %2814 }
 0xceb   :  { %v2817_v7 = vpop.eup %2816 }
 0xcec   :  { %v2244_v46 = vadd.f32 %v2815_v9, %v2243_v32 }
 0xcee   :  { %v2245_v53 = vadd.f32 %v2817_v7, %v2244_v46 }
 0xcf0   :  { %2818 = vrcp.f32 %v2245_v53 }
 0xcfa   :  { %v2819_v41 = vpop.eup %2818 }
 0xcfb   :  { %v2248_v37 = vmul.f32 %v2819_v41, %v2811_v10  ;;  %v2251_v20 = vmul.f32 %v2819_v41, %v2813_v5  ;;  %v2256_v61 = vmul.f32 %v2819_v41, %v2815_v9  ;;  %v2261_v17 = vmul.f32 %v2819_v41, %v2817_v7 }
 0xcfd   :  { %v2249_v30 = vmul.f32 %v2248_v37, %v3442_v8  ;;  %v2250_v39 = vmul.f32 %v2248_v37, %v3444_v42  ;;  %v2252_v43 = vmul.f32 %v2251_v20, %v3449_v34  ;;  %v2253_v27 = vmul.f32 %v2251_v20, %v3451_v6 }
 0xcfe   :  { %v2257_v33 = vmul.f32 %v2256_v61, %v3472_v12  ;;  %v2258_v38 = vmul.f32 %v2256_v61, %v3474_v3  ;;  %v2262_v56 = vmul.f32 %v2261_v17, %v3503_v29  ;;  %v2263_v8 = vmul.f32 %v2261_v17, %v3505_v23 }
 0xcff   :  { %v2254_v47 = vadd.f32 %v2252_v43, %v2249_v30  ;;  %v2255_v52 = vadd.f32 %v2253_v27, %v2250_v39 }
 0xd01   :  { %v2259_v54 = vadd.f32 %v2257_v33, %v2254_v47  ;;  %v2260_v28 = vadd.f32 %v2258_v38, %v2255_v52 }
 0xd03   :  { %v2264_v40 = vadd.f32 %v2262_v56, %v2259_v54  ;;  %v2265_v42 = vadd.f32 %v2263_v8, %v2260_v28 }
 0xd05   :  { %2266 = vst.msk [vmem:[#allocation2] sm:$0xff] %vm44_vm0, %v2264_v40  ;;  %2267 = vst.msk [vmem:[#allocation2 + $0x8] sm:$0xff] %vm44_vm0, %v2265_v42 }
 0xd06   :  { %2831 = shalt.err (!%p2828_p4)
}
 0xd07   :  { %s2832_s27 = scalar_lea.hbm %s3546_s9, 256 }
 0xd08   :  { %p2833_p5 = scmp.ne.s32.totalorder %s3546_s9, %s2832_s27  ;;  %p2836_p6 = scmp.lt.u32.totalorder %s2832_s27, %s3546_s9 }
 0xd0a   :  { %p2838_p7 = pnand %p2836_p6, %p2833_p5 }
 0xd0c   :  { %2841 = shalt.err (!%p2838_p7)
}
 0xd0d   :  { %s2855_s30 = smov 128  }
 0xd0e   :  { %2279 = dma.vmem_to_hbm [thread:$0]  %s2274_s8, 256, %s3546_s9, [#allocation3], %s2855_s30, %s2855_s30, %s2851_s12  }
 0xd0f   :  { %2842 = dma.done.wait [#allocation3], 256  }
 0xd10   :  { %2843 = vsyncadd [#allocation3], 4294967040 }
 0xd11   :  { %2283 = vsyncpa [#allocation3], 1 }

</bundles_post_ra>
